<compile_context>
chip_gen: v5e
topology: v5e:2x2
jax: 0.10.0
libtpu: 0.0.40
codegen_flags: <defaults>
</compile_context>

<pallas_src>
import jax
import jax.numpy as jnp
from jax.experimental import pallas as pl
from jax.experimental.pallas import tpu as pltpu

# --- synthetic quant_config (module __init__): attn.attn_map = {n_bits: 8, sym: False, group: 'column'}
N_BITS = 8
SYM = False  # attention maps are non-negative -> asymmetric dynamic quant

_MiB = 1024 * 1024


def _tpu_generation():
    """(target_block_bytes, physical_vmem_bytes, num_tensorcores) for the attached TPU."""
    kind = ""
    try:
        kind = jax.devices()[0].device_kind.lower()
    except Exception:
        pass
    if "v7" in kind:
        return 4 * _MiB, 64 * _MiB, 2        # v7x: 64 MiB VMEM per TC, 2 TCs per chip
    if "v6" in kind:
        return 6 * _MiB, 128 * _MiB, 1       # v6e
    if "v5" in kind and ("lite" in kind or "5e" in kind):
        return 2 * _MiB, 128 * _MiB, 1       # v5e
    return 4 * _MiB, 128 * _MiB, 1           # v4 / v5p / unknown: conservative default


def _vmem_need_bytes(g, nq, tile_nk, itemsize):
    """Conservative scoped-VMEM estimate for one (g, nq, tile_nk) block:
    double-buffered input + output blocks, plus ~2 blocks of in-kernel f32 element
    intermediates (x_q / out before the output cast), plus a fixed margin for the
    tiny per-column stats and compiler scratch."""
    block = g * nq * tile_nk * itemsize
    block_f32 = g * nq * tile_nk * 4
    return 4 * block + 2 * block_f32 + 2 * _MiB


def _pick_tiles(bh, nq, nk, itemsize, target_bytes, vmem_cap, num_tc):
    """Pick (head-group G, key tile TILE_NK).

    Preference order:
      1. widest lane-dense TILE_NK (full Nk, then 2048/1024/512/256/128) whose g=1 block
         fits the per-generation VMEM cap -> long contiguous DMA rows;
      2. grow G to amortize the ~0.35us per-grid-step overhead, but only up to
         target_bytes / the VMEM cap, and only with G dividing B*H exactly;
      3. on multi-TensorCore parts (v7x) shrink G until the leading parallel extent
         divides the core count, so both cores get balanced work.
    Nq is the reduction axis and must stay fully resident, so block size is Nq-driven.
    """
    candidates = [nk] + [c for c in (2048, 1024, 512, 256, 128) if c < nk and nk % c == 0]
    tile_nk = candidates[-1]  # fallback: narrowest candidate
    for cand in candidates:
        if _vmem_need_bytes(1, nq, cand, itemsize) <= vmem_cap:
            tile_nk = cand
            break

    g = 1
    for d in range(bh, 0, -1):
        if bh % d:
            continue
        if (d * nq * tile_nk * itemsize <= target_bytes
                and _vmem_need_bytes(d, nq, tile_nk, itemsize) <= vmem_cap):
            g = d
            break

    if num_tc > 1:
        # Keep the leading parallel extent divisible by the core count when possible.
        while g > 1 and (bh // g) % num_tc != 0:
            g = next(d for d in range(g - 1, 0, -1) if bh % d == 0)
    return g, tile_nk


def _attn_map_quant_kernel(x_ref, o_ref):
    """One (G, Nq, TILE_NK) tile; per-column (key-index) dynamic fake-quant."""
    x = x_ref[...]                                            # native dtype; no f32 copy
    qmax = float(2 ** N_BITS - 1)

    if SYM:
        # symmetric: delta = absmax / (2^(n-1) - 1), zero_point = 0
        qpos = float(2 ** (N_BITS - 1) - 1)
        absmax = jnp.max(jnp.abs(x), axis=-2, keepdims=True).astype(jnp.float32)
        delta = jnp.maximum(absmax / qpos, 1e-8)
        inv_delta = 1.0 / delta                               # tiny (G,1,TILE_NK) divide
        x_q = jnp.clip(jnp.round(x.astype(jnp.float32) * inv_delta), -qpos - 1.0, qpos)
        out = x_q * delta
    else:
        # Per-key-column stats over the query axis (axis=-2).  min/max are exact in the
        # native dtype, so only the tiny stats are cast to f32 — no full-tile f32 temp.
        x_max = jnp.max(x, axis=-2, keepdims=True).astype(jnp.float32)   # (G,1,TILE_NK)
        x_min = jnp.min(x, axis=-2, keepdims=True).astype(jnp.float32)   # (G,1,TILE_NK)
        # delta floored at 1e-8 (PyTorch would emit inf/NaN for a constant column).
        delta = jnp.maximum((x_max - x_min) / qmax, 1e-8)
        # Hoisted reciprocal: the divide touches only the stats; the per-element pass is
        # a single fused cast+mul.  Can differ from x/delta by 1 ulp (see header note).
        inv_delta = 1.0 / delta
        zp = jnp.round(-x_min * inv_delta)
        # Lower clamp at 0 dropped: round() is monotone and round-half-to-even is odd, so
        # round(x*inv_delta) >= round(x_min*inv_delta) = -zp  =>  x_q >= 0 always.
        x_q = jnp.minimum(jnp.round(x.astype(jnp.float32) * inv_delta) + zp, qmax)
        out = (x_q - zp) * delta

    o_ref[...] = out.astype(o_ref.dtype)


def quantized_attention_map(x):
    """Pallas implementation of QuantizedAttentionMap.forward (group='column', quant_mode=True).

    x: [B, H, N, N] attention map  ->  fake-quantized attention map, same shape/dtype.
    """
    B, H, Nq, Nk = x.shape
    assert Nq == Nk, "attention map must be square in the token dims"

    BH = B * H
    itemsize = jnp.dtype(x.dtype).itemsize
    target_bytes, vmem_phys, num_tc = _tpu_generation()
    vmem_cap = (3 * vmem_phys) // 4            # leave headroom for compiler scratch

    # Lane-dense output: pad the key axis to a multiple of 128 (masked partial stores on
    # a ragged last dim are a large lever for mem-bound kernels).  Padded columns are
    # constant 0 -> quantize to 0 -> sliced away below; they do not affect real columns.
    Nk_pad = -(-Nk // 128) * 128
    xf = x.reshape(BH, Nq, Nk)
    if Nk_pad != Nk:
        xf = jnp.pad(xf, ((0, 0), (0, 0), (0, Nk_pad - Nk)))

    g, tile_nk = _pick_tiles(BH, Nq, Nk_pad, itemsize, target_bytes, vmem_cap, num_tc)
    grid = (BH // g, Nk_pad // tile_nk)

    # Always set the scoped-VMEM limit explicitly from buffers + in-kernel temporaries
    # (v5e's 16 MiB default is easy to exceed for mid-size Nq; v7x only has 64 MiB total).
    need = _vmem_need_bytes(g, Nq, tile_nk, itemsize)
    vmem_limit = int(min(max(need, 32 * _MiB), vmem_phys - 4 * _MiB))

    out = pl.pallas_call(
        _attn_map_quant_kernel,
        out_shape=jax.ShapeDtypeStruct(xf.shape, x.dtype),
        grid=grid,
        in_specs=[pl.BlockSpec((g, Nq, tile_nk), lambda i, j: (i, 0, j))],
        out_specs=pl.BlockSpec((g, Nq, tile_nk), lambda i, j: (i, 0, j)),
        compiler_params=pltpu.CompilerParams(
            dimension_semantics=("parallel", "parallel"),
            vmem_limit_bytes=vmem_limit),
    )(xf)

    if Nk_pad != Nk:
        out = out[..., :Nk]
    return out.reshape(B, H, Nq, Nk)


def _reference(x, hoisted=True):
    """Pure-JAX reference mirroring the PyTorch path
    (permute -> reshape -> per-row dynamic quant -> reshape -> permute).
    hoisted=True uses the kernel's x*(1/delta) formulation; hoisted=False uses the
    literal x/delta of DynamicQuantizer.  Returns (output, per-group delta)."""
    B, H, N, _ = x.shape
    xt = jnp.transpose(x, (0, 1, 3, 2)).reshape(-1, N).astype(jnp.float32)
    qmax = float(2 ** N_BITS - 1)
    x_max = jnp.max(xt, axis=-1, keepdims=True)
    x_min = jnp.min(xt, axis=-1, keepdims=True)
    delta = jnp.maximum((x_max - x_min) / qmax, 1e-8)
    if hoisted:
        inv = 1.0 / delta
        zp = jnp.round(-x_min * inv)
        x_q = jnp.clip(jnp.round(xt * inv) + zp, 0.0, qmax)
    else:
        zp = jnp.round(-x_min / delta)
        x_q = jnp.clip(jnp.round(xt / delta) + zp, 0.0, qmax)
    deq = ((x_q - zp) * delta).reshape(B, H, N, N)
    return jnp.transpose(deq, (0, 1, 3, 2)).astype(x.dtype), delta


if __name__ == "__main__":
    B, H, N = 2, 4, 128  # batch, heads, tokens (small, lane-dense square attention map)
    key = jax.random.PRNGKey(0)
    logits = jax.random.normal(key, (B, H, N, N), dtype=jnp.float32)
    x = jax.nn.softmax(logits, axis=-1)  # attention-map-like input in [0, 1]

    y = jax.jit(quantized_attention_map)(x)
    y = jax.block_until_ready(y)

    assert y.shape == x.shape and y.dtype == x.dtype

    # (1) Tight check against the exact in-kernel math (hoisted reciprocal).
    y_ref, delta = _reference(x, hoisted=True)
    assert jnp.allclose(y, y_ref, atol=1e-6, rtol=1e-6), "mismatch vs hoisted reference"

    # (2) Bounded check against the literal PyTorch DynamicQuantizer form (x / delta):
    #     the hoisted reciprocal may flip round() at an exact half-level boundary, so the
    #     divergence is bounded by a couple of quant levels per element.
    y_div, _ = _reference(x, hoisted=False)
    max_err = float(jnp.max(jnp.abs(y.astype(jnp.float32) - y_div.astype(jnp.float32))))
    assert max_err <= 2.0 * float(jnp.max(delta)) + 1e-6, \
        "divergence vs exact-divide reference exceeds bound"

    print("KERNEL_OK")
</pallas_src>

<mosaic_0001>
module attributes {stable_mosaic.version = 11 : i64} {
  func.func @_attn_map_quant_kernel(%arg0: i32, %arg1: i32, %arg2: memref<8x128x128xf32, #tpu.memory_space<vmem>>, %arg3: memref<8x128x128xf32, #tpu.memory_space<vmem>>) attributes {dimension_semantics = [#tpu.dimension_semantics<parallel>, #tpu.dimension_semantics<parallel>], iteration_bounds = array<i64: 1, 1>, scalar_prefetch = 0 : i64, scratch_operands = 0 : i64, tpu.core_type = #tpu.core_type<tc>, window_params = [{transform_indices = @transform_0, window_bounds = array<i64: 8, 128, 128>}, {transform_indices = @transform_1, window_bounds = array<i64: 8, 128, 128>}]} {
    %c0 = arith.constant 0 : index
    %c0_0 = arith.constant 0 : index
    %c0_1 = arith.constant 0 : index
    %0 = vector.load %arg2[%c0, %c0_0, %c0_1] : memref<8x128x128xf32, #tpu.memory_space<vmem>>, vector<8x128x128xf32>
    %cst = arith.constant dense<0xFF800000> : vector<8x128xf32>
    %1 = vector.multi_reduction <maximumf>, %0, %cst [1] : vector<8x128x128xf32> to vector<8x128xf32>
    %2 = vector.shape_cast %1 : vector<8x128xf32> to vector<8x1x128xf32>
    %cst_2 = arith.constant dense<0x7F800000> : vector<8x128xf32>
    %3 = vector.multi_reduction <minimumf>, %0, %cst_2 [1] : vector<8x128x128xf32> to vector<8x128xf32>
    %4 = vector.shape_cast %3 : vector<8x128xf32> to vector<8x1x128xf32>
    %5 = arith.subf %2, %4 : vector<8x1x128xf32>
    %cst_3 = arith.constant 2.550000e+02 : f32
    %6 = vector.broadcast %cst_3 : f32 to vector<8x1x128xf32>
    %7 = arith.divf %5, %6 : vector<8x1x128xf32>
    %cst_4 = arith.constant 9.99999993E-9 : f32
    %8 = vector.broadcast %cst_4 : f32 to vector<8x1x128xf32>
    %9 = arith.maximumf %7, %8 : vector<8x1x128xf32>
    %cst_5 = arith.constant 1.000000e+00 : f32
    %10 = vector.broadcast %cst_5 : f32 to vector<8x1x128xf32>
    %11 = arith.divf %10, %9 : vector<8x1x128xf32>
    %cst_6 = arith.constant 0.000000e+00 : f32
    %12 = vector.broadcast %cst_6 : f32 to vector<8x1x128xf32>
    %13 = arith.subf %12, %4 : vector<8x1x128xf32>
    %14 = arith.mulf %13, %11 : vector<8x1x128xf32>
    %15 = math.roundeven %14 : vector<8x1x128xf32>
    %16 = vector.broadcast %11 : vector<8x1x128xf32> to vector<8x128x128xf32>
    %17 = arith.mulf %0, %16 : vector<8x128x128xf32>
    %18 = math.roundeven %17 : vector<8x128x128xf32>
    %19 = vector.broadcast %15 : vector<8x1x128xf32> to vector<8x128x128xf32>
    %20 = arith.addf %18, %19 : vector<8x128x128xf32>
    %cst_7 = arith.constant 2.550000e+02 : f32
    %21 = vector.broadcast %cst_7 : f32 to vector<8x128x128xf32>
    %22 = arith.minimumf %20, %21 : vector<8x128x128xf32>
    %23 = vector.broadcast %15 : vector<8x1x128xf32> to vector<8x128x128xf32>
    %24 = arith.subf %22, %23 : vector<8x128x128xf32>
    %25 = vector.broadcast %9 : vector<8x1x128xf32> to vector<8x128x128xf32>
    %26 = arith.mulf %24, %25 : vector<8x128x128xf32>
    %c0_8 = arith.constant 0 : index
    %c0_9 = arith.constant 0 : index
    %c0_10 = arith.constant 0 : index
    %27 = vector.load %arg3[%c0_8, %c0_9, %c0_10] : memref<8x128x128xf32, #tpu.memory_space<vmem>>, vector<8x128x128xf32>
    tpu.vector_store %arg3[%c0_8, %c0_9, %c0_10], %26 {strides = array<i32>} : memref<8x128x128xf32, #tpu.memory_space<vmem>>, vector<8x128x128xf32>,
    return
  }
  func.func @transform_0(%arg0: i32, %arg1: i32) -> (i32, i32, i32) {
    %c0_i32 = arith.constant 0 : i32
    %c0_i32_0 = arith.constant 0 : i32
    return %arg0, %c0_i32, %arg1 : i32, i32, i32
  }
  func.func @transform_1(%arg0: i32, %arg1: i32) -> (i32, i32, i32) {
    %c0_i32 = arith.constant 0 : i32
    %c0_i32_0 = arith.constant 0 : i32
    return %arg0, %c0_i32, %arg1 : i32, i32, i32
  }
}

</mosaic_0001>

<bundles_post_ra>
// kernel: quantized_attention_map.1
= control target key start
LH: loop header
LB: loop body
LE: loop exit
PB: predicated region body
PF: predicated region fallthrough
CT: control target
= control target key end

     0   :  { %6 = vsyncpa [#allocation3], 0  ;;  %s5060_s0 = inlined_call_operand.hbm [shape: f32[8,128,128], index: 0, kind: input, shape index: {}]   ;;  %s5061_s1 = inlined_call_operand.hbm [shape: f32[8,128,128], index: 1, kind: output, shape index: {}]  }
   0x1   :  { %7 = vsyncpa [#allocation4], 0  ;;  %s12_s8 = sshll.u32 %s5060_s0, 4  ;;  %s2742_s9 = smov [#allocation2]   ;;  %s13_s8 = int_to_ptr.hbm [resolvable:$true] %s12_s8 }
   0x2   :  { %s14_s10 = sshll.u32 %s2742_s9, 4  ;;  %s2743_s11 = smov 128   ;;  %s15_s10 = int_to_ptr.vmem [resolvable:$true] %s14_s10 }
   0x3   :  { %s2744_s12 = smov 8  }
   0x4   :  { %20 = dma.hbm_to_vmem [thread:$0]  %s13_s8, 16384, %s15_s10, [#allocation3], %s2743_s11, %s2743_s11, %s2744_s12  }
   0x5   :  { %2738 = dma.done.wait [#allocation3], 16384  }
   0x6   :  { %2739 = vsyncadd [#allocation3], 4294950912  ;;  %v2763_v0 = vld [vmem:[#allocation2] sm:$0xff]  ;;  %v2765_v1 = vld [vmem:[#allocation2 + $0x8] sm:$0xff]  ;;  %v2745_v36 = vmov 255.0   ;;  %s2746_s0 = smov [#allocation5]  }
   0x7   :  { %v2767_v2 = vld [vmem:[#allocation2 + $0x10] sm:$0xff]  ;;  %v153_v3 = vmax.f32 %v2763_v0, %v2765_v1  ;;  %v321_v4 = vmin.f32 %v2763_v0, %v2765_v1  ;;  %v2773_v5 = vld [vmem:[#allocation2 + $0x18] sm:$0xff]  ;;  %v2777_v8 = vld [vmem:[#allocation2 + $0x20] sm:$0xff]  ;;  %2672 = vrcp.f32 %v2745_v36  ;;  %s1564_s13 = sshll.u32 %s2746_s0, 4  ;;  %s1566_s16 = sshll.u32 %s5061_s1, 4  ;;  %s1565_s13 = int_to_ptr.vmem [resolvable:$true] %s1564_s13  ;;  %s1567_s16 = int_to_ptr.hbm [resolvable:$true] %s1566_s16 }
   0x8   :  { %v2781_v11 = vld [vmem:[#allocation2 + $0x28] sm:$0xff]  ;;  %v2785_v14 = vld [vmem:[#allocation2 + $0x30] sm:$0xff]  ;;  %v2789_v17 = vld [vmem:[#allocation2 + $0x38] sm:$0xff] }
   0x9   :  { %v154_v6 = vmax.f32 %v153_v3, %v2767_v2  ;;  %v322_v7 = vmin.f32 %v321_v4, %v2767_v2  ;;  %v2793_v20 = vld [vmem:[#allocation2 + $0x40] sm:$0xff]  ;;  %v2799_v24 = vld [vmem:[#allocation2 + $0x88] sm:$0xff]  ;;  %v2809_v30 = vld [vmem:[#allocation2 + $0x90] sm:$0xff] }
   0xa   :  { %v2797_v23 = vld [vmem:[#allocation2 + $0x80] sm:$0xff]  ;;  %v2801_v25 = vld [vmem:[#allocation2 + $0x48] sm:$0xff]  ;;  %v2811_v31 = vld [vmem:[#allocation2 + $0x50] sm:$0xff] }
   0xb   :  { %v155_v9 = vmax.f32 %v154_v6, %v2773_v5  ;;  %v323_v10 = vmin.f32 %v322_v7, %v2773_v5  ;;  %v174_v26 = vmax.f32 %v2797_v23, %v2799_v24  ;;  %v342_v27 = vmin.f32 %v2797_v23, %v2799_v24  ;;  %v2817_v37 = vld [vmem:[#allocation2 + $0x98] sm:$0xff]  ;;  %v2825_v43 = vld [vmem:[#allocation2 + $0xa0] sm:$0xff]  ;;  %v2833_v49 = vld [vmem:[#allocation2 + $0xa8] sm:$0xff] }
   0xc   :  { %v2819_v38 = vld [vmem:[#allocation2 + $0x58] sm:$0xff]  ;;  %v2827_v44 = vld [vmem:[#allocation2 + $0x60] sm:$0xff]  ;;  %v2835_v50 = vld [vmem:[#allocation2 + $0x68] sm:$0xff] }
   0xd   :  { %v156_v12 = vmax.f32 %v155_v9, %v2777_v8  ;;  %v324_v13 = vmin.f32 %v323_v10, %v2777_v8  ;;  %v175_v32 = vmax.f32 %v174_v26, %v2809_v30  ;;  %v343_v33 = vmin.f32 %v342_v27, %v2809_v30  ;;  %v2673_v53 = vpop.eup %2672  ;;  %v2841_v56 = vld [vmem:[#allocation2 + $0xb0] sm:$0xff]  ;;  %v2849_v62 = vld [vmem:[#allocation2 + $0xb8] sm:$0xff]  ;;  %v2857_v10 = vld [vmem:[#allocation2 + $0xc0] sm:$0xff] }
   0xe   :  { %v2843_v57 = vld [vmem:[#allocation2 + $0x70] sm:$0xff]  ;;  %v2851_v63 = vld [vmem:[#allocation2 + $0x78] sm:$0xff]  ;;  %v498_v3 = vmul.f32 255.0, %v2673_v53  ;;  %vm502_vm0 = vweird.f32 %v2673_v53 }
   0xf   :  { %v157_v15 = vmax.f32 %v156_v12, %v2781_v11  ;;  %v325_v16 = vmin.f32 %v324_v13, %v2781_v11  ;;  %v176_v39 = vmax.f32 %v175_v32, %v2817_v37  ;;  %v344_v40 = vmin.f32 %v343_v33, %v2817_v37 }
  0x11   :  { %v158_v18 = vmax.f32 %v157_v15, %v2785_v14  ;;  %v326_v19 = vmin.f32 %v325_v16, %v2785_v14  ;;  %v177_v45 = vmax.f32 %v176_v39, %v2825_v43  ;;  %v345_v46 = vmin.f32 %v344_v40, %v2825_v43 }
  0x13   :  { %v159_v21 = vmax.f32 %v158_v18, %v2789_v17  ;;  %v327_v22 = vmin.f32 %v326_v19, %v2789_v17  ;;  %v178_v51 = vmax.f32 %v177_v45, %v2833_v49  ;;  %v346_v52 = vmin.f32 %v345_v46, %v2833_v49  ;;  %v2863_v18 = vld [vmem:[#allocation2 + $0xc8] sm:$0xff]  ;;  %v2875_v45 = vld [vmem:[#allocation2 + $0xe0] sm:$0xff] }
  0x14   :  { %v499_v19 = vsub.f32 1.0, %v498_v3 }
  0x15   :  { %v160_v28 = vmax.f32 %v159_v21, %v2793_v20  ;;  %v328_v29 = vmin.f32 %v327_v22, %v2793_v20  ;;  %v179_v58 = vmax.f32 %v178_v51, %v2841_v56  ;;  %v347_v59 = vmin.f32 %v346_v52, %v2841_v56  ;;  %v2879_v52 = vld [vmem:[#allocation2 + $0xe8] sm:$0xff] }
  0x16   :  { %v500_v36 = vmul.f32 %v2673_v53, %v499_v19 }
  0x17   :  { %v161_v34 = vmax.f32 %v160_v28, %v2801_v25  ;;  %v329_v35 = vmin.f32 %v328_v29, %v2801_v25  ;;  %v180_v4 = vmax.f32 %v179_v58, %v2849_v62  ;;  %v348_v6 = vmin.f32 %v347_v59, %v2849_v62  ;;  %v2867_v28 = vld [vmem:[#allocation2 + $0xd0] sm:$0xff] }
  0x19   :  { %v162_v41 = vmax.f32 %v161_v34, %v2811_v31  ;;  %v330_v42 = vmin.f32 %v329_v35, %v2811_v31  ;;  %v181_v12 = vmax.f32 %v180_v4, %v2857_v10  ;;  %v349_v13 = vmin.f32 %v348_v6, %v2857_v10  ;;  %v2871_v35 = vld [vmem:[#allocation2 + $0xd8] sm:$0xff] }
  0x1b   :  { %v163_v47 = vmax.f32 %v162_v41, %v2819_v38  ;;  %v331_v48 = vmin.f32 %v330_v42, %v2819_v38  ;;  %v182_v21 = vmax.f32 %v181_v12, %v2863_v18  ;;  %v350_v22 = vmin.f32 %v349_v13, %v2863_v18 }
  0x1d   :  { %v164_v54 = vmax.f32 %v163_v47, %v2827_v44  ;;  %v332_v55 = vmin.f32 %v331_v48, %v2827_v44  ;;  %v183_v29 = vmax.f32 %v182_v21, %v2867_v28  ;;  %v351_v32 = vmin.f32 %v350_v22, %v2867_v28 }
  0x1f   :  { %v165_v60 = vmax.f32 %v164_v54, %v2835_v50  ;;  %v333_v61 = vmin.f32 %v332_v55, %v2835_v50  ;;  %v184_v39 = vmax.f32 %v183_v29, %v2871_v35  ;;  %v352_v40 = vmin.f32 %v351_v32, %v2871_v35 }
  0x20   :  { %v501_v54 = vadd.f32 %v2673_v53, %v500_v36 }
  0x21   :  { %v166_v7 = vmax.f32 %v165_v60, %v2843_v57  ;;  %v334_v9 = vmin.f32 %v333_v61, %v2843_v57  ;;  %v185_v46 = vmax.f32 %v184_v39, %v2875_v45  ;;  %v353_v47 = vmin.f32 %v352_v40, %v2875_v45  ;;  %v2883_v61 = vld [vmem:[#allocation2 + $0xf0] sm:$0xff] }
  0x22   :  { %v2889_v12 = vsel %vm502_vm0, %v2673_v53, %v501_v54 }
  0x23   :  { %v167_v15 = vmax.f32 %v166_v7, %v2851_v63  ;;  %v335_v16 = vmin.f32 %v334_v9, %v2851_v63  ;;  %v186_v55 = vmax.f32 %v185_v46, %v2879_v52  ;;  %v354_v58 = vmin.f32 %v353_v47, %v2879_v52  ;;  %v2887_v9 = vld [vmem:[#allocation2 + $0xf8] sm:$0xff] }
  0x25   :  { %v168_v26 = vrot.slane %v167_v15, 4  ;;  %v336_v27 = vrot.slane %v335_v16, 4  ;;  %v187_v3 = vmax.f32 %v186_v55, %v2883_v61  ;;  %v355_v4 = vmin.f32 %v354_v58, %v2883_v61 }
  0x27   :  { %v169_v33 = vmax.f32 %v167_v15, %v168_v26  ;;  %v337_v34 = vmin.f32 %v335_v16, %v336_v27  ;;  %v188_v13 = vmax.f32 %v187_v3, %v2887_v9  ;;  %v356_v15 = vmin.f32 %v355_v4, %v2887_v9 }
  0x29   :  { %v170_v41 = vrot.slane %v169_v33, 2  ;;  %v338_v42 = vrot.slane %v337_v34, 2  ;;  %v189_v19 = vrot.slane %v188_v13, 4  ;;  %v357_v21 = vrot.slane %v356_v15, 4 }
  0x2b   :  { %v171_v48 = vmax.f32 %v169_v33, %v170_v41  ;;  %v339_v51 = vmin.f32 %v337_v34, %v338_v42  ;;  %v190_v26 = vmax.f32 %v188_v13, %v189_v19  ;;  %v358_v27 = vmin.f32 %v356_v15, %v357_v21 }
  0x2d   :  { %v172_v59 = vrot.slane %v171_v48, 1  ;;  %v340_v60 = vrot.slane %v339_v51, 1  ;;  %v191_v32 = vrot.slane %v190_v26, 2  ;;  %v359_v33 = vrot.slane %v358_v27, 2 }
  0x2f   :  { %v173_v6 = vmax.f32 %v171_v48, %v172_v59  ;;  %v341_v7 = vmin.f32 %v339_v51, %v340_v60  ;;  %v192_v34 = vmax.f32 %v190_v26, %v191_v32  ;;  %v360_v53 = vmin.f32 %v358_v27, %v359_v33 }
  0x31   :  { %v489_v16 = vsub.f32 %v173_v6, %v341_v7  ;;  %v193_v36 = vrot.slane %v192_v34, 1  ;;  %v361_v39 = vrot.slane %v360_v53, 1  ;;  %v640_v3 = vsub.f32 0.0, %v341_v7 }
  0x33   :  { %v504_v22 = vmul.f32 %v2889_v12, %v489_v16  ;;  %v194_v40 = vmax.f32 %v192_v34, %v193_v36  ;;  %v2897_v41 = vmin.f32 %v360_v53, %v361_v39 }
  0x35   :  { %v2894_v29 = vmax.f32 %v504_v22, 1e-08  ;;  %v490_v47 = vsub.f32 %v194_v40, %v2897_v41 }
  0x37   :  { %2674 = vrcp.f32 %v2894_v29  ;;  %vm525_vm1 = vweird.f32 %v2894_v29  ;;  %v531_v48 = vand.u32 2147483648, %v2894_v29  ;;  %v529_v54 = vand.u32 2147483647, %v2894_v29 }
  0x38   :  { %v505_v55 = vmul.f32 %v2889_v12, %v490_v47 }
  0x39   :  { %v532_v59 = vor.u32 1.1754944e-38, %v531_v48  ;;  %vm530_vm4 = vcmp.eq.f32.partialorder %v529_v54, 8.507059e+37 }
  0x3a   :  { %v2905_v4 = vmax.f32 %v505_v55, 1e-08 }
  0x3c   :  { %2676 = vrcp.f32 %v2905_v4 }
  0x3d   :  { %v2675_v42 = vpop.eup %2674 }
  0x3e   :  { %v521_v46 = vmul.f32 %v2675_v42, %v2894_v29  ;;  %vm526_vm2 = vweird.f32 %v2675_v42 }
  0x3f   :  { %vm527_vm3 = vmor %vm525_vm1, %vm526_vm2 }
  0x40   :  { %v522_v51 = vsub.f32 1.0, %v521_v46 }
  0x42   :  { %v523_v58 = vmul.f32 %v2675_v42, %v522_v51 }
  0x44   :  { %v524_v60 = vadd.f32 %v2675_v42, %v523_v58 }
  0x46   :  { %v528_v6 = vsel %vm527_vm3, %v2675_v42, %v524_v60 }
  0x47   :  { %v2907_v13 = vsel %vm530_vm4, %v532_v59, %v528_v6 }
  0x48   :  { %v648_v15 = vmul.f32 %v640_v3, %v2907_v13  ;;  %v664_v16 = vmul.f32 %v2907_v13, %v2763_v0  ;;  %v665_v19 = vmul.f32 %v2907_v13, %v2765_v1  ;;  %v666_v21 = vmul.f32 %v2907_v13, %v2767_v2 }
  0x49   :  { %v2919_v7 = vmul.f32 %v2907_v13, %v2773_v5  ;;  %v2923_v22 = vmul.f32 %v2907_v13, %v2777_v8  ;;  %v2927_v26 = vmul.f32 %v2907_v13, %v2781_v11  ;;  %v2931_v32 = vmul.f32 %v2907_v13, %v2785_v14  ;;  %v2941_v14 = vpop.eup %2676 }
  0x4a   :  { %v1579_v0 = vand.u32 2147483647, %v648_v15  ;;  %v1581_v27 = vcvt.f32.s32 %v648_v15  ;;  %v1643_v1 = vand.u32 2147483647, %v664_v16  ;;  %v1584_v2 = vand.u32 2147483648, %v648_v15 }
  0x4b   :  { %v1645_v33 = vcvt.f32.s32 %v664_v16  ;;  %v1651_v34 = vand.u32 2147483647, %v665_v19  ;;  %v1653_v5 = vcvt.f32.s32 %v665_v19  ;;  %v1648_v11 = vand.u32 2147483648, %v664_v16 }
  0x4c   :  { %vm2933_vm5 = vcmp.lt.f32.partialorder %v1579_v0, 8388608.0  ;;  %v1582_v8 = vcvt.s32.f32 %v1581_v27  ;;  %vm2937_vm6 = vcmp.lt.f32.partialorder %v1643_v1, 8388608.0  ;;  %v1656_v42 = vand.u32 2147483648, %v665_v19 }
  0x4d   :  { %v1646_v39 = vcvt.s32.f32 %v1645_v33  ;;  %v1654_v40 = vcvt.s32.f32 %v1653_v5  ;;  %v1659_v46 = vand.u32 2147483647, %v666_v21  ;;  %vm2943_vm7 = vcmp.lt.f32.partialorder %v1651_v34, 8388608.0 }
  0x4e   :  { %v1583_v47 = vand.u32 2147483647, %v1582_v8  ;;  %v1661_v51 = vcvt.f32.s32 %v666_v21  ;;  %v1667_v54 = vand.u32 2147483647, %v2919_v7  ;;  %v1664_v59 = vand.u32 2147483648, %v666_v21 }
  0x4f   :  { %v1647_v55 = vand.u32 2147483647, %v1646_v39  ;;  %v1655_v58 = vand.u32 2147483647, %v1654_v40  ;;  %v1669_v60 = vcvt.f32.s32 %v2919_v7  ;;  %vm2949_vm8 = vcmp.lt.f32.partialorder %v1659_v46, 8388608.0 }
  0x50   :  { %v1585_v3 = vor.u32 %v1584_v2, %v1583_v47  ;;  %v1662_v0 = vcvt.s32.f32 %v1661_v51  ;;  %v1672_v27 = vand.u32 2147483648, %v2919_v7  ;;  %v1675_v5 = vand.u32 2147483647, %v2923_v22 }
  0x51   :  { %v1649_v1 = vor.u32 %v1648_v11, %v1647_v55  ;;  %v1657_v33 = vor.u32 %v1656_v42, %v1655_v58  ;;  %v1670_v34 = vcvt.s32.f32 %v1669_v60  ;;  %vm2959_vm9 = vcmp.lt.f32.partialorder %v1667_v54, 8388608.0 }
  0x52   :  { %v2957_v8 = vsel %vm2933_vm5, %v1585_v3, %v648_v15  ;;  %v1663_v39 = vand.u32 2147483647, %v1662_v0  ;;  %v1677_v2 = vcvt.f32.s32 %v2923_v22  ;;  %v1680_v47 = vand.u32 2147483648, %v2923_v22 }
  0x53   :  { %v1650_v46 = vsel %vm2937_vm6, %v1649_v1, %v664_v16  ;;  %v1658_v11 = vsel %vm2943_vm7, %v1657_v33, %v665_v19  ;;  %v1671_v42 = vand.u32 2147483647, %v1670_v34  ;;  %vm2971_vm10 = vcmp.lt.f32.partialorder %v1675_v5, 8388608.0 }
  0x54   :  { %v920_v53 = vadd.f32 %v1650_v46, %v2957_v8  ;;  %v921_v15 = vadd.f32 %v1658_v11, %v2957_v8  ;;  %v1665_v51 = vor.u32 %v1664_v59, %v1663_v39  ;;  %v1678_v54 = vcvt.s32.f32 %v1677_v2 }
  0x55   :  { %v1673_v55 = vor.u32 %v1672_v27, %v1671_v42  ;;  %v1683_v36 = vand.u32 2147483647, %v2927_v26  ;;  %v1685_v16 = vcvt.f32.s32 %v2927_v26  ;;  %v1688_v1 = vand.u32 2147483648, %v2927_v26 }
  0x56   :  { %v1048_v48 = vmin.f32 %v920_v53, 255.0  ;;  %v1049_v19 = vmin.f32 %v921_v15, 255.0  ;;  %v1666_v60 = vsel %vm2949_vm8, %v1665_v51, %v666_v21  ;;  %v1679_v3 = vand.u32 2147483647, %v1678_v54 }
  0x57   :  { %v922_v0 = vadd.f32 %v1666_v60, %v2957_v8  ;;  %v1674_v59 = vsel %vm2959_vm9, %v1673_v55, %v2919_v7  ;;  %v1686_v27 = vcvt.s32.f32 %v1685_v16  ;;  %vm2987_vm11 = vcmp.lt.f32.partialorder %v1683_v36, 8388608.0 }
  0x58   :  { %v1176_v33 = vsub.f32 %v1048_v48, %v2957_v8  ;;  %v1177_v34 = vsub.f32 %v1049_v19, %v2957_v8  ;;  %v923_v5 = vadd.f32 %v1674_v59, %v2957_v8  ;;  %v1681_v39 = vor.u32 %v1680_v47, %v1679_v3 }
  0x59   :  { %v1050_v2 = vmin.f32 %v922_v0, 255.0  ;;  %v1687_v6 = vand.u32 2147483647, %v1686_v27  ;;  %v1693_v46 = vcvt.f32.s32 %v2931_v32  ;;  %v1691_v51 = vand.u32 2147483647, %v2931_v32 }
  0x5a   :  { %v1304_v7 = vmul.f32 %v1176_v33, %v2894_v29  ;;  %v1305_v40 = vmul.f32 %v1177_v34, %v2894_v29  ;;  %v1051_v11 = vmin.f32 %v923_v5, 255.0  ;;  %v1682_v42 = vsel %vm2971_vm10, %v1681_v39, %v2923_v22 }
  0x5b   :  { %v1178_v53 = vsub.f32 %v1050_v2, %v2957_v8  ;;  %v924_v47 = vadd.f32 %v1682_v42, %v2957_v8  ;;  %v1689_v15 = vor.u32 %v1688_v1, %v1687_v6  ;;  %v1694_v55 = vcvt.s32.f32 %v1693_v46 }
  0x5c   :  { %1432 = vst [vmem:[#allocation5] sm:$0xff] %v1304_v7  ;;  %v1179_v54 = vsub.f32 %v1051_v11, %v2957_v8  ;;  %v1696_v36 = vand.u32 2147483648, %v2931_v32  ;;  %v671_v16 = vmul.f32 %v2907_v13, %v2789_v17  ;;  %v672_v19 = vmul.f32 %v2907_v13, %v2793_v20 }
  0x5d   :  { %1433 = vst [vmem:[#allocation5 + $0x8] sm:$0xff] %v1305_v40  ;;  %v1306_v58 = vmul.f32 %v1178_v53, %v2894_v29  ;;  %v1052_v22 = vmin.f32 %v924_v47, 255.0  ;;  %v1690_v48 = vsel %vm2987_vm11, %v1689_v15, %v2927_v26  ;;  %v1695_v0 = vand.u32 2147483647, %v1694_v55 }
  0x5e   :  { %v1307_v60 = vmul.f32 %v1179_v54, %v2894_v29  ;;  %v925_v3 = vadd.f32 %v1690_v48, %v2957_v8  ;;  %v1699_v59 = vand.u32 2147483647, %v671_v16  ;;  %vm3013_vm12 = vcmp.lt.f32.partialorder %v1691_v51, 8388608.0 }
  0x5f   :  { %1434 = vst [vmem:[#allocation5 + $0x10] sm:$0xff] %v1306_v58  ;;  %v1180_v17 = vsub.f32 %v1052_v22, %v2957_v8  ;;  %v1701_v1 = vcvt.f32.s32 %v671_v16  ;;  %v1707_v33 = vand.u32 2147483647, %v672_v19  ;;  %v1697_v34 = vor.u32 %v1696_v36, %v1695_v0 }
  0x60   :  { %1435 = vst [vmem:[#allocation5 + $0x18] sm:$0xff] %v1307_v60  ;;  %v1053_v26 = vmin.f32 %v925_v3, 255.0  ;;  %v1704_v5 = vand.u32 2147483648, %v671_v16  ;;  %v1709_v20 = vcvt.f32.s32 %v672_v19  ;;  %vm3018_vm13 = vcmp.lt.f32.partialorder %v1699_v59, 8388608.0 }
  0x61   :  { %v1308_v39 = vmul.f32 %v1180_v17, %v2894_v29  ;;  %v1702_v21 = vcvt.s32.f32 %v1701_v1  ;;  %v1712_v6 = vand.u32 2147483648, %v672_v19  ;;  %v1698_v7 = vsel %vm3013_vm12, %v1697_v34, %v2931_v32 }
  0x62   :  { %v1181_v46 = vsub.f32 %v1053_v26, %v2957_v8  ;;  %v1710_v40 = vcvt.s32.f32 %v1709_v20  ;;  %v673_v11 = vmul.f32 %v2907_v13, %v2801_v25  ;;  %v926_v42 = vadd.f32 %v1698_v7, %v2957_v8 }
  0x63   :  { %1436 = vst [vmem:[#allocation5 + $0x20] sm:$0xff] %v1308_v39  ;;  %v1703_v53 = vand.u32 2147483647, %v1702_v21  ;;  %vm3029_vm14 = vcmp.lt.f32.partialorder %v1707_v33, 8388608.0  ;;  %v674_v15 = vmul.f32 %v2907_v13, %v2811_v31  ;;  %v675_v25 = vmul.f32 %v2907_v13, %v2819_v38 }
  0x64   :  { %v1309_v51 = vmul.f32 %v1181_v46, %v2894_v29  ;;  %v1711_v54 = vand.u32 2147483647, %v1710_v40  ;;  %v1715_v55 = vand.u32 2147483647, %v673_v11  ;;  %v1717_v32 = vcvt.f32.s32 %v673_v11 }
  0x65   :  { %v1054_v36 = vmin.f32 %v926_v42, 255.0  ;;  %v1705_v58 = vor.u32 %v1704_v5, %v1703_v53  ;;  %v1723_v22 = vand.u32 2147483647, %v674_v15  ;;  %v1720_v3 = vand.u32 2147483648, %v673_v11 }
  0x66   :  { %1437 = vst [vmem:[#allocation5 + $0x28] sm:$0xff] %v1309_v51  ;;  %v1713_v48 = vor.u32 %v1712_v6, %v1711_v54  ;;  %v1718_v60 = vcvt.s32.f32 %v1717_v32  ;;  %v1725_v0 = vcvt.f32.s32 %v674_v15  ;;  %vm3041_vm15 = vcmp.lt.f32.partialorder %v1715_v55, 8388608.0 }
  0x67   :  { %v1182_v59 = vsub.f32 %v1054_v36, %v2957_v8  ;;  %v1706_v31 = vsel %vm3018_vm13, %v1705_v58, %v671_v16  ;;  %v1728_v27 = vand.u32 2147483648, %v674_v15  ;;  %vm3050_vm0 = vcmp.lt.f32.partialorder %v1723_v22, 8388608.0 }
  0x68   :  { %v927_v1 = vadd.f32 %v1706_v31, %v2957_v8  ;;  %v1714_v38 = vsel %vm3029_vm14, %v1713_v48, %v672_v19  ;;  %v1719_v33 = vand.u32 2147483647, %v1718_v60  ;;  %v1726_v26 = vcvt.s32.f32 %v1725_v0 }
  0x69   :  { %v1310_v34 = vmul.f32 %v1182_v59, %v2894_v29  ;;  %v928_v5 = vadd.f32 %v1714_v38, %v2957_v8  ;;  %v1733_v16 = vcvt.f32.s32 %v675_v25  ;;  %v1731_v6 = vand.u32 2147483647, %v675_v25 }
  0x6a   :  { %v1055_v39 = vmin.f32 %v927_v1, 255.0  ;;  %v1721_v2 = vor.u32 %v1720_v3, %v1719_v33  ;;  %v1727_v21 = vand.u32 2147483647, %v1726_v26  ;;  %v1736_v40 = vand.u32 2147483648, %v675_v25 }
  0x6b   :  { %1438 = vst [vmem:[#allocation5 + $0x30] sm:$0xff] %v1310_v34  ;;  %v1056_v46 = vmin.f32 %v928_v5, 255.0  ;;  %v1734_v7 = vcvt.s32.f32 %v1733_v16  ;;  %v676_v19 = vmul.f32 %v2907_v13, %v2827_v44  ;;  %v677_v51 = vmul.f32 %v2907_v13, %v2835_v50 }
  0x6c   :  { %v1183_v42 = vsub.f32 %v1055_v39, %v2957_v8  ;;  %v1722_v53 = vsel %vm3041_vm15, %v1721_v2, %v673_v11  ;;  %v1729_v47 = vor.u32 %v1728_v27, %v1727_v21  ;;  %vm3066_vm1 = vcmp.lt.f32.partialorder %v1731_v6, 8388608.0 }
  0x6d   :  { %v1184_v54 = vsub.f32 %v1056_v46, %v2957_v8  ;;  %v929_v55 = vadd.f32 %v1722_v53, %v2957_v8  ;;  %v1735_v32 = vand.u32 2147483647, %v1734_v7  ;;  %v1739_v36 = vand.u32 2147483647, %v676_v19 }
  0x6e   :  { %v1311_v58 = vmul.f32 %v1183_v42, %v2894_v29  ;;  %v1730_v44 = vsel %vm3050_vm0, %v1729_v47, %v674_v15  ;;  %v1741_v11 = vcvt.f32.s32 %v676_v19  ;;  %v1744_v59 = vand.u32 2147483648, %v676_v19 }
  0x6f   :  { %v1312_v48 = vmul.f32 %v1184_v54, %v2894_v29  ;;  %v1057_v60 = vmin.f32 %v929_v55, 255.0  ;;  %v930_v50 = vadd.f32 %v1730_v44, %v2957_v8  ;;  %v1737_v3 = vor.u32 %v1736_v40, %v1735_v32 }
  0x70   :  { %1439 = vst [vmem:[#allocation5 + $0x38] sm:$0xff] %v1311_v58  ;;  %v1742_v0 = vcvt.s32.f32 %v1741_v11  ;;  %v1747_v31 = vand.u32 2147483647, %v677_v51  ;;  %v1749_v17 = vcvt.f32.s32 %v677_v51  ;;  %vm3075_vm2 = vcmp.lt.f32.partialorder %v1739_v36, 8388608.0 }
  0x71   :  { %1440 = vst [vmem:[#allocation5 + $0x40] sm:$0xff] %v1312_v48  ;;  %v1185_v27 = vsub.f32 %v1057_v60, %v2957_v8  ;;  %v1058_v15 = vmin.f32 %v930_v50, 255.0  ;;  %v1738_v1 = vsel %vm3066_vm1, %v1737_v3, %v675_v25  ;;  %v1752_v5 = vand.u32 2147483648, %v677_v51 }
  0x72   :  { %v931_v33 = vadd.f32 %v1738_v1, %v2957_v8  ;;  %v1743_v26 = vand.u32 2147483647, %v1742_v0  ;;  %v1750_v34 = vcvt.s32.f32 %v1749_v17  ;;  %v678_v39 = vmul.f32 %v2907_v13, %v2843_v57 }
  0x73   :  { %v1313_v20 = vmul.f32 %v1185_v27, %v2894_v29  ;;  %v1186_v16 = vsub.f32 %v1058_v15, %v2957_v8  ;;  %v679_v2 = vmul.f32 %v2907_v13, %v2851_v63  ;;  %vm3086_vm3 = vcmp.lt.f32.partialorder %v1747_v31, 8388608.0 }
  0x74   :  { %v1059_v25 = vmin.f32 %v931_v33, 255.0  ;;  %v1745_v21 = vor.u32 %v1744_v59, %v1743_v26  ;;  %v1751_v46 = vand.u32 2147483647, %v1750_v34  ;;  %v1755_v40 = vand.u32 2147483647, %v678_v39 }
  0x75   :  { %1441 = vst [vmem:[#allocation5 + $0x48] sm:$0xff] %v1313_v20  ;;  %v1314_v7 = vmul.f32 %v1186_v16, %v2894_v29  ;;  %v1757_v42 = vcvt.f32.s32 %v678_v39  ;;  %v536_v53 = vmul.f32 %v2941_v14, %v2905_v4  ;;  %v1760_v47 = vand.u32 2147483648, %v678_v39 }
  0x76   :  { %v1187_v57 = vsub.f32 %v1059_v25, %v2957_v8  ;;  %v1746_v63 = vsel %vm3075_vm2, %v1745_v21, %v676_v19  ;;  %v1753_v13 = vor.u32 %v1752_v5, %v1751_v46  ;;  %v1763_v32 = vand.u32 2147483647, %v679_v2 }
  0x77   :  { %1442 = vst [vmem:[#allocation5 + $0x50] sm:$0xff] %v1314_v7  ;;  %v932_v54 = vadd.f32 %v1746_v63, %v2957_v8  ;;  %v1758_v55 = vcvt.s32.f32 %v1757_v42  ;;  %v1765_v36 = vcvt.f32.s32 %v679_v2  ;;  %vm3100_vm4 = vcmp.lt.f32.partialorder %v1755_v40, 8388608.0  ;;  %v3133_v42 = vld [vmem:[#allocation2 + $0x100] sm:$0xff] }
  0x78   :  { %v1315_v58 = vmul.f32 %v1187_v57, %v2894_v29  ;;  %v1754_v44 = vsel %vm3086_vm3, %v1753_v13, %v677_v51  ;;  %v1768_v11 = vand.u32 2147483648, %v679_v2  ;;  %v537_v3 = vsub.f32 1.0, %v536_v53  ;;  %v3135_v53 = vld [vmem:[#allocation2 + $0x108] sm:$0xff] }
  0x79   :  { %v1060_v48 = vmin.f32 %v932_v54, 255.0  ;;  %v933_v19 = vadd.f32 %v1754_v44, %v2957_v8  ;;  %v1759_v60 = vand.u32 2147483647, %v1758_v55  ;;  %v1766_v50 = vcvt.s32.f32 %v1765_v36 }
  0x7a   :  { %1443 = vst [vmem:[#allocation5 + $0x58] sm:$0xff] %v1315_v58  ;;  %vm540_vm5 = vweird.f32 %v2905_v4  ;;  %vm541_vm6 = vweird.f32 %v2941_v14  ;;  %v544_v0 = vand.u32 2147483647, %v2905_v4  ;;  %vm3109_vm7 = vcmp.lt.f32.partialorder %v1763_v32, 8388608.0 }
  0x7b   :  { %v1188_v51 = vsub.f32 %v1060_v48, %v2957_v8  ;;  %v1061_v59 = vmin.f32 %v933_v19, 255.0  ;;  %v1761_v31 = vor.u32 %v1760_v47, %v1759_v60  ;;  %v1767_v17 = vand.u32 2147483647, %v1766_v50  ;;  %vm542_vm9 = vmor %vm540_vm5, %vm541_vm6 }
  0x7c   :  { %v538_v15 = vmul.f32 %v2941_v14, %v537_v3  ;;  %vm3114_vm8 = vcmp.eq.f32.partialorder %v544_v0, 8.507059e+37  ;;  %v546_v38 = vand.u32 2147483648, %v2905_v4  ;;  %v641_v21 = vsub.f32 0.0, %v2897_v41 }
  0x7d   :  { %v1316_v33 = vmul.f32 %v1188_v51, %v2894_v29  ;;  %v1189_v26 = vsub.f32 %v1061_v59, %v2957_v8  ;;  %v1762_v34 = vsel %vm3100_vm4, %v1761_v31, %v678_v39  ;;  %v1769_v5 = vor.u32 %v1768_v11, %v1767_v17 }
  0x7e   :  { %v934_v20 = vadd.f32 %v1762_v34, %v2957_v8  ;;  %v539_v16 = vadd.f32 %v2941_v14, %v538_v15  ;;  %v547_v25 = vor.u32 1.1754944e-38, %v546_v38  ;;  %v195_v55 = vmax.f32 %v3133_v42, %v3135_v53 }
  0x7f   :  { %1444 = vst [vmem:[#allocation5 + $0x60] sm:$0xff] %v1316_v33  ;;  %v1317_v6 = vmul.f32 %v1189_v26, %v2894_v29  ;;  %v1770_v46 = vsel %vm3109_vm7, %v1769_v5, %v679_v2 }
  0x80   :  { %v1062_v7 = vmin.f32 %v934_v20, 255.0  ;;  %v935_v39 = vadd.f32 %v1770_v46, %v2957_v8  ;;  %v543_v40 = vsel %vm542_vm9, %v2941_v14, %v539_v16 }
  0x81   :  { %1445 = vst [vmem:[#allocation5 + $0x68] sm:$0xff] %v1317_v6  ;;  %v3139_v57 = vsel %vm3114_vm8, %v547_v25, %v543_v40 }
  0x82   :  { %v1190_v41 = vsub.f32 %v1062_v7, %v2957_v8  ;;  %v1063_v63 = vmin.f32 %v935_v39, 255.0  ;;  %v649_v13 = vmul.f32 %v641_v21, %v3139_v57  ;;  %v680_v2 = vmul.f32 %v3139_v57, %v2797_v23 }
  0x83   :  { %v681_v14 = vmul.f32 %v3139_v57, %v2799_v24  ;;  %v682_v47 = vmul.f32 %v3139_v57, %v2809_v30  ;;  %v3151_v54 = vmul.f32 %v3139_v57, %v2817_v37  ;;  %v3159_v24 = vmul.f32 %v3139_v57, %v2825_v43 }
  0x84   :  { %v1318_v32 = vmul.f32 %v1190_v41, %v2894_v29  ;;  %v1191_v36 = vsub.f32 %v1063_v63, %v2957_v8  ;;  %v1587_v58 = vand.u32 2147483647, %v649_v13  ;;  %v1589_v44 = vcvt.f32.s32 %v649_v13 }
  0x85   :  { %v1592_v23 = vand.u32 2147483648, %v649_v13  ;;  %v1771_v22 = vand.u32 2147483647, %v680_v2  ;;  %v1773_v11 = vcvt.f32.s32 %v680_v2  ;;  %v1776_v48 = vand.u32 2147483648, %v680_v2 }
  0x86   :  { %1446 = vst [vmem:[#allocation5 + $0x70] sm:$0xff] %v1318_v32  ;;  %v1319_v30 = vmul.f32 %v1191_v36, %v2894_v29  ;;  %v1590_v37 = vcvt.s32.f32 %v1589_v44  ;;  %v1779_v19 = vand.u32 2147483647, %v681_v14  ;;  %vm3162_vm10 = vcmp.lt.f32.partialorder %v1587_v58, 8388608.0 }
  0x87   :  { %vm3166_vm11 = vcmp.lt.f32.partialorder %v1771_v22, 8388608.0  ;;  %v1774_v50 = vcvt.s32.f32 %v1773_v11  ;;  %v1781_v3 = vcvt.f32.s32 %v681_v14  ;;  %v1784_v43 = vand.u32 2147483648, %v681_v14 }
  0x88   :  { %1447 = vst [vmem:[#allocation5 + $0x78] sm:$0xff] %v1319_v30  ;;  %v1591_v0 = vand.u32 2147483647, %v1590_v37  ;;  %v1787_v51 = vand.u32 2147483647, %v682_v47  ;;  %v1789_v59 = vcvt.f32.s32 %v682_v47  ;;  %vm3170_vm12 = vcmp.lt.f32.partialorder %v1779_v19, 8388608.0 }
  0x89   :  { %v1775_v31 = vand.u32 2147483647, %v1774_v50  ;;  %v1782_v17 = vcvt.s32.f32 %v1781_v3  ;;  %v1795_v27 = vand.u32 2147483647, %v3151_v54  ;;  %v1792_v38 = vand.u32 2147483648, %v682_v47 }
  0x8a   :  { %v1593_v15 = vor.u32 %v1592_v23, %v1591_v0  ;;  %v1790_v1 = vcvt.s32.f32 %v1789_v59  ;;  %v1797_v33 = vcvt.f32.s32 %v3151_v54  ;;  %vm3176_vm13 = vcmp.lt.f32.partialorder %v1787_v51, 8388608.0 }
  0x8b   :  { %v1777_v26 = vor.u32 %v1776_v48, %v1775_v31  ;;  %v1783_v34 = vand.u32 2147483647, %v1782_v17  ;;  %v1800_v20 = vand.u32 2147483648, %v3151_v54  ;;  %v1803_v6 = vand.u32 2147483647, %v3159_v24 }
  0x8c   :  { %v3183_v16 = vsel %vm3162_vm10, %v1593_v15, %v649_v13  ;;  %v1791_v25 = vand.u32 2147483647, %v1790_v1  ;;  %v1798_v21 = vcvt.s32.f32 %v1797_v33  ;;  %vm3188_vm14 = vcmp.lt.f32.partialorder %v1795_v27, 8388608.0 }
  0x8d   :  { %v1778_v46 = vsel %vm3166_vm11, %v1777_v26, %v680_v2  ;;  %v1785_v7 = vor.u32 %v1784_v43, %v1783_v34  ;;  %v1805_v40 = vcvt.f32.s32 %v3159_v24  ;;  %v1808_v13 = vand.u32 2147483648, %v3159_v24 }
  0x8e   :  { %v936_v41 = vadd.f32 %v1778_v46, %v3183_v16  ;;  %v1793_v63 = vor.u32 %v1792_v38, %v1791_v25  ;;  %v1799_v32 = vand.u32 2147483647, %v1798_v21  ;;  %vm3197_vm15 = vcmp.lt.f32.partialorder %v1803_v6, 8388608.0 }
  0x8f   :  { %v1786_v36 = vsel %vm3170_vm12, %v1785_v7, %v681_v14  ;;  %v1806_v2 = vcvt.s32.f32 %v1805_v40  ;;  %v685_v44 = vmul.f32 %v3139_v57, %v2833_v49  ;;  %v686_v14 = vmul.f32 %v3139_v57, %v2841_v56 }
  0x90   :  { %v1064_v23 = vmin.f32 %v936_v41, 255.0  ;;  %v937_v22 = vadd.f32 %v1786_v36, %v3183_v16  ;;  %v1794_v11 = vsel %vm3176_vm13, %v1793_v63, %v682_v47  ;;  %v1801_v30 = vor.u32 %v1800_v20, %v1799_v32 }
  0x91   :  { %v938_v37 = vadd.f32 %v1794_v11, %v3183_v16  ;;  %v1807_v48 = vand.u32 2147483647, %v1806_v2  ;;  %v1813_v19 = vcvt.f32.s32 %v685_v44  ;;  %v1811_v50 = vand.u32 2147483647, %v685_v44 }
  0x92   :  { %v1192_v60 = vsub.f32 %v1064_v23, %v3183_v16  ;;  %v1065_v8 = vmin.f32 %v937_v22, 255.0  ;;  %v1802_v49 = vsel %vm3188_vm14, %v1801_v30, %v3151_v54  ;;  %v1816_v43 = vand.u32 2147483648, %v685_v44 }
  0x93   :  { %v1066_v3 = vmin.f32 %v938_v37, 255.0  ;;  %v939_v0 = vadd.f32 %v1802_v49, %v3183_v16  ;;  %v1809_v47 = vor.u32 %v1808_v13, %v1807_v48  ;;  %v1814_v31 = vcvt.s32.f32 %v1813_v19  ;;  %v3300_v49 = vld [vmem:[#allocation2 + $0x110] sm:$0xff] }
  0x94   :  { %v1320_v51 = vmul.f32 %v1192_v60, %v2905_v4  ;;  %v1193_v59 = vsub.f32 %v1065_v8, %v3183_v16  ;;  %v1819_v29 = vand.u32 2147483647, %v686_v14  ;;  %v1821_v54 = vcvt.f32.s32 %v686_v14 }
  0x95   :  { %v1194_v56 = vsub.f32 %v1066_v3, %v3183_v16  ;;  %v1067_v17 = vmin.f32 %v939_v0, 255.0  ;;  %v1810_v27 = vsel %vm3197_vm15, %v1809_v47, %v3159_v24  ;;  %vm3222_vm0 = vcmp.lt.f32.partialorder %v1811_v50, 8388608.0 }
  0x96   :  { %1448 = vst [vmem:[#allocation5 + $0x80] sm:$0xff] %v1320_v51  ;;  %v1321_v15 = vmul.f32 %v1193_v59, %v2905_v4  ;;  %v940_v1 = vadd.f32 %v1810_v27, %v3183_v16  ;;  %v1815_v33 = vand.u32 2147483647, %v1814_v31  ;;  %v1822_v5 = vcvt.s32.f32 %v1821_v54 }
  0x97   :  { %v1322_v26 = vmul.f32 %v1194_v56, %v2905_v4  ;;  %v1195_v34 = vsub.f32 %v1067_v17, %v3183_v16  ;;  %v1824_v20 = vand.u32 2147483648, %v686_v14  ;;  %v687_v21 = vmul.f32 %v3139_v57, %v2849_v62 }
  0x98   :  { %1449 = vst [vmem:[#allocation5 + $0x88] sm:$0xff] %v1321_v15  ;;  %v1068_v25 = vmin.f32 %v940_v1, 255.0  ;;  %v1817_v24 = vor.u32 %v1816_v43, %v1815_v33  ;;  %v688_v6 = vmul.f32 %v3139_v57, %v2857_v10  ;;  %vm3233_vm1 = vcmp.lt.f32.partialorder %v1819_v29, 8388608.0 }
  0x99   :  { %1450 = vst [vmem:[#allocation5 + $0x90] sm:$0xff] %v1322_v26  ;;  %v1323_v46 = vmul.f32 %v1195_v34, %v2905_v4  ;;  %v1823_v39 = vand.u32 2147483647, %v1822_v5  ;;  %v689_v40 = vmul.f32 %v3139_v57, %v2863_v18  ;;  %v1827_v62 = vand.u32 2147483647, %v687_v21 }
  0x9a   :  { %v1196_v41 = vsub.f32 %v1068_v25, %v3183_v16  ;;  %v1818_v63 = vsel %vm3222_vm0, %v1817_v24, %v685_v44  ;;  %v1829_v32 = vcvt.f32.s32 %v687_v21  ;;  %v1835_v36 = vand.u32 2147483647, %v688_v6 }
  0x9b   :  { %1451 = vst [vmem:[#allocation5 + $0x98] sm:$0xff] %v1323_v46  ;;  %v941_v10 = vadd.f32 %v1818_v63, %v3183_v16  ;;  %v1825_v13 = vor.u32 %v1824_v20, %v1823_v39  ;;  %v690_v58 = vmul.f32 %v3139_v57, %v2867_v28  ;;  %v1832_v22 = vand.u32 2147483648, %v687_v21 }
  0x9c   :  { %v1324_v2 = vmul.f32 %v1196_v41, %v2905_v4  ;;  %v1830_v23 = vcvt.s32.f32 %v1829_v32  ;;  %v1837_v18 = vcvt.f32.s32 %v688_v6  ;;  %vm3248_vm2 = vcmp.lt.f32.partialorder %v1827_v62, 8388608.0 }
  0x9d   :  { %v1069_v11 = vmin.f32 %v941_v10, 255.0  ;;  %v1826_v30 = vsel %vm3233_vm1, %v1825_v13, %v686_v14  ;;  %v1840_v37 = vand.u32 2147483648, %v688_v6  ;;  %v1843_v28 = vand.u32 2147483647, %v689_v40 }
  0x9e   :  { %1452 = vst [vmem:[#allocation5 + $0xa0] sm:$0xff] %v1324_v2  ;;  %v942_v48 = vadd.f32 %v1826_v30, %v3183_v16  ;;  %v1831_v19 = vand.u32 2147483647, %v1830_v23  ;;  %v1838_v60 = vcvt.s32.f32 %v1837_v18  ;;  %vm3254_vm3 = vcmp.lt.f32.partialorder %v1835_v36, 8388608.0 }
  0x9f   :  { %v1197_v8 = vsub.f32 %v1069_v11, %v3183_v16  ;;  %v1845_v50 = vcvt.f32.s32 %v689_v40  ;;  %v1848_v3 = vand.u32 2147483648, %v689_v40  ;;  %v1851_v43 = vand.u32 2147483647, %v690_v58 }
  0xa0   :  { %v1070_v14 = vmin.f32 %v942_v48, 255.0  ;;  %v1833_v0 = vor.u32 %v1832_v22, %v1831_v19  ;;  %v1839_v47 = vand.u32 2147483647, %v1838_v60  ;;  %vm3259_vm4 = vcmp.lt.f32.partialorder %v1843_v28, 8388608.0 }
  0xa1   :  { %v1325_v51 = vmul.f32 %v1197_v8, %v2905_v4  ;;  %v1846_v31 = vcvt.s32.f32 %v1845_v50  ;;  %v1853_v29 = vcvt.f32.s32 %v690_v58  ;;  %v1856_v54 = vand.u32 2147483648, %v690_v58 }
  0xa2   :  { %v1198_v56 = vsub.f32 %v1070_v14, %v3183_v16  ;;  %v1834_v17 = vsel %vm3248_vm2, %v1833_v0, %v687_v21  ;;  %v1841_v27 = vor.u32 %v1840_v37, %v1839_v47  ;;  %v691_v33 = vmul.f32 %v3139_v57, %v2871_v35 }
  0xa3   :  { %1453 = vst [vmem:[#allocation5 + $0xa8] sm:$0xff] %v1325_v51  ;;  %v943_v15 = vadd.f32 %v1834_v17, %v3183_v16  ;;  %v1847_v1 = vand.u32 2147483647, %v1846_v31  ;;  %v1854_v38 = vcvt.s32.f32 %v1853_v29  ;;  %vm3272_vm5 = vcmp.lt.f32.partialorder %v1851_v43, 8388608.0 }
  0xa4   :  { %v1326_v26 = vmul.f32 %v1198_v56, %v2905_v4  ;;  %v1842_v34 = vsel %vm3254_vm3, %v1841_v27, %v688_v6  ;;  %v692_v20 = vmul.f32 %v3139_v57, %v2875_v45  ;;  %v1859_v7 = vand.u32 2147483647, %v691_v33 }
  0xa5   :  { %v1071_v25 = vmin.f32 %v943_v15, 255.0  ;;  %v944_v24 = vadd.f32 %v1842_v34, %v3183_v16  ;;  %v1849_v21 = vor.u32 %v1848_v3, %v1847_v1  ;;  %v1855_v46 = vand.u32 2147483647, %v1854_v38  ;;  %v3320_v1 = vld [vmem:[#allocation2 + $0x118] sm:$0xff] }
  0xa6   :  { %1454 = vst [vmem:[#allocation5 + $0xb0] sm:$0xff] %v1326_v26  ;;  %v1861_v35 = vcvt.f32.s32 %v691_v33  ;;  %v1867_v39 = vand.u32 2147483647, %v692_v20  ;;  %v693_v41 = vmul.f32 %v3139_v57, %v2879_v52  ;;  %vm3285_vm6 = vcmp.lt.f32.partialorder %v1859_v7, 8388608.0 }
  0xa7   :  { %v1199_v6 = vsub.f32 %v1071_v25, %v3183_v16  ;;  %v1072_v63 = vmin.f32 %v944_v24, 255.0  ;;  %v1850_v62 = vsel %vm3259_vm4, %v1849_v21, %v689_v40  ;;  %v1857_v32 = vor.u32 %v1856_v54, %v1855_v46  ;;  %v3325_v25 = vld [vmem:[#allocation2 + $0x120] sm:$0xff] }
  0xa8   :  { %v945_v45 = vadd.f32 %v1850_v62, %v3183_v16  ;;  %v1862_v13 = vcvt.s32.f32 %v1861_v35  ;;  %v1864_v36 = vand.u32 2147483648, %v691_v33  ;;  %v1869_v22 = vcvt.f32.s32 %v692_v20 }
  0xa9   :  { %v1327_v2 = vmul.f32 %v1199_v6, %v2905_v4  ;;  %v1200_v23 = vsub.f32 %v1072_v63, %v3183_v16  ;;  %v1858_v52 = vsel %vm3272_vm5, %v1857_v32, %v690_v58  ;;  %vm3294_vm7 = vcmp.lt.f32.partialorder %v1867_v39, 8388608.0  ;;  %v3332_v63 = vld [vmem:[#allocation2 + $0x128] sm:$0xff] }
  0xaa   :  { %v1073_v18 = vmin.f32 %v945_v45, 255.0  ;;  %v946_v40 = vadd.f32 %v1858_v52, %v3183_v16  ;;  %v1863_v11 = vand.u32 2147483647, %v1862_v13  ;;  %v1870_v37 = vcvt.s32.f32 %v1869_v22 }
  0xab   :  { %1455 = vst [vmem:[#allocation5 + $0xb8] sm:$0xff] %v1327_v2  ;;  %v1328_v44 = vmul.f32 %v1200_v23, %v2905_v4  ;;  %v1872_v48 = vand.u32 2147483648, %v692_v20  ;;  %v1877_v19 = vcvt.f32.s32 %v693_v41  ;;  %v1875_v58 = vand.u32 2147483647, %v693_v41  ;;  %v3343_v23 = vld [vmem:[#allocation2 + $0x130] sm:$0xff] }
  0xac   :  { %v1201_v60 = vsub.f32 %v1073_v18, %v3183_v16  ;;  %v1074_v28 = vmin.f32 %v946_v40, 255.0  ;;  %v1865_v8 = vor.u32 %v1864_v36, %v1863_v11  ;;  %v1871_v50 = vand.u32 2147483647, %v1870_v37  ;;  %v3355_v37 = vld [vmem:[#allocation2 + $0x138] sm:$0xff] }
  0xad   :  { %1456 = vst [vmem:[#allocation5 + $0xc0] sm:$0xff] %v1328_v44  ;;  %v1878_v3 = vcvt.s32.f32 %v1877_v19  ;;  %v1880_v14 = vand.u32 2147483648, %v693_v41  ;;  %v694_v0 = vmul.f32 %v3139_v57, %v2883_v61  ;;  %v695_v59 = vmul.f32 %v3139_v57, %v2887_v9 }
  0xae   :  { %v1329_v47 = vmul.f32 %v1201_v60, %v2905_v4  ;;  %v1202_v43 = vsub.f32 %v1074_v28, %v3183_v16  ;;  %v1866_v51 = vsel %vm3285_vm6, %v1865_v8, %v691_v33  ;;  %v1873_v29 = vor.u32 %v1872_v48, %v1871_v50 }
  0xaf   :  { %v947_v31 = vadd.f32 %v1866_v51, %v3183_v16  ;;  %v1879_v56 = vand.u32 2147483647, %v1878_v3  ;;  %v196_v17 = vmax.f32 %v195_v55, %v3300_v49  ;;  %vm3316_vm8 = vcmp.lt.f32.partialorder %v1875_v58, 8388608.0  ;;  %v3363_v58 = vld [vmem:[#allocation2 + $0x140] sm:$0xff] }
  0xb0   :  { %1457 = vst [vmem:[#allocation5 + $0xc8] sm:$0xff] %v1329_v47  ;;  %v1330_v61 = vmul.f32 %v1202_v43, %v2905_v4  ;;  %v1883_v54 = vand.u32 2147483647, %v694_v0  ;;  %v1885_v15 = vcvt.f32.s32 %v694_v0  ;;  %v1874_v57 = vsel %vm3294_vm7, %v1873_v29, %v692_v20  ;;  %v3368_v47 = vld [vmem:[#allocation2 + $0x148] sm:$0xff] }
  0xb1   :  { %v1075_v9 = vmin.f32 %v947_v31, 255.0  ;;  %v1881_v38 = vor.u32 %v1880_v14, %v1879_v56  ;;  %v1888_v33 = vand.u32 2147483648, %v694_v0  ;;  %v948_v55 = vadd.f32 %v1874_v57, %v3183_v16 }
  0xb2   :  { %1458 = vst [vmem:[#allocation5 + $0xd0] sm:$0xff] %v1330_v61  ;;  %v1886_v26 = vcvt.s32.f32 %v1885_v15  ;;  %v1891_v34 = vand.u32 2147483647, %v695_v59  ;;  %v1893_v5 = vcvt.f32.s32 %v695_v59  ;;  %v1896_v46 = vand.u32 2147483648, %v695_v59 }
  0xb3   :  { %v1203_v24 = vsub.f32 %v1075_v9, %v3183_v16  ;;  %v1882_v21 = vsel %vm3316_vm8, %v1881_v38, %v693_v41  ;;  %v197_v7 = vmax.f32 %v196_v17, %v3320_v1  ;;  %v1076_v35 = vmin.f32 %v948_v55, 255.0  ;;  %v3384_v38 = vld [vmem:[#allocation2 + $0x180] sm:$0xff] }
  0xb4   :  { %v949_v20 = vadd.f32 %v1882_v21, %v3183_v16  ;;  %v1887_v39 = vand.u32 2147483647, %v1886_v26  ;;  %v1894_v6 = vcvt.s32.f32 %v1893_v5  ;;  %vm3335_vm9 = vcmp.lt.f32.partialorder %v1883_v54, 8388608.0  ;;  %v3379_v54 = vld [vmem:[#allocation2 + $0x158] sm:$0xff]  ;;  %v3388_v55 = vld [vmem:[#allocation2 + $0x160] sm:$0xff]  ;;  %v3396_v5 = vld [vmem:[#allocation2 + $0x190] sm:$0xff] }
  0xb5   :  { %v1331_v62 = vmul.f32 %v1203_v24, %v2905_v4  ;;  %v198_v45 = vmax.f32 %v197_v7, %v3325_v25  ;;  %v363_v41 = vmin.f32 %v3133_v42, %v3135_v53  ;;  %v1204_v10 = vsub.f32 %v1076_v35, %v3183_v16  ;;  %v3398_v24 = vld [vmem:[#allocation2 + $0x168] sm:$0xff] }
  0xb6   :  { %v1077_v13 = vmin.f32 %v949_v20, 255.0  ;;  %v1889_v36 = vor.u32 %v1888_v33, %v1887_v39  ;;  %v1895_v2 = vand.u32 2147483647, %v1894_v6  ;;  %vm3345_vm10 = vcmp.lt.f32.partialorder %v1891_v34, 8388608.0  ;;  %v3386_v33 = vld [vmem:[#allocation2 + $0x188] sm:$0xff]  ;;  %v3404_v20 = vld [vmem:[#allocation2 + $0x198] sm:$0xff] }
  0xb7   :  { %1459 = vst [vmem:[#allocation5 + $0xd8] sm:$0xff] %v1331_v62  ;;  %v199_v22 = vmax.f32 %v198_v45, %v3332_v63  ;;  %v364_v18 = vmin.f32 %v363_v41, %v3300_v49  ;;  %v1332_v40 = vmul.f32 %v1204_v10, %v2905_v4  ;;  %v384_v26 = vmin.f32 %v3384_v38, %v3386_v33  ;;  %v3406_v39 = vld [vmem:[#allocation2 + $0x170] sm:$0xff]  ;;  %v3412_v41 = vld [vmem:[#allocation2 + $0x1a0] sm:$0xff]  ;;  %v3414_v10 = vld [vmem:[#allocation2 + $0x178] sm:$0xff] }
  0xb8   :  { %v1205_v11 = vsub.f32 %v1077_v13, %v3183_v16  ;;  %v1890_v30 = vsel %vm3335_vm9, %v1889_v36, %v694_v0  ;;  %v1897_v44 = vor.u32 %v1896_v46, %v1895_v2 }
  0xb9   :  { %v950_v48 = vadd.f32 %v1890_v30, %v3183_v16  ;;  %v200_v19 = vmax.f32 %v199_v22, %v3343_v23  ;;  %v365_v60 = vmin.f32 %v364_v18, %v3320_v1  ;;  %1460 = vst [vmem:[#allocation5 + $0xe0] sm:$0xff] %v1332_v40  ;;  %v385_v46 = vmin.f32 %v384_v26, %v3396_v5  ;;  %v3420_v22 = vld [vmem:[#allocation2 + $0x1a8] sm:$0xff] }
  0xba   :  { %v1333_v28 = vmul.f32 %v1205_v11, %v2905_v4  ;;  %v1898_v8 = vsel %vm3345_vm10, %v1897_v44, %v695_v59  ;;  %v3373_v59 = vld [vmem:[#allocation2 + $0x150] sm:$0xff] }
  0xbb   :  { %v1078_v50 = vmin.f32 %v950_v48, 255.0  ;;  %v951_v3 = vadd.f32 %v1898_v8, %v3183_v16  ;;  %v201_v14 = vmax.f32 %v200_v19, %v3355_v37  ;;  %v366_v0 = vmin.f32 %v365_v60, %v3325_v25  ;;  %v3426_v44 = vld [vmem:[#allocation2 + $0x1b0] sm:$0xff]  ;;  %v3431_v8 = vld [vmem:[#allocation2 + $0x1b8] sm:$0xff] }
  0xbc   :  { %1461 = vst [vmem:[#allocation5 + $0xe8] sm:$0xff] %v1333_v28  ;;  %v386_v62 = vmin.f32 %v385_v46, %v3404_v20 }
  0xbd   :  { %v1206_v43 = vsub.f32 %v1078_v50, %v3183_v16  ;;  %v1079_v51 = vmin.f32 %v951_v3, 255.0  ;;  %v202_v31 = vmax.f32 %v201_v14, %v3363_v58  ;;  %v367_v29 = vmin.f32 %v366_v0, %v3332_v63 }
  0xbe   :  { %v387_v36 = vmin.f32 %v386_v62, %v3412_v41 }
  0xbf   :  { %v1334_v56 = vmul.f32 %v1206_v43, %v2905_v4  ;;  %v1207_v17 = vsub.f32 %v1079_v51, %v3183_v16  ;;  %v203_v61 = vmax.f32 %v202_v31, %v3368_v47  ;;  %v368_v27 = vmin.f32 %v367_v29, %v3343_v23  ;;  %v3436_v43 = vld [vmem:[#allocation2 + $0x1c0] sm:$0xff] }
  0xc0   :  { %v216_v16 = vmax.f32 %v3384_v38, %v3386_v33  ;;  %v388_v40 = vmin.f32 %v387_v36, %v3420_v22 }
  0xc1   :  { %1462 = vst [vmem:[#allocation5 + $0xf0] sm:$0xff] %v1334_v56  ;;  %v1335_v15 = vmul.f32 %v1207_v17, %v2905_v4  ;;  %v204_v9 = vmax.f32 %v203_v61, %v3373_v59  ;;  %v369_v57 = vmin.f32 %v368_v27, %v3355_v37  ;;  %v3441_v17 = vld [vmem:[#allocation2 + $0x1c8] sm:$0xff] }
  0xc2   :  { %v217_v21 = vmax.f32 %v216_v16, %v3396_v5  ;;  %v389_v19 = vmin.f32 %v388_v40, %v3426_v44  ;;  %v3461_v40 = vld [vmem:[#allocation2 + $0x1f0] sm:$0xff] }
  0xc3   :  { %1463 = vst [vmem:[#allocation5 + $0xf8] sm:$0xff] %v1335_v15  ;;  %v205_v34 = vmax.f32 %v204_v9, %v3379_v54  ;;  %v370_v4 = vmin.f32 %v369_v57, %v3363_v58  ;;  %v3445_v57 = vld [vmem:[#allocation2 + $0x1d0] sm:$0xff] }
  0xc4   :  { %v218_v6 = vmax.f32 %v217_v21, %v3404_v20  ;;  %v390_v3 = vmin.f32 %v389_v19, %v3431_v8  ;;  %v3465_v19 = vld [vmem:[#allocation2 + $0x1f8] sm:$0xff] }
  0xc5   :  { %v206_v7 = vmax.f32 %v205_v34, %v3388_v55  ;;  %v371_v35 = vmin.f32 %v370_v4, %v3368_v47  ;;  %v3449_v4 = vld [vmem:[#allocation2 + $0x1d8] sm:$0xff] }
  0xc6   :  { %v219_v13 = vmax.f32 %v218_v6, %v3412_v41  ;;  %v391_v31 = vmin.f32 %v390_v3, %v3436_v43  ;;  %v3453_v6 = vld [vmem:[#allocation2 + $0x1e0] sm:$0xff] }
  0xc7   :  { %v207_v32 = vmax.f32 %v206_v7, %v3398_v24  ;;  %v372_v45 = vmin.f32 %v371_v35, %v3373_v59 }
  0xc8   :  { %v220_v18 = vmax.f32 %v219_v13, %v3420_v22  ;;  %v392_v27 = vmin.f32 %v391_v31, %v3441_v17  ;;  %v3457_v13 = vld [vmem:[#allocation2 + $0x1e8] sm:$0xff] }
  0xc9   :  { %v208_v2 = vmax.f32 %v207_v32, %v3406_v39  ;;  %v373_v52 = vmin.f32 %v372_v45, %v3379_v54 }
  0xca   :  { %v221_v48 = vmax.f32 %v220_v18, %v3426_v44  ;;  %v393_v26 = vmin.f32 %v392_v27, %v3445_v57 }
  0xcb   :  { %v209_v11 = vmax.f32 %v208_v2, %v3414_v10  ;;  %v374_v30 = vmin.f32 %v373_v52, %v3388_v55 }
  0xcc   :  { %v222_v50 = vmax.f32 %v221_v48, %v3431_v8  ;;  %v394_v46 = vmin.f32 %v393_v26, %v3449_v4 }
  0xcd   :  { %v210_v60 = vrot.slane %v209_v11, 4  ;;  %v375_v28 = vmin.f32 %v374_v30, %v3398_v24 }
  0xce   :  { %v223_v51 = vmax.f32 %v222_v50, %v3436_v43  ;;  %v395_v32 = vmin.f32 %v394_v46, %v3453_v6 }
  0xcf   :  { %v211_v14 = vmax.f32 %v209_v11, %v210_v60  ;;  %v376_v0 = vmin.f32 %v375_v28, %v3406_v39 }
  0xd0   :  { %v224_v61 = vmax.f32 %v223_v51, %v3441_v17  ;;  %v396_v2 = vmin.f32 %v395_v32, %v3457_v13 }
  0xd1   :  { %v212_v29 = vrot.slane %v211_v14, 2  ;;  %v377_v56 = vmin.f32 %v376_v0, %v3414_v10 }
  0xd2   :  { %v225_v16 = vmax.f32 %v224_v61, %v3445_v57  ;;  %v397_v30 = vmin.f32 %v396_v2, %v3461_v40 }
  0xd3   :  { %v213_v15 = vmax.f32 %v211_v14, %v212_v29  ;;  %v378_v9 = vrot.slane %v377_v56, 4 }
  0xd4   :  { %v226_v21 = vmax.f32 %v225_v16, %v3449_v4  ;;  %v398_v28 = vmin.f32 %v397_v30, %v3465_v19 }
  0xd5   :  { %v379_v34 = vmin.f32 %v377_v56, %v378_v9  ;;  %v214_v7 = vrot.slane %v213_v15, 1 }
  0xd6   :  { %v227_v62 = vmax.f32 %v226_v21, %v3453_v6  ;;  %v399_v14 = vrot.slane %v398_v28, 4 }
  0xd7   :  { %v380_v35 = vrot.slane %v379_v34, 2  ;;  %v215_v52 = vmax.f32 %v213_v15, %v214_v7 }
  0xd8   :  { %v228_v36 = vmax.f32 %v227_v62, %v3457_v13  ;;  %v400_v31 = vmin.f32 %v398_v28, %v399_v14 }
  0xd9   :  { %v381_v45 = vmin.f32 %v379_v34, %v380_v35 }
  0xda   :  { %v229_v11 = vmax.f32 %v228_v36, %v3461_v40  ;;  %v401_v61 = vrot.slane %v400_v31, 2 }
  0xdb   :  { %v382_v18 = vrot.slane %v381_v45, 1 }
  0xdc   :  { %v230_v60 = vmax.f32 %v229_v11, %v3465_v19  ;;  %v402_v15 = vmin.f32 %v400_v31, %v401_v61 }
  0xdd   :  { %v383_v48 = vmin.f32 %v381_v45, %v382_v18 }
  0xde   :  { %v231_v3 = vrot.slane %v230_v60, 4  ;;  %v403_v16 = vrot.slane %v402_v15, 1 }
  0xdf   :  { %v491_v50 = vsub.f32 %v215_v52, %v383_v48  ;;  %v642_v18 = vsub.f32 0.0, %v383_v48 }
  0xe0   :  { %v232_v51 = vmax.f32 %v230_v60, %v231_v3  ;;  %v3473_v34 = vmin.f32 %v402_v15, %v403_v16 }
  0xe1   :  { %v506_v0 = vmul.f32 %v2889_v12, %v491_v50 }
  0xe2   :  { %v233_v56 = vrot.slane %v232_v51, 2 }
  0xe3   :  { %v3470_v29 = vmax.f32 %v506_v0, 1e-08 }
  0xe4   :  { %v234_v27 = vmax.f32 %v232_v51, %v233_v56 }
  0xe5   :  { %2678 = vrcp.f32 %v3470_v29  ;;  %vm555_vm11 = vweird.f32 %v3470_v29  ;;  %v561_v35 = vand.u32 2147483648, %v3470_v29  ;;  %v559_v32 = vand.u32 2147483647, %v3470_v29 }
  0xe6   :  { %v235_v9 = vrot.slane %v234_v27, 1 }
  0xe7   :  { %v562_v2 = vor.u32 1.1754944e-38, %v561_v35  ;;  %vm560_vm14 = vcmp.eq.f32.partialorder %v559_v32, 8.507059e+37 }
  0xe8   :  { %v236_v26 = vmax.f32 %v234_v27, %v235_v9 }
  0xea   :  { %v492_v7 = vsub.f32 %v236_v26, %v3473_v34 }
  0xeb   :  { %v2679_v21 = vpop.eup %2678 }
  0xec   :  { %v551_v46 = vmul.f32 %v2679_v21, %v3470_v29  ;;  %vm556_vm12 = vweird.f32 %v2679_v21  ;;  %v507_v45 = vmul.f32 %v2889_v12, %v492_v7 }
  0xed   :  { %vm557_vm13 = vmor %vm555_vm11, %vm556_vm12 }
  0xee   :  { %v552_v62 = vsub.f32 1.0, %v551_v46  ;;  %v3481_v11 = vmax.f32 %v507_v45, 1e-08 }
  0xf0   :  { %v553_v36 = vmul.f32 %v2679_v21, %v552_v62  ;;  %2680 = vrcp.f32 %v3481_v11 }
  0xf2   :  { %v554_v52 = vadd.f32 %v2679_v21, %v553_v36 }
  0xf4   :  { %v558_v30 = vsel %vm557_vm13, %v2679_v21, %v554_v52 }
  0xf5   :  { %v3483_v60 = vsel %vm560_vm14, %v562_v2, %v558_v30 }
  0xf6   :  { %v650_v28 = vmul.f32 %v642_v18, %v3483_v60  ;;  %v696_v50 = vmul.f32 %v3483_v60, %v3133_v42  ;;  %v697_v3 = vmul.f32 %v3483_v60, %v3135_v53  ;;  %v698_v14 = vmul.f32 %v3483_v60, %v3300_v49 }
  0xf7   :  { %v3495_v48 = vmul.f32 %v3483_v60, %v3320_v1  ;;  %v3499_v0 = vmul.f32 %v3483_v60, %v3325_v25  ;;  %v3503_v51 = vmul.f32 %v3483_v60, %v3332_v63  ;;  %v3507_v56 = vmul.f32 %v3483_v60, %v3343_v23  ;;  %v3517_v23 = vpop.eup %2680 }
  0xf8   :  { %v1595_v42 = vand.u32 2147483647, %v650_v28  ;;  %v1597_v31 = vcvt.f32.s32 %v650_v28  ;;  %v1899_v53 = vand.u32 2147483647, %v696_v50  ;;  %v1600_v49 = vand.u32 2147483648, %v650_v28 }
  0xf9   :  { %v1901_v61 = vcvt.f32.s32 %v696_v50  ;;  %v1907_v27 = vand.u32 2147483647, %v697_v3  ;;  %v1909_v1 = vcvt.f32.s32 %v697_v3  ;;  %v1904_v63 = vand.u32 2147483648, %v696_v50 }
  0xfa   :  { %vm3509_vm15 = vcmp.lt.f32.partialorder %v1595_v42, 8388608.0  ;;  %v1598_v25 = vcvt.s32.f32 %v1597_v31  ;;  %vm3513_vm0 = vcmp.lt.f32.partialorder %v1899_v53, 8388608.0  ;;  %v1912_v21 = vand.u32 2147483648, %v697_v3 }
  0xfb   :  { %v1902_v16 = vcvt.s32.f32 %v1901_v61  ;;  %v1910_v26 = vcvt.s32.f32 %v1909_v1  ;;  %v1915_v46 = vand.u32 2147483647, %v698_v14  ;;  %vm3519_vm1 = vcmp.lt.f32.partialorder %v1907_v27, 8388608.0 }
  0xfc   :  { %v1599_v7 = vand.u32 2147483647, %v1598_v25  ;;  %v1917_v62 = vcvt.f32.s32 %v698_v14  ;;  %v1923_v32 = vand.u32 2147483647, %v3495_v48  ;;  %v1920_v2 = vand.u32 2147483648, %v698_v14 }
  0xfd   :  { %v1903_v45 = vand.u32 2147483647, %v1902_v16  ;;  %v1911_v36 = vand.u32 2147483647, %v1910_v26  ;;  %v1925_v52 = vcvt.f32.s32 %v3495_v48  ;;  %vm3525_vm2 = vcmp.lt.f32.partialorder %v1915_v46, 8388608.0 }
  0xfe   :  { %v1601_v18 = vor.u32 %v1600_v49, %v1599_v7  ;;  %v1918_v42 = vcvt.s32.f32 %v1917_v62  ;;  %v1928_v31 = vand.u32 2147483648, %v3495_v48  ;;  %v1931_v1 = vand.u32 2147483647, %v3499_v0 }
  0xff   :  { %v1905_v53 = vor.u32 %v1904_v63, %v1903_v45  ;;  %v1913_v61 = vor.u32 %v1912_v21, %v1911_v36  ;;  %v1926_v27 = vcvt.s32.f32 %v1925_v52  ;;  %vm3535_vm3 = vcmp.lt.f32.partialorder %v1923_v32, 8388608.0 }
 0x100   :  { %v3533_v25 = vsel %vm3509_vm15, %v1601_v18, %v650_v28  ;;  %v1919_v16 = vand.u32 2147483647, %v1918_v42  ;;  %v1933_v49 = vcvt.f32.s32 %v3499_v0  ;;  %v1936_v7 = vand.u32 2147483648, %v3499_v0 }
 0x101   :  { %v1906_v46 = vsel %vm3513_vm0, %v1905_v53, %v696_v50  ;;  %v1914_v63 = vsel %vm3519_vm1, %v1913_v61, %v697_v3  ;;  %v1927_v21 = vand.u32 2147483647, %v1926_v27  ;;  %vm3547_vm4 = vcmp.lt.f32.partialorder %v1931_v1, 8388608.0 }
 0x102   :  { %v952_v15 = vadd.f32 %v1906_v46, %v3533_v25  ;;  %v953_v28 = vadd.f32 %v1914_v63, %v3533_v25  ;;  %v1921_v62 = vor.u32 %v1920_v2, %v1919_v16  ;;  %v1934_v32 = vcvt.s32.f32 %v1933_v49 }
 0x103   :  { %v1929_v45 = vor.u32 %v1928_v31, %v1927_v21  ;;  %v1939_v9 = vand.u32 2147483647, %v3503_v51  ;;  %v1941_v50 = vcvt.f32.s32 %v3503_v51  ;;  %v1944_v53 = vand.u32 2147483648, %v3503_v51 }
 0x104   :  { %v1080_v35 = vmin.f32 %v952_v15, 255.0  ;;  %v1081_v3 = vmin.f32 %v953_v28, 255.0  ;;  %v1922_v52 = vsel %vm3525_vm2, %v1921_v62, %v698_v14  ;;  %v1935_v18 = vand.u32 2147483647, %v1934_v32 }
 0x105   :  { %v954_v42 = vadd.f32 %v1922_v52, %v3533_v25  ;;  %v1930_v2 = vsel %vm3535_vm3, %v1929_v45, %v3495_v48  ;;  %v1942_v31 = vcvt.s32.f32 %v1941_v50  ;;  %vm3563_vm5 = vcmp.lt.f32.partialorder %v1939_v9, 8388608.0 }
 0x106   :  { %v1208_v61 = vsub.f32 %v1080_v35, %v3533_v25  ;;  %v1209_v27 = vsub.f32 %v1081_v3, %v3533_v25  ;;  %v955_v1 = vadd.f32 %v1930_v2, %v3533_v25  ;;  %v1937_v16 = vor.u32 %v1936_v7, %v1935_v18 }
 0x107   :  { %v1082_v49 = vmin.f32 %v954_v42, 255.0  ;;  %v1943_v30 = vand.u32 2147483647, %v1942_v31  ;;  %v1949_v46 = vcvt.f32.s32 %v3507_v56  ;;  %v1947_v62 = vand.u32 2147483647, %v3507_v56 }
 0x108   :  { %v1336_v48 = vmul.f32 %v1208_v61, %v3470_v29  ;;  %v1337_v26 = vmul.f32 %v1209_v27, %v3470_v29  ;;  %v1083_v63 = vmin.f32 %v955_v1, 255.0  ;;  %v1938_v21 = vsel %vm3547_vm4, %v1937_v16, %v3499_v0 }
 0x109   :  { %v1210_v15 = vsub.f32 %v1082_v49, %v3533_v25  ;;  %v956_v7 = vadd.f32 %v1938_v21, %v3533_v25  ;;  %v1945_v28 = vor.u32 %v1944_v53, %v1943_v30  ;;  %v1950_v45 = vcvt.s32.f32 %v1949_v46 }
 0x10a   :  { %1464 = vst [vmem:[#allocation5 + $0x100] sm:$0xff] %v1336_v48  ;;  %v1211_v32 = vsub.f32 %v1083_v63, %v3533_v25  ;;  %v1952_v9 = vand.u32 2147483648, %v3507_v56  ;;  %v703_v50 = vmul.f32 %v3483_v60, %v3355_v37  ;;  %v704_v3 = vmul.f32 %v3483_v60, %v3363_v58 }
 0x10b   :  { %1465 = vst [vmem:[#allocation5 + $0x108] sm:$0xff] %v1337_v26  ;;  %v1338_v36 = vmul.f32 %v1210_v15, %v3470_v29  ;;  %v1084_v0 = vmin.f32 %v956_v7, 255.0  ;;  %v1946_v35 = vsel %vm3563_vm5, %v1945_v28, %v3503_v51  ;;  %v1951_v42 = vand.u32 2147483647, %v1950_v45 }
 0x10c   :  { %v1339_v52 = vmul.f32 %v1211_v32, %v3470_v29  ;;  %v957_v18 = vadd.f32 %v1946_v35, %v3533_v25  ;;  %v1955_v2 = vand.u32 2147483647, %v703_v50  ;;  %vm3589_vm6 = vcmp.lt.f32.partialorder %v1947_v62, 8388608.0 }
 0x10d   :  { %1466 = vst [vmem:[#allocation5 + $0x110] sm:$0xff] %v1338_v36  ;;  %v1212_v37 = vsub.f32 %v1084_v0, %v3533_v25  ;;  %v1957_v53 = vcvt.f32.s32 %v703_v50  ;;  %v1963_v61 = vand.u32 2147483647, %v704_v3  ;;  %v1953_v27 = vor.u32 %v1952_v9, %v1951_v42 }
 0x10e   :  { %1467 = vst [vmem:[#allocation5 + $0x118] sm:$0xff] %v1339_v52  ;;  %v1085_v51 = vmin.f32 %v957_v18, 255.0  ;;  %v1960_v1 = vand.u32 2147483648, %v703_v50  ;;  %v1965_v58 = vcvt.f32.s32 %v704_v3  ;;  %vm3594_vm7 = vcmp.lt.f32.partialorder %v1955_v2, 8388608.0 }
 0x10f   :  { %v1340_v16 = vmul.f32 %v1212_v37, %v3470_v29  ;;  %v1958_v14 = vcvt.s32.f32 %v1957_v53  ;;  %v1968_v30 = vand.u32 2147483648, %v704_v3  ;;  %v1954_v48 = vsel %vm3589_vm6, %v1953_v27, %v3507_v56 }
 0x110   :  { %v1213_v46 = vsub.f32 %v1085_v51, %v3533_v25  ;;  %v1966_v26 = vcvt.s32.f32 %v1965_v58  ;;  %v705_v63 = vmul.f32 %v3483_v60, %v3368_v47  ;;  %v958_v21 = vadd.f32 %v1954_v48, %v3533_v25 }
 0x111   :  { %1468 = vst [vmem:[#allocation5 + $0x120] sm:$0xff] %v1340_v16  ;;  %v1959_v15 = vand.u32 2147483647, %v1958_v14  ;;  %vm3605_vm8 = vcmp.lt.f32.partialorder %v1963_v61, 8388608.0  ;;  %v706_v28 = vmul.f32 %v3483_v60, %v3373_v59  ;;  %v707_v47 = vmul.f32 %v3483_v60, %v3379_v54 }
 0x112   :  { %v1341_v62 = vmul.f32 %v1213_v46, %v3470_v29  ;;  %v1967_v32 = vand.u32 2147483647, %v1966_v26  ;;  %v1971_v45 = vand.u32 2147483647, %v705_v63  ;;  %v1973_v56 = vcvt.f32.s32 %v705_v63 }
 0x113   :  { %v1086_v9 = vmin.f32 %v958_v21, 255.0  ;;  %v1961_v36 = vor.u32 %v1960_v1, %v1959_v15  ;;  %v1979_v0 = vand.u32 2147483647, %v706_v28  ;;  %v1976_v18 = vand.u32 2147483648, %v705_v63 }
 0x114   :  { %1469 = vst [vmem:[#allocation5 + $0x128] sm:$0xff] %v1341_v62  ;;  %v1969_v35 = vor.u32 %v1968_v30, %v1967_v32  ;;  %v1974_v52 = vcvt.s32.f32 %v1973_v56  ;;  %v1981_v42 = vcvt.f32.s32 %v706_v28  ;;  %vm3617_vm9 = vcmp.lt.f32.partialorder %v1971_v45, 8388608.0 }
 0x115   :  { %v1214_v2 = vsub.f32 %v1086_v9, %v3533_v25  ;;  %v1962_v59 = vsel %vm3594_vm7, %v1961_v36, %v703_v50  ;;  %v1984_v31 = vand.u32 2147483648, %v706_v28  ;;  %vm3626_vm10 = vcmp.lt.f32.partialorder %v1979_v0, 8388608.0 }
 0x116   :  { %v959_v53 = vadd.f32 %v1962_v59, %v3533_v25  ;;  %v1970_v54 = vsel %vm3605_vm8, %v1969_v35, %v704_v3  ;;  %v1975_v61 = vand.u32 2147483647, %v1974_v52  ;;  %v1982_v51 = vcvt.s32.f32 %v1981_v42 }
 0x117   :  { %v1342_v27 = vmul.f32 %v1214_v2, %v3470_v29  ;;  %v960_v1 = vadd.f32 %v1970_v54, %v3533_v25  ;;  %v1989_v50 = vcvt.f32.s32 %v707_v47  ;;  %v1987_v30 = vand.u32 2147483647, %v707_v47 }
 0x118   :  { %v1087_v16 = vmin.f32 %v959_v53, 255.0  ;;  %v1977_v49 = vor.u32 %v1976_v18, %v1975_v61  ;;  %v1983_v14 = vand.u32 2147483647, %v1982_v51  ;;  %v1992_v26 = vand.u32 2147483648, %v707_v47 }
 0x119   :  { %1470 = vst [vmem:[#allocation5 + $0x130] sm:$0xff] %v1342_v27  ;;  %v1088_v46 = vmin.f32 %v960_v1, 255.0  ;;  %v1990_v48 = vcvt.s32.f32 %v1989_v50  ;;  %v708_v3 = vmul.f32 %v3483_v60, %v3388_v55  ;;  %v709_v62 = vmul.f32 %v3483_v60, %v3398_v24 }
 0x11a   :  { %v1215_v21 = vsub.f32 %v1087_v16, %v3533_v25  ;;  %v1978_v15 = vsel %vm3617_vm9, %v1977_v49, %v705_v63  ;;  %v1985_v7 = vor.u32 %v1984_v31, %v1983_v14  ;;  %vm3642_vm11 = vcmp.lt.f32.partialorder %v1987_v30, 8388608.0 }
 0x11b   :  { %v1216_v32 = vsub.f32 %v1088_v46, %v3533_v25  ;;  %v961_v45 = vadd.f32 %v1978_v15, %v3533_v25  ;;  %v1991_v56 = vand.u32 2147483647, %v1990_v48  ;;  %v1995_v9 = vand.u32 2147483647, %v708_v3 }
 0x11c   :  { %v1343_v36 = vmul.f32 %v1215_v21, %v3470_v29  ;;  %v1986_v55 = vsel %vm3626_vm10, %v1985_v7, %v706_v28  ;;  %v1997_v63 = vcvt.f32.s32 %v708_v3  ;;  %v2000_v2 = vand.u32 2147483648, %v708_v3 }
 0x11d   :  { %v1344_v35 = vmul.f32 %v1216_v32, %v3470_v29  ;;  %v1089_v52 = vmin.f32 %v961_v45, 255.0  ;;  %v962_v24 = vadd.f32 %v1986_v55, %v3533_v25  ;;  %v1993_v18 = vor.u32 %v1992_v26, %v1991_v56 }
 0x11e   :  { %1471 = vst [vmem:[#allocation5 + $0x138] sm:$0xff] %v1343_v36  ;;  %v1998_v42 = vcvt.s32.f32 %v1997_v63  ;;  %v2003_v59 = vand.u32 2147483647, %v709_v62  ;;  %v2005_v37 = vcvt.f32.s32 %v709_v62  ;;  %vm3651_vm12 = vcmp.lt.f32.partialorder %v1995_v9, 8388608.0 }
 0x11f   :  { %1472 = vst [vmem:[#allocation5 + $0x140] sm:$0xff] %v1344_v35  ;;  %v1217_v31 = vsub.f32 %v1089_v52, %v3533_v25  ;;  %v1090_v28 = vmin.f32 %v962_v24, 255.0  ;;  %v1994_v53 = vsel %vm3642_vm11, %v1993_v18, %v707_v47  ;;  %v2008_v1 = vand.u32 2147483648, %v709_v62 }
 0x120   :  { %v963_v61 = vadd.f32 %v1994_v53, %v3533_v25  ;;  %v1999_v51 = vand.u32 2147483647, %v1998_v42  ;;  %v2006_v27 = vcvt.s32.f32 %v2005_v37  ;;  %v710_v16 = vmul.f32 %v3483_v60, %v3406_v39 }
 0x121   :  { %v1345_v58 = vmul.f32 %v1217_v31, %v3470_v29  ;;  %v1218_v50 = vsub.f32 %v1090_v28, %v3533_v25  ;;  %v711_v49 = vmul.f32 %v3483_v60, %v3414_v10  ;;  %vm3662_vm13 = vcmp.lt.f32.partialorder %v2003_v59, 8388608.0 }
 0x122   :  { %v1091_v47 = vmin.f32 %v963_v61, 255.0  ;;  %v2001_v14 = vor.u32 %v2000_v2, %v1999_v51  ;;  %v2007_v46 = vand.u32 2147483647, %v2006_v27  ;;  %v2011_v26 = vand.u32 2147483647, %v710_v16 }
 0x123   :  { %1473 = vst [vmem:[#allocation5 + $0x148] sm:$0xff] %v1345_v58  ;;  %v1346_v48 = vmul.f32 %v1218_v50, %v3470_v29  ;;  %v2013_v21 = vcvt.f32.s32 %v710_v16  ;;  %v566_v15 = vmul.f32 %v3517_v23, %v3481_v11  ;;  %v2016_v7 = vand.u32 2147483648, %v710_v16 }
 0x124   :  { %v1219_v39 = vsub.f32 %v1091_v47, %v3533_v25  ;;  %v2002_v10 = vsel %vm3651_vm12, %v2001_v14, %v708_v3  ;;  %v2009_v60 = vor.u32 %v2008_v1, %v2007_v46  ;;  %v2019_v56 = vand.u32 2147483647, %v711_v49 }
 0x125   :  { %1474 = vst [vmem:[#allocation5 + $0x150] sm:$0xff] %v1346_v48  ;;  %v964_v32 = vadd.f32 %v2002_v10, %v3533_v25  ;;  %v2014_v45 = vcvt.s32.f32 %v2013_v21  ;;  %v2021_v9 = vcvt.f32.s32 %v711_v49  ;;  %vm3676_vm14 = vcmp.lt.f32.partialorder %v2011_v26, 8388608.0  ;;  %v3709_v21 = vld [vmem:[#allocation2 + $0x200] sm:$0xff] }
 0x126   :  { %v1347_v36 = vmul.f32 %v1219_v39, %v3470_v29  ;;  %v2010_v55 = vsel %vm3662_vm13, %v2009_v60, %v709_v62  ;;  %v2024_v63 = vand.u32 2147483648, %v711_v49  ;;  %v567_v18 = vsub.f32 1.0, %v566_v15  ;;  %v3711_v15 = vld [vmem:[#allocation2 + $0x208] sm:$0xff] }
 0x127   :  { %v1092_v35 = vmin.f32 %v964_v32, 255.0  ;;  %v965_v3 = vadd.f32 %v2010_v55, %v3533_v25  ;;  %v2015_v52 = vand.u32 2147483647, %v2014_v45  ;;  %v2022_v24 = vcvt.s32.f32 %v2021_v9 }
 0x128   :  { %1475 = vst [vmem:[#allocation5 + $0x158] sm:$0xff] %v1347_v36  ;;  %vm570_vm15 = vweird.f32 %v3481_v11  ;;  %vm571_vm0 = vweird.f32 %v3517_v23  ;;  %v574_v42 = vand.u32 2147483647, %v3481_v11  ;;  %vm3685_vm1 = vcmp.lt.f32.partialorder %v2019_v56, 8388608.0 }
 0x129   :  { %v1220_v62 = vsub.f32 %v1092_v35, %v3533_v25  ;;  %v1093_v2 = vmin.f32 %v965_v3, 255.0  ;;  %v2017_v59 = vor.u32 %v2016_v7, %v2015_v52  ;;  %v2023_v37 = vand.u32 2147483647, %v2022_v24  ;;  %vm572_vm3 = vmor %vm570_vm15, %vm571_vm0 }
 0x12a   :  { %v568_v28 = vmul.f32 %v3517_v23, %v567_v18  ;;  %vm3690_vm2 = vcmp.eq.f32.partialorder %v574_v42, 8.507059e+37  ;;  %v576_v54 = vand.u32 2147483648, %v3481_v11  ;;  %v643_v14 = vsub.f32 0.0, %v3473_v34 }
 0x12b   :  { %v1348_v61 = vmul.f32 %v1220_v62, %v3470_v29  ;;  %v1221_v51 = vsub.f32 %v1093_v2, %v3533_v25  ;;  %v2018_v27 = vsel %vm3676_vm14, %v2017_v59, %v710_v16  ;;  %v2025_v1 = vor.u32 %v2024_v63, %v2023_v37 }
 0x12c   :  { %v966_v58 = vadd.f32 %v2018_v27, %v3533_v25  ;;  %v569_v50 = vadd.f32 %v3517_v23, %v568_v28  ;;  %v577_v47 = vor.u32 1.1754944e-38, %v576_v54  ;;  %v237_v45 = vmax.f32 %v3709_v21, %v3711_v15 }
 0x12d   :  { %1476 = vst [vmem:[#allocation5 + $0x160] sm:$0xff] %v1348_v61  ;;  %v1349_v30 = vmul.f32 %v1221_v51, %v3470_v29  ;;  %v2026_v46 = vsel %vm3685_vm1, %v2025_v1, %v711_v49 }
 0x12e   :  { %v1094_v48 = vmin.f32 %v966_v58, 255.0  ;;  %v967_v16 = vadd.f32 %v2026_v46, %v3533_v25  ;;  %v573_v26 = vsel %vm572_vm3, %v3517_v23, %v569_v50 }
 0x12f   :  { %1477 = vst [vmem:[#allocation5 + $0x168] sm:$0xff] %v1349_v30  ;;  %v3715_v39 = vsel %vm3690_vm2, %v577_v47, %v573_v26 }
 0x130   :  { %v1222_v34 = vsub.f32 %v1094_v48, %v3533_v25  ;;  %v1095_v10 = vmin.f32 %v967_v16, 255.0  ;;  %v651_v60 = vmul.f32 %v643_v14, %v3715_v39  ;;  %v712_v49 = vmul.f32 %v3715_v39, %v3384_v38 }
 0x131   :  { %v713_v23 = vmul.f32 %v3715_v39, %v3386_v33  ;;  %v714_v7 = vmul.f32 %v3715_v39, %v3396_v5  ;;  %v3727_v32 = vmul.f32 %v3715_v39, %v3404_v20  ;;  %v3735_v33 = vmul.f32 %v3715_v39, %v3412_v41 }
 0x132   :  { %v1350_v56 = vmul.f32 %v1222_v34, %v3470_v29  ;;  %v1223_v9 = vsub.f32 %v1095_v10, %v3533_v25  ;;  %v1603_v36 = vand.u32 2147483647, %v651_v60  ;;  %v1605_v55 = vcvt.f32.s32 %v651_v60 }
 0x133   :  { %v1608_v38 = vand.u32 2147483648, %v651_v60  ;;  %v2027_v0 = vand.u32 2147483647, %v712_v49  ;;  %v2029_v63 = vcvt.f32.s32 %v712_v49  ;;  %v2032_v35 = vand.u32 2147483648, %v712_v49 }
 0x134   :  { %1478 = vst [vmem:[#allocation5 + $0x170] sm:$0xff] %v1350_v56  ;;  %v1351_v5 = vmul.f32 %v1223_v9, %v3470_v29  ;;  %v1606_v20 = vcvt.s32.f32 %v1605_v55  ;;  %v2035_v3 = vand.u32 2147483647, %v713_v23  ;;  %vm3738_vm4 = vcmp.lt.f32.partialorder %v1603_v36, 8388608.0 }
 0x135   :  { %vm3742_vm5 = vcmp.lt.f32.partialorder %v2027_v0, 8388608.0  ;;  %v2030_v24 = vcvt.s32.f32 %v2029_v63  ;;  %v2037_v18 = vcvt.f32.s32 %v713_v23  ;;  %v2040_v41 = vand.u32 2147483648, %v713_v23 }
 0x136   :  { %1479 = vst [vmem:[#allocation5 + $0x178] sm:$0xff] %v1351_v5  ;;  %v1607_v42 = vand.u32 2147483647, %v1606_v20  ;;  %v2043_v62 = vand.u32 2147483647, %v714_v7  ;;  %v2045_v2 = vcvt.f32.s32 %v714_v7  ;;  %vm3746_vm6 = vcmp.lt.f32.partialorder %v2035_v3, 8388608.0 }
 0x137   :  { %v2031_v59 = vand.u32 2147483647, %v2030_v24  ;;  %v2038_v37 = vcvt.s32.f32 %v2037_v18  ;;  %v2051_v31 = vand.u32 2147483647, %v3727_v32  ;;  %v2048_v54 = vand.u32 2147483648, %v714_v7 }
 0x138   :  { %v1609_v28 = vor.u32 %v1608_v38, %v1607_v42  ;;  %v2046_v53 = vcvt.s32.f32 %v2045_v2  ;;  %v2053_v61 = vcvt.f32.s32 %v3727_v32  ;;  %vm3752_vm7 = vcmp.lt.f32.partialorder %v2043_v62, 8388608.0 }
 0x139   :  { %v2033_v51 = vor.u32 %v2032_v35, %v2031_v59  ;;  %v2039_v27 = vand.u32 2147483647, %v2038_v37  ;;  %v2056_v58 = vand.u32 2147483648, %v3727_v32  ;;  %v2059_v30 = vand.u32 2147483647, %v3735_v33 }
 0x13a   :  { %v3759_v50 = vsel %vm3738_vm4, %v1609_v28, %v651_v60  ;;  %v2047_v47 = vand.u32 2147483647, %v2046_v53  ;;  %v2054_v14 = vcvt.s32.f32 %v2053_v61  ;;  %vm3764_vm8 = vcmp.lt.f32.partialorder %v2051_v31, 8388608.0 }
 0x13b   :  { %v2034_v46 = vsel %vm3742_vm5, %v2033_v51, %v712_v49  ;;  %v2041_v48 = vor.u32 %v2040_v41, %v2039_v27  ;;  %v2061_v26 = vcvt.f32.s32 %v3735_v33  ;;  %v2064_v60 = vand.u32 2147483648, %v3735_v33 }
 0x13c   :  { %v968_v34 = vadd.f32 %v2034_v46, %v3759_v50  ;;  %v2049_v10 = vor.u32 %v2048_v54, %v2047_v47  ;;  %v2055_v56 = vand.u32 2147483647, %v2054_v14  ;;  %vm3773_vm9 = vcmp.lt.f32.partialorder %v2059_v30, 8388608.0 }
 0x13d   :  { %v2042_v9 = vsel %vm3746_vm6, %v2041_v48, %v713_v23  ;;  %v2062_v49 = vcvt.s32.f32 %v2061_v26  ;;  %v717_v55 = vmul.f32 %v3715_v39, %v3420_v22  ;;  %v718_v23 = vmul.f32 %v3715_v39, %v3426_v44 }
 0x13e   :  { %v1096_v38 = vmin.f32 %v968_v34, 255.0  ;;  %v969_v0 = vadd.f32 %v2042_v9, %v3759_v50  ;;  %v2050_v63 = vsel %vm3752_vm7, %v2049_v10, %v714_v7  ;;  %v2057_v5 = vor.u32 %v2056_v58, %v2055_v56 }
 0x13f   :  { %v970_v20 = vadd.f32 %v2050_v63, %v3759_v50  ;;  %v2063_v35 = vand.u32 2147483647, %v2062_v49  ;;  %v2069_v3 = vcvt.f32.s32 %v717_v55  ;;  %v2067_v24 = vand.u32 2147483647, %v717_v55 }
 0x140   :  { %v1224_v52 = vsub.f32 %v1096_v38, %v3759_v50  ;;  %v1097_v25 = vmin.f32 %v969_v0, 255.0  ;;  %v2058_v22 = vsel %vm3764_vm8, %v2057_v5, %v3727_v32  ;;  %v2072_v41 = vand.u32 2147483648, %v717_v55 }
 0x141   :  { %v1098_v18 = vmin.f32 %v970_v20, 255.0  ;;  %v971_v42 = vadd.f32 %v2058_v22, %v3759_v50  ;;  %v2065_v7 = vor.u32 %v2064_v60, %v2063_v35  ;;  %v2070_v59 = vcvt.s32.f32 %v2069_v3  ;;  %v3876_v22 = vld [vmem:[#allocation2 + $0x210] sm:$0xff] }
 0x142   :  { %v1352_v62 = vmul.f32 %v1224_v52, %v3481_v11  ;;  %v1225_v2 = vsub.f32 %v1097_v25, %v3759_v50  ;;  %v2075_v29 = vand.u32 2147483647, %v718_v23  ;;  %v2077_v32 = vcvt.f32.s32 %v718_v23 }
 0x143   :  { %v1226_v44 = vsub.f32 %v1098_v18, %v3759_v50  ;;  %v1099_v37 = vmin.f32 %v971_v42, 255.0  ;;  %v2066_v31 = vsel %vm3773_vm9, %v2065_v7, %v3735_v33  ;;  %vm3798_vm10 = vcmp.lt.f32.partialorder %v2067_v24, 8388608.0 }
 0x144   :  { %1480 = vst [vmem:[#allocation5 + $0x180] sm:$0xff] %v1352_v62  ;;  %v1353_v28 = vmul.f32 %v1225_v2, %v3481_v11  ;;  %v972_v53 = vadd.f32 %v2066_v31, %v3759_v50  ;;  %v2071_v61 = vand.u32 2147483647, %v2070_v59  ;;  %v2078_v1 = vcvt.s32.f32 %v2077_v32 }
 0x145   :  { %v1354_v51 = vmul.f32 %v1226_v44, %v3481_v11  ;;  %v1227_v27 = vsub.f32 %v1099_v37, %v3759_v50  ;;  %v2080_v58 = vand.u32 2147483648, %v718_v23  ;;  %v719_v14 = vmul.f32 %v3715_v39, %v3431_v8 }
 0x146   :  { %1481 = vst [vmem:[#allocation5 + $0x188] sm:$0xff] %v1353_v28  ;;  %v1100_v47 = vmin.f32 %v972_v53, 255.0  ;;  %v2073_v33 = vor.u32 %v2072_v41, %v2071_v61  ;;  %v720_v30 = vmul.f32 %v3715_v39, %v3436_v43  ;;  %vm3809_vm11 = vcmp.lt.f32.partialorder %v2075_v29, 8388608.0 }
 0x147   :  { %1482 = vst [vmem:[#allocation5 + $0x190] sm:$0xff] %v1354_v51  ;;  %v1355_v46 = vmul.f32 %v1227_v27, %v3481_v11  ;;  %v2079_v16 = vand.u32 2147483647, %v2078_v1  ;;  %v721_v26 = vmul.f32 %v3715_v39, %v3441_v17  ;;  %v2083_v8 = vand.u32 2147483647, %v719_v14 }
 0x148   :  { %v1228_v34 = vsub.f32 %v1100_v47, %v3759_v50  ;;  %v2074_v10 = vsel %vm3798_vm10, %v2073_v33, %v717_v55  ;;  %v2085_v56 = vcvt.f32.s32 %v719_v14  ;;  %v2091_v9 = vand.u32 2147483647, %v720_v30 }
 0x149   :  { %1483 = vst [vmem:[#allocation5 + $0x198] sm:$0xff] %v1355_v46  ;;  %v973_v43 = vadd.f32 %v2074_v10, %v3759_v50  ;;  %v2081_v60 = vor.u32 %v2080_v58, %v2079_v16  ;;  %v722_v36 = vmul.f32 %v3715_v39, %v3445_v57  ;;  %v2088_v0 = vand.u32 2147483648, %v719_v14 }
 0x14a   :  { %v1356_v49 = vmul.f32 %v1228_v34, %v3481_v11  ;;  %v2086_v38 = vcvt.s32.f32 %v2085_v56  ;;  %v2093_v17 = vcvt.f32.s32 %v720_v30  ;;  %vm3824_vm12 = vcmp.lt.f32.partialorder %v2083_v8, 8388608.0 }
 0x14b   :  { %v1101_v63 = vmin.f32 %v973_v43, 255.0  ;;  %v2082_v5 = vsel %vm3809_vm11, %v2081_v60, %v718_v23  ;;  %v2096_v20 = vand.u32 2147483648, %v720_v30  ;;  %v2099_v57 = vand.u32 2147483647, %v721_v26 }
 0x14c   :  { %1484 = vst [vmem:[#allocation5 + $0x1a0] sm:$0xff] %v1356_v49  ;;  %v974_v35 = vadd.f32 %v2082_v5, %v3759_v50  ;;  %v2087_v3 = vand.u32 2147483647, %v2086_v38  ;;  %v2094_v52 = vcvt.s32.f32 %v2093_v17  ;;  %vm3830_vm13 = vcmp.lt.f32.partialorder %v2091_v9, 8388608.0 }
 0x14d   :  { %v1229_v25 = vsub.f32 %v1101_v63, %v3759_v50  ;;  %v2101_v24 = vcvt.f32.s32 %v721_v26  ;;  %v2104_v18 = vand.u32 2147483648, %v721_v26  ;;  %v2107_v41 = vand.u32 2147483647, %v722_v36 }
 0x14e   :  { %v1102_v23 = vmin.f32 %v974_v35, 255.0  ;;  %v2089_v42 = vor.u32 %v2088_v0, %v2087_v3  ;;  %v2095_v7 = vand.u32 2147483647, %v2094_v52  ;;  %vm3835_vm14 = vcmp.lt.f32.partialorder %v2099_v57, 8388608.0 }
 0x14f   :  { %v1357_v62 = vmul.f32 %v1229_v25, %v3481_v11  ;;  %v2102_v59 = vcvt.s32.f32 %v2101_v24  ;;  %v2109_v29 = vcvt.f32.s32 %v722_v36  ;;  %v2112_v32 = vand.u32 2147483648, %v722_v36 }
 0x150   :  { %v1230_v44 = vsub.f32 %v1102_v23, %v3759_v50  ;;  %v2090_v37 = vsel %vm3824_vm12, %v2089_v42, %v719_v14  ;;  %v2097_v31 = vor.u32 %v2096_v20, %v2095_v7  ;;  %v723_v61 = vmul.f32 %v3715_v39, %v3449_v4 }
 0x151   :  { %1485 = vst [vmem:[#allocation5 + $0x1a8] sm:$0xff] %v1357_v62  ;;  %v975_v28 = vadd.f32 %v2090_v37, %v3759_v50  ;;  %v2103_v53 = vand.u32 2147483647, %v2102_v59  ;;  %v2110_v54 = vcvt.s32.f32 %v2109_v29  ;;  %vm3848_vm15 = vcmp.lt.f32.partialorder %v2107_v41, 8388608.0 }
 0x152   :  { %v1358_v51 = vmul.f32 %v1230_v44, %v3481_v11  ;;  %v2098_v27 = vsel %vm3830_vm13, %v2097_v31, %v720_v30  ;;  %v724_v58 = vmul.f32 %v3715_v39, %v3453_v6  ;;  %v2115_v48 = vand.u32 2147483647, %v723_v61 }
 0x153   :  { %v1103_v47 = vmin.f32 %v975_v28, 255.0  ;;  %v976_v33 = vadd.f32 %v2098_v27, %v3759_v50  ;;  %v2105_v14 = vor.u32 %v2104_v18, %v2103_v53  ;;  %v2111_v46 = vand.u32 2147483647, %v2110_v54  ;;  %v3896_v53 = vld [vmem:[#allocation2 + $0x218] sm:$0xff] }
 0x154   :  { %1486 = vst [vmem:[#allocation5 + $0x1b0] sm:$0xff] %v1358_v51  ;;  %v2117_v4 = vcvt.f32.s32 %v723_v61  ;;  %v2123_v16 = vand.u32 2147483647, %v724_v58  ;;  %v725_v34 = vmul.f32 %v3715_v39, %v3457_v13  ;;  %vm3861_vm0 = vcmp.lt.f32.partialorder %v2115_v48, 8388608.0 }
 0x155   :  { %v1231_v30 = vsub.f32 %v1103_v47, %v3759_v50  ;;  %v1104_v10 = vmin.f32 %v976_v33, 255.0  ;;  %v2106_v8 = vsel %vm3835_vm14, %v2105_v14, %v721_v26  ;;  %v2113_v56 = vor.u32 %v2112_v32, %v2111_v46  ;;  %v3901_v47 = vld [vmem:[#allocation2 + $0x220] sm:$0xff] }
 0x156   :  { %v977_v6 = vadd.f32 %v2106_v8, %v3759_v50  ;;  %v2118_v60 = vcvt.s32.f32 %v2117_v4  ;;  %v2120_v9 = vand.u32 2147483648, %v723_v61  ;;  %v2125_v0 = vcvt.f32.s32 %v724_v58 }
 0x157   :  { %v1359_v49 = vmul.f32 %v1231_v30, %v3481_v11  ;;  %v1232_v38 = vsub.f32 %v1104_v10, %v3759_v50  ;;  %v2114_v13 = vsel %vm3848_vm15, %v2113_v56, %v722_v36  ;;  %vm3870_vm1 = vcmp.lt.f32.partialorder %v2123_v16, 8388608.0  ;;  %v3908_v10 = vld [vmem:[#allocation2 + $0x228] sm:$0xff] }
 0x158   :  { %v1105_v17 = vmin.f32 %v977_v6, 255.0  ;;  %v978_v26 = vadd.f32 %v2114_v13, %v3759_v50  ;;  %v2119_v63 = vand.u32 2147483647, %v2118_v60  ;;  %v2126_v20 = vcvt.s32.f32 %v2125_v0 }
 0x159   :  { %1487 = vst [vmem:[#allocation5 + $0x1b8] sm:$0xff] %v1359_v49  ;;  %v1360_v55 = vmul.f32 %v1232_v38, %v3481_v11  ;;  %v2128_v35 = vand.u32 2147483648, %v724_v58  ;;  %v2133_v3 = vcvt.f32.s32 %v725_v34  ;;  %v2131_v36 = vand.u32 2147483647, %v725_v34  ;;  %v3919_v38 = vld [vmem:[#allocation2 + $0x230] sm:$0xff] }
 0x15a   :  { %v1233_v52 = vsub.f32 %v1105_v17, %v3759_v50  ;;  %v1106_v57 = vmin.f32 %v978_v26, 255.0  ;;  %v2121_v25 = vor.u32 %v2120_v9, %v2119_v63  ;;  %v2127_v24 = vand.u32 2147483647, %v2126_v20  ;;  %v3931_v20 = vld [vmem:[#allocation2 + $0x238] sm:$0xff] }
 0x15b   :  { %1488 = vst [vmem:[#allocation5 + $0x1c0] sm:$0xff] %v1360_v55  ;;  %v2134_v18 = vcvt.s32.f32 %v2133_v3  ;;  %v2136_v23 = vand.u32 2147483648, %v725_v34  ;;  %v726_v42 = vmul.f32 %v3715_v39, %v3461_v40  ;;  %v727_v2 = vmul.f32 %v3715_v39, %v3465_v19 }
 0x15c   :  { %v1361_v7 = vmul.f32 %v1233_v52, %v3481_v11  ;;  %v1234_v41 = vsub.f32 %v1106_v57, %v3759_v50  ;;  %v2122_v62 = vsel %vm3861_vm0, %v2121_v25, %v723_v61  ;;  %v2129_v29 = vor.u32 %v2128_v35, %v2127_v24 }
 0x15d   :  { %v979_v59 = vadd.f32 %v2122_v62, %v3759_v50  ;;  %v2135_v44 = vand.u32 2147483647, %v2134_v18  ;;  %v238_v37 = vmax.f32 %v237_v45, %v3876_v22  ;;  %vm3892_vm2 = vcmp.lt.f32.partialorder %v2131_v36, 8388608.0  ;;  %v3939_v36 = vld [vmem:[#allocation2 + $0x240] sm:$0xff] }
 0x15e   :  { %1489 = vst [vmem:[#allocation5 + $0x1c8] sm:$0xff] %v1361_v7  ;;  %v1362_v40 = vmul.f32 %v1234_v41, %v3481_v11  ;;  %v2139_v32 = vand.u32 2147483647, %v726_v42  ;;  %v2141_v28 = vcvt.f32.s32 %v726_v42  ;;  %v2130_v39 = vsel %vm3870_vm1, %v2129_v29, %v724_v58  ;;  %v3944_v7 = vld [vmem:[#allocation2 + $0x248] sm:$0xff] }
 0x15f   :  { %v1107_v19 = vmin.f32 %v979_v59, 255.0  ;;  %v2137_v54 = vor.u32 %v2136_v23, %v2135_v44  ;;  %v2144_v61 = vand.u32 2147483648, %v726_v42  ;;  %v980_v45 = vadd.f32 %v2130_v39, %v3759_v50 }
 0x160   :  { %1490 = vst [vmem:[#allocation5 + $0x1d0] sm:$0xff] %v1362_v40  ;;  %v2142_v51 = vcvt.s32.f32 %v2141_v28  ;;  %v2147_v27 = vand.u32 2147483647, %v727_v2  ;;  %v2149_v1 = vcvt.f32.s32 %v727_v2  ;;  %v2152_v46 = vand.u32 2147483648, %v727_v2 }
 0x161   :  { %v1235_v33 = vsub.f32 %v1107_v19, %v3759_v50  ;;  %v2138_v14 = vsel %vm3892_vm2, %v2137_v54, %v725_v34  ;;  %v239_v48 = vmax.f32 %v238_v37, %v3896_v53  ;;  %v1108_v4 = vmin.f32 %v980_v45, 255.0  ;;  %v3960_v54 = vld [vmem:[#allocation2 + $0x280] sm:$0xff] }
 0x162   :  { %v981_v58 = vadd.f32 %v2138_v14, %v3759_v50  ;;  %v2143_v16 = vand.u32 2147483647, %v2142_v51  ;;  %v2150_v30 = vcvt.s32.f32 %v2149_v1  ;;  %vm3911_vm3 = vcmp.lt.f32.partialorder %v2139_v32, 8388608.0  ;;  %v3955_v32 = vld [vmem:[#allocation2 + $0x258] sm:$0xff]  ;;  %v3964_v45 = vld [vmem:[#allocation2 + $0x260] sm:$0xff]  ;;  %v3972_v1 = vld [vmem:[#allocation2 + $0x290] sm:$0xff] }
 0x163   :  { %v1363_v8 = vmul.f32 %v1235_v33, %v3481_v11  ;;  %v240_v6 = vmax.f32 %v239_v48, %v3901_v47  ;;  %v405_v34 = vmin.f32 %v3709_v21, %v3711_v15  ;;  %v1236_v43 = vsub.f32 %v1108_v4, %v3759_v50  ;;  %v3974_v33 = vld [vmem:[#allocation2 + $0x268] sm:$0xff] }
 0x164   :  { %v1109_v60 = vmin.f32 %v981_v58, 255.0  ;;  %v2145_v9 = vor.u32 %v2144_v61, %v2143_v16  ;;  %v2151_v49 = vand.u32 2147483647, %v2150_v30  ;;  %vm3921_vm4 = vcmp.lt.f32.partialorder %v2147_v27, 8388608.0  ;;  %v3962_v61 = vld [vmem:[#allocation2 + $0x288] sm:$0xff]  ;;  %v3980_v58 = vld [vmem:[#allocation2 + $0x298] sm:$0xff] }
 0x165   :  { %1491 = vst [vmem:[#allocation5 + $0x1d8] sm:$0xff] %v1363_v8  ;;  %v241_v0 = vmax.f32 %v240_v6, %v3908_v10  ;;  %v406_v17 = vmin.f32 %v405_v34, %v3876_v22  ;;  %v1364_v26 = vmul.f32 %v1236_v43, %v3481_v11  ;;  %v426_v51 = vmin.f32 %v3960_v54, %v3962_v61  ;;  %v3982_v16 = vld [vmem:[#allocation2 + $0x270] sm:$0xff]  ;;  %v3988_v34 = vld [vmem:[#allocation2 + $0x2a0] sm:$0xff]  ;;  %v3990_v43 = vld [vmem:[#allocation2 + $0x278] sm:$0xff] }
 0x166   :  { %v1237_v63 = vsub.f32 %v1109_v60, %v3759_v50  ;;  %v2146_v5 = vsel %vm3911_vm3, %v2145_v9, %v726_v42  ;;  %v2153_v55 = vor.u32 %v2152_v46, %v2151_v49 }
 0x167   :  { %v982_v35 = vadd.f32 %v2146_v5, %v3759_v50  ;;  %v242_v3 = vmax.f32 %v241_v0, %v3919_v38  ;;  %v407_v52 = vmin.f32 %v406_v17, %v3896_v53  ;;  %1492 = vst [vmem:[#allocation5 + $0x1e0] sm:$0xff] %v1364_v26  ;;  %v427_v46 = vmin.f32 %v426_v51, %v3972_v1  ;;  %v3996_v0 = vld [vmem:[#allocation2 + $0x2a8] sm:$0xff] }
 0x168   :  { %v1365_v57 = vmul.f32 %v1237_v63, %v3481_v11  ;;  %v2154_v25 = vsel %vm3921_vm4, %v2153_v55, %v727_v2  ;;  %v3949_v2 = vld [vmem:[#allocation2 + $0x250] sm:$0xff] }
 0x169   :  { %v1110_v24 = vmin.f32 %v982_v35, 255.0  ;;  %v983_v18 = vadd.f32 %v2154_v25, %v3759_v50  ;;  %v243_v23 = vmax.f32 %v242_v3, %v3931_v20  ;;  %v408_v42 = vmin.f32 %v407_v52, %v3901_v47  ;;  %v4002_v55 = vld [vmem:[#allocation2 + $0x2b0] sm:$0xff]  ;;  %v4007_v25 = vld [vmem:[#allocation2 + $0x2b8] sm:$0xff] }
 0x16a   :  { %1493 = vst [vmem:[#allocation5 + $0x1e8] sm:$0xff] %v1365_v57  ;;  %v428_v8 = vmin.f32 %v427_v46, %v3980_v58 }
 0x16b   :  { %v1238_v41 = vsub.f32 %v1110_v24, %v3759_v50  ;;  %v1111_v62 = vmin.f32 %v983_v18, 255.0  ;;  %v244_v59 = vmax.f32 %v243_v23, %v3939_v36  ;;  %v409_v29 = vmin.f32 %v408_v42, %v3908_v10 }
 0x16c   :  { %v429_v9 = vmin.f32 %v428_v8, %v3988_v34 }
 0x16d   :  { %v1366_v44 = vmul.f32 %v1238_v41, %v3481_v11  ;;  %v1239_v37 = vsub.f32 %v1111_v62, %v3759_v50  ;;  %v245_v40 = vmax.f32 %v244_v59, %v3944_v7  ;;  %v410_v31 = vmin.f32 %v409_v29, %v3919_v38  ;;  %v4012_v41 = vld [vmem:[#allocation2 + $0x2c0] sm:$0xff] }
 0x16e   :  { %v258_v50 = vmax.f32 %v3960_v54, %v3962_v61  ;;  %v430_v26 = vmin.f32 %v429_v9, %v3996_v0 }
 0x16f   :  { %1494 = vst [vmem:[#allocation5 + $0x1f0] sm:$0xff] %v1366_v44  ;;  %v1367_v28 = vmul.f32 %v1239_v37, %v3481_v11  ;;  %v246_v19 = vmax.f32 %v245_v40, %v3949_v2  ;;  %v411_v39 = vmin.f32 %v410_v31, %v3931_v20  ;;  %v4017_v37 = vld [vmem:[#allocation2 + $0x2c8] sm:$0xff] }
 0x170   :  { %v259_v14 = vmax.f32 %v258_v50, %v3972_v1  ;;  %v431_v3 = vmin.f32 %v430_v26, %v4002_v55  ;;  %v4037_v26 = vld [vmem:[#allocation2 + $0x2f0] sm:$0xff] }
 0x171   :  { %1495 = vst [vmem:[#allocation5 + $0x1f8] sm:$0xff] %v1367_v28  ;;  %v247_v27 = vmax.f32 %v246_v19, %v3955_v32  ;;  %v412_v11 = vmin.f32 %v411_v39, %v3939_v36  ;;  %v4021_v39 = vld [vmem:[#allocation2 + $0x2d0] sm:$0xff] }
 0x172   :  { %v260_v30 = vmax.f32 %v259_v14, %v3980_v58  ;;  %v432_v18 = vmin.f32 %v431_v3, %v4007_v25  ;;  %v4041_v3 = vld [vmem:[#allocation2 + $0x2f8] sm:$0xff] }
 0x173   :  { %v248_v48 = vmax.f32 %v247_v27, %v3964_v45  ;;  %v413_v4 = vmin.f32 %v412_v11, %v3944_v7  ;;  %v4025_v11 = vld [vmem:[#allocation2 + $0x2d8] sm:$0xff] }
 0x174   :  { %v261_v60 = vmax.f32 %v260_v30, %v3988_v34  ;;  %v433_v59 = vmin.f32 %v432_v18, %v4012_v41  ;;  %v4029_v30 = vld [vmem:[#allocation2 + $0x2e0] sm:$0xff] }
 0x175   :  { %v249_v56 = vmax.f32 %v248_v48, %v3974_v33  ;;  %v414_v6 = vmin.f32 %v413_v4, %v3949_v2 }
 0x176   :  { %v262_v17 = vmax.f32 %v261_v60, %v3996_v0  ;;  %v434_v31 = vmin.f32 %v433_v59, %v4017_v37  ;;  %v4033_v60 = vld [vmem:[#allocation2 + $0x2e8] sm:$0xff] }
 0x177   :  { %v250_v49 = vmax.f32 %v249_v56, %v3982_v16  ;;  %v415_v13 = vmin.f32 %v414_v6, %v3955_v32 }
 0x178   :  { %v263_v35 = vmax.f32 %v262_v17, %v4002_v55  ;;  %v435_v51 = vmin.f32 %v434_v31, %v4021_v39 }
 0x179   :  { %v251_v63 = vmax.f32 %v250_v49, %v3990_v43  ;;  %v416_v5 = vmin.f32 %v415_v13, %v3964_v45 }
 0x17a   :  { %v264_v24 = vmax.f32 %v263_v35, %v4007_v25  ;;  %v436_v46 = vmin.f32 %v435_v51, %v4025_v11 }
 0x17b   :  { %v252_v52 = vrot.slane %v251_v63, 4  ;;  %v417_v57 = vmin.f32 %v416_v5, %v3974_v33 }
 0x17c   :  { %v265_v62 = vmax.f32 %v264_v24, %v4012_v41  ;;  %v437_v56 = vmin.f32 %v436_v46, %v4029_v30 }
 0x17d   :  { %v253_v23 = vmax.f32 %v251_v63, %v252_v52  ;;  %v418_v42 = vmin.f32 %v417_v57, %v3982_v16 }
 0x17e   :  { %v266_v40 = vmax.f32 %v265_v62, %v4017_v37  ;;  %v438_v49 = vmin.f32 %v437_v56, %v4033_v60 }
 0x17f   :  { %v254_v29 = vrot.slane %v253_v23, 2  ;;  %v419_v44 = vmin.f32 %v418_v42, %v3990_v43 }
 0x180   :  { %v267_v50 = vmax.f32 %v266_v40, %v4021_v39  ;;  %v439_v5 = vmin.f32 %v438_v49, %v4037_v26 }
 0x181   :  { %v255_v28 = vmax.f32 %v253_v23, %v254_v29  ;;  %v420_v19 = vrot.slane %v419_v44, 4 }
 0x182   :  { %v268_v14 = vmax.f32 %v267_v50, %v4025_v11  ;;  %v440_v57 = vmin.f32 %v439_v5, %v4041_v3 }
 0x183   :  { %v421_v27 = vmin.f32 %v419_v44, %v420_v19  ;;  %v256_v48 = vrot.slane %v255_v28, 1 }
 0x184   :  { %v269_v8 = vmax.f32 %v268_v14, %v4029_v30  ;;  %v441_v23 = vrot.slane %v440_v57, 4 }
 0x185   :  { %v422_v4 = vrot.slane %v421_v27, 2  ;;  %v257_v13 = vmax.f32 %v255_v28, %v256_v48 }
 0x186   :  { %v270_v9 = vmax.f32 %v269_v8, %v4033_v60  ;;  %v442_v59 = vmin.f32 %v440_v57, %v441_v23 }
 0x187   :  { %v423_v6 = vmin.f32 %v421_v27, %v422_v4 }
 0x188   :  { %v271_v63 = vmax.f32 %v270_v9, %v4037_v26  ;;  %v443_v40 = vrot.slane %v442_v59, 2 }
 0x189   :  { %v424_v17 = vrot.slane %v423_v6, 1 }
 0x18a   :  { %v272_v52 = vmax.f32 %v271_v63, %v4041_v3  ;;  %v444_v28 = vmin.f32 %v442_v59, %v443_v40 }
 0x18b   :  { %v425_v35 = vmin.f32 %v423_v6, %v424_v17 }
 0x18c   :  { %v273_v18 = vrot.slane %v272_v52, 4  ;;  %v445_v50 = vrot.slane %v444_v28, 1 }
 0x18d   :  { %v493_v24 = vsub.f32 %v257_v13, %v425_v35  ;;  %v644_v17 = vsub.f32 0.0, %v425_v35 }
 0x18e   :  { %v274_v62 = vmax.f32 %v272_v52, %v273_v18  ;;  %v4049_v27 = vmin.f32 %v444_v28, %v445_v50 }
 0x18f   :  { %v508_v42 = vmul.f32 %v2889_v12, %v493_v24 }
 0x190   :  { %v275_v44 = vrot.slane %v274_v62, 2 }
 0x191   :  { %v4046_v29 = vmax.f32 %v508_v42, 1e-08 }
 0x192   :  { %v276_v31 = vmax.f32 %v274_v62, %v275_v44 }
 0x193   :  { %2682 = vrcp.f32 %v4046_v29  ;;  %vm585_vm5 = vweird.f32 %v4046_v29  ;;  %v591_v4 = vand.u32 2147483648, %v4046_v29  ;;  %v589_v56 = vand.u32 2147483647, %v4046_v29 }
 0x194   :  { %v277_v19 = vrot.slane %v276_v31, 1 }
 0x195   :  { %v592_v49 = vor.u32 1.1754944e-38, %v591_v4  ;;  %vm590_vm8 = vcmp.eq.f32.partialorder %v589_v56, 8.507059e+37 }
 0x196   :  { %v278_v51 = vmax.f32 %v276_v31, %v277_v19 }
 0x198   :  { %v494_v48 = vsub.f32 %v278_v51, %v4049_v27 }
 0x199   :  { %v2683_v14 = vpop.eup %2682 }
 0x19a   :  { %v581_v46 = vmul.f32 %v2683_v14, %v4046_v29  ;;  %vm586_vm6 = vweird.f32 %v2683_v14  ;;  %v509_v6 = vmul.f32 %v2889_v12, %v494_v48 }
 0x19b   :  { %vm587_vm7 = vmor %vm585_vm5, %vm586_vm6 }
 0x19c   :  { %v582_v8 = vsub.f32 1.0, %v581_v46  ;;  %v4057_v63 = vmax.f32 %v509_v6, 1e-08 }
 0x19e   :  { %v583_v9 = vmul.f32 %v2683_v14, %v582_v8  ;;  %2684 = vrcp.f32 %v4057_v63 }
 0x1a0   :  { %v584_v13 = vadd.f32 %v2683_v14, %v583_v9 }
 0x1a2   :  { %v588_v5 = vsel %vm587_vm7, %v2683_v14, %v584_v13 }
 0x1a3   :  { %v4059_v52 = vsel %vm590_vm8, %v592_v49, %v588_v5 }
 0x1a4   :  { %v652_v57 = vmul.f32 %v644_v17, %v4059_v52  ;;  %v728_v24 = vmul.f32 %v4059_v52, %v3709_v21  ;;  %v729_v18 = vmul.f32 %v4059_v52, %v3711_v15  ;;  %v730_v23 = vmul.f32 %v4059_v52, %v3876_v22 }
 0x1a5   :  { %v4071_v35 = vmul.f32 %v4059_v52, %v3896_v53  ;;  %v4075_v42 = vmul.f32 %v4059_v52, %v3901_v47  ;;  %v4079_v62 = vmul.f32 %v4059_v52, %v3908_v10  ;;  %v4083_v44 = vmul.f32 %v4059_v52, %v3919_v38  ;;  %v4093_v38 = vpop.eup %2684 }
 0x1a6   :  { %v1611_v21 = vand.u32 2147483647, %v652_v57  ;;  %v1613_v59 = vcvt.f32.s32 %v652_v57  ;;  %v2155_v15 = vand.u32 2147483647, %v728_v24  ;;  %v1616_v22 = vand.u32 2147483648, %v652_v57 }
 0x1a7   :  { %v2157_v40 = vcvt.f32.s32 %v728_v24  ;;  %v2163_v31 = vand.u32 2147483647, %v729_v18  ;;  %v2165_v53 = vcvt.f32.s32 %v729_v18  ;;  %v2160_v10 = vand.u32 2147483648, %v728_v24 }
 0x1a8   :  { %vm4085_vm9 = vcmp.lt.f32.partialorder %v1611_v21, 8388608.0  ;;  %v1614_v47 = vcvt.s32.f32 %v1613_v59  ;;  %vm4089_vm10 = vcmp.lt.f32.partialorder %v2155_v15, 8388608.0  ;;  %v2168_v14 = vand.u32 2147483648, %v729_v18 }
 0x1a9   :  { %v2158_v50 = vcvt.s32.f32 %v2157_v40  ;;  %v2166_v51 = vcvt.s32.f32 %v2165_v53  ;;  %v2171_v46 = vand.u32 2147483647, %v730_v23  ;;  %vm4095_vm11 = vcmp.lt.f32.partialorder %v2163_v31, 8388608.0 }
 0x1aa   :  { %v1615_v48 = vand.u32 2147483647, %v1614_v47  ;;  %v2173_v8 = vcvt.f32.s32 %v730_v23  ;;  %v2179_v56 = vand.u32 2147483647, %v4071_v35  ;;  %v2176_v49 = vand.u32 2147483648, %v730_v23 }
 0x1ab   :  { %v2159_v6 = vand.u32 2147483647, %v2158_v50  ;;  %v2167_v9 = vand.u32 2147483647, %v2166_v51  ;;  %v2181_v13 = vcvt.f32.s32 %v4071_v35  ;;  %vm4101_vm12 = vcmp.lt.f32.partialorder %v2171_v46, 8388608.0 }
 0x1ac   :  { %v1617_v17 = vor.u32 %v1616_v22, %v1615_v48  ;;  %v2174_v21 = vcvt.s32.f32 %v2173_v8  ;;  %v2184_v59 = vand.u32 2147483648, %v4071_v35  ;;  %v2187_v53 = vand.u32 2147483647, %v4075_v42 }
 0x1ad   :  { %v2161_v15 = vor.u32 %v2160_v10, %v2159_v6  ;;  %v2169_v40 = vor.u32 %v2168_v14, %v2167_v9  ;;  %v2182_v31 = vcvt.s32.f32 %v2181_v13  ;;  %vm4111_vm13 = vcmp.lt.f32.partialorder %v2179_v56, 8388608.0 }
 0x1ae   :  { %v4109_v47 = vsel %vm4085_vm9, %v1617_v17, %v652_v57  ;;  %v2175_v50 = vand.u32 2147483647, %v2174_v21  ;;  %v2189_v22 = vcvt.f32.s32 %v4075_v42  ;;  %v2192_v48 = vand.u32 2147483648, %v4075_v42 }
 0x1af   :  { %v2162_v46 = vsel %vm4089_vm10, %v2161_v15, %v728_v24  ;;  %v2170_v10 = vsel %vm4095_vm11, %v2169_v40, %v729_v18  ;;  %v2183_v14 = vand.u32 2147483647, %v2182_v31  ;;  %vm4123_vm14 = vcmp.lt.f32.partialorder %v2187_v53, 8388608.0 }
 0x1b0   :  { %v984_v28 = vadd.f32 %v2162_v46, %v4109_v47  ;;  %v985_v57 = vadd.f32 %v2170_v10, %v4109_v47  ;;  %v2177_v8 = vor.u32 %v2176_v49, %v2175_v50  ;;  %v2190_v56 = vcvt.s32.f32 %v2189_v22 }
 0x1b1   :  { %v2185_v6 = vor.u32 %v2184_v59, %v2183_v14  ;;  %v2195_v19 = vand.u32 2147483647, %v4079_v62  ;;  %v2197_v24 = vcvt.f32.s32 %v4079_v62  ;;  %v2200_v15 = vand.u32 2147483648, %v4079_v62 }
 0x1b2   :  { %v1112_v4 = vmin.f32 %v984_v28, 255.0  ;;  %v1113_v18 = vmin.f32 %v985_v57, 255.0  ;;  %v2178_v13 = vsel %vm4101_vm12, %v2177_v8, %v730_v23  ;;  %v2191_v17 = vand.u32 2147483647, %v2190_v56 }
 0x1b3   :  { %v986_v21 = vadd.f32 %v2178_v13, %v4109_v47  ;;  %v2186_v49 = vsel %vm4111_vm13, %v2185_v6, %v4071_v35  ;;  %v2198_v59 = vcvt.s32.f32 %v2197_v24  ;;  %vm4139_vm15 = vcmp.lt.f32.partialorder %v2195_v19, 8388608.0 }
 0x1b4   :  { %v1240_v40 = vsub.f32 %v1112_v4, %v4109_v47  ;;  %v1241_v31 = vsub.f32 %v1113_v18, %v4109_v47  ;;  %v987_v53 = vadd.f32 %v2186_v49, %v4109_v47  ;;  %v2193_v50 = vor.u32 %v2192_v48, %v2191_v17 }
 0x1b5   :  { %v1114_v22 = vmin.f32 %v986_v21, 255.0  ;;  %v2199_v5 = vand.u32 2147483647, %v2198_v59  ;;  %v2205_v46 = vcvt.f32.s32 %v4083_v44  ;;  %v2203_v8 = vand.u32 2147483647, %v4083_v44 }
 0x1b6   :  { %v1368_v35 = vmul.f32 %v1240_v40, %v4046_v29  ;;  %v1369_v51 = vmul.f32 %v1241_v31, %v4046_v29  ;;  %v1115_v10 = vmin.f32 %v987_v53, 255.0  ;;  %v2194_v14 = vsel %vm4123_vm14, %v2193_v50, %v4075_v42 }
 0x1b7   :  { %v1242_v28 = vsub.f32 %v1114_v22, %v4109_v47  ;;  %v988_v48 = vadd.f32 %v2194_v14, %v4109_v47  ;;  %v2201_v57 = vor.u32 %v2200_v15, %v2199_v5  ;;  %v2206_v6 = vcvt.s32.f32 %v2205_v46 }
 0x1b8   :  { %1496 = vst [vmem:[#allocation5 + $0x200] sm:$0xff] %v1368_v35  ;;  %v1243_v56 = vsub.f32 %v1115_v10, %v4109_v47  ;;  %v2208_v19 = vand.u32 2147483648, %v4083_v44  ;;  %v735_v24 = vmul.f32 %v4059_v52, %v3931_v20  ;;  %v736_v18 = vmul.f32 %v4059_v52, %v3939_v36 }
 0x1b9   :  { %1497 = vst [vmem:[#allocation5 + $0x208] sm:$0xff] %v1369_v51  ;;  %v1370_v9 = vmul.f32 %v1242_v28, %v4046_v29  ;;  %v1116_v42 = vmin.f32 %v988_v48, 255.0  ;;  %v2202_v4 = vsel %vm4139_vm15, %v2201_v57, %v4079_v62  ;;  %v2207_v21 = vand.u32 2147483647, %v2206_v6 }
 0x1ba   :  { %v1371_v13 = vmul.f32 %v1243_v56, %v4046_v29  ;;  %v989_v17 = vadd.f32 %v2202_v4, %v4109_v47  ;;  %v2211_v49 = vand.u32 2147483647, %v735_v24  ;;  %vm4165_vm0 = vcmp.lt.f32.partialorder %v2203_v8, 8388608.0 }
 0x1bb   :  { %1498 = vst [vmem:[#allocation5 + $0x210] sm:$0xff] %v1370_v9  ;;  %v1244_v20 = vsub.f32 %v1116_v42, %v4109_v47  ;;  %v2213_v15 = vcvt.f32.s32 %v735_v24  ;;  %v2219_v40 = vand.u32 2147483647, %v736_v18  ;;  %v2209_v31 = vor.u32 %v2208_v19, %v2207_v21 }
 0x1bc   :  { %1499 = vst [vmem:[#allocation5 + $0x218] sm:$0xff] %v1371_v13  ;;  %v1117_v62 = vmin.f32 %v989_v17, 255.0  ;;  %v2216_v53 = vand.u32 2147483648, %v735_v24  ;;  %v2221_v36 = vcvt.f32.s32 %v736_v18  ;;  %vm4170_vm1 = vcmp.lt.f32.partialorder %v2211_v49, 8388608.0 }
 0x1bd   :  { %v1372_v50 = vmul.f32 %v1244_v20, %v4046_v29  ;;  %v2214_v23 = vcvt.s32.f32 %v2213_v15  ;;  %v2224_v5 = vand.u32 2147483648, %v736_v18  ;;  %v2210_v35 = vsel %vm4165_vm0, %v2209_v31, %v4083_v44 }
 0x1be   :  { %v1245_v46 = vsub.f32 %v1117_v62, %v4109_v47  ;;  %v2222_v51 = vcvt.s32.f32 %v2221_v36  ;;  %v737_v10 = vmul.f32 %v4059_v52, %v3944_v7  ;;  %v990_v14 = vadd.f32 %v2210_v35, %v4109_v47 }
 0x1bf   :  { %1500 = vst [vmem:[#allocation5 + $0x220] sm:$0xff] %v1372_v50  ;;  %v2215_v28 = vand.u32 2147483647, %v2214_v23  ;;  %vm4181_vm2 = vcmp.lt.f32.partialorder %v2219_v40, 8388608.0  ;;  %v738_v57 = vmul.f32 %v4059_v52, %v3949_v2  ;;  %v739_v7 = vmul.f32 %v4059_v52, %v3955_v32 }
 0x1c0   :  { %v1373_v8 = vmul.f32 %v1245_v46, %v4046_v29  ;;  %v2223_v56 = vand.u32 2147483647, %v2222_v51  ;;  %v2227_v6 = vand.u32 2147483647, %v737_v10  ;;  %v2229_v44 = vcvt.f32.s32 %v737_v10 }
 0x1c1   :  { %v1118_v19 = vmin.f32 %v990_v14, 255.0  ;;  %v2217_v9 = vor.u32 %v2216_v53, %v2215_v28  ;;  %v2235_v42 = vand.u32 2147483647, %v738_v57  ;;  %v2232_v17 = vand.u32 2147483648, %v737_v10 }
 0x1c2   :  { %1501 = vst [vmem:[#allocation5 + $0x228] sm:$0xff] %v1373_v8  ;;  %v2225_v4 = vor.u32 %v2224_v5, %v2223_v56  ;;  %v2230_v13 = vcvt.s32.f32 %v2229_v44  ;;  %v2237_v21 = vcvt.f32.s32 %v738_v57  ;;  %vm4193_vm3 = vcmp.lt.f32.partialorder %v2227_v6, 8388608.0 }
 0x1c3   :  { %v1246_v49 = vsub.f32 %v1118_v19, %v4109_v47  ;;  %v2218_v2 = vsel %vm4170_vm1, %v2217_v9, %v735_v24  ;;  %v2240_v59 = vand.u32 2147483648, %v738_v57  ;;  %vm4202_vm4 = vcmp.lt.f32.partialorder %v2235_v42, 8388608.0 }
 0x1c4   :  { %v991_v15 = vadd.f32 %v2218_v2, %v4109_v47  ;;  %v2226_v32 = vsel %vm4181_vm2, %v2225_v4, %v736_v18  ;;  %v2231_v40 = vand.u32 2147483647, %v2230_v13  ;;  %v2238_v62 = vcvt.s32.f32 %v2237_v21 }
 0x1c5   :  { %v1374_v31 = vmul.f32 %v1246_v49, %v4046_v29  ;;  %v992_v53 = vadd.f32 %v2226_v32, %v4109_v47  ;;  %v2245_v24 = vcvt.f32.s32 %v739_v7  ;;  %v2243_v5 = vand.u32 2147483647, %v739_v7 }
 0x1c6   :  { %v1119_v50 = vmin.f32 %v991_v15, 255.0  ;;  %v2233_v22 = vor.u32 %v2232_v17, %v2231_v40  ;;  %v2239_v23 = vand.u32 2147483647, %v2238_v62  ;;  %v2248_v51 = vand.u32 2147483648, %v739_v7 }
 0x1c7   :  { %1502 = vst [vmem:[#allocation5 + $0x230] sm:$0xff] %v1374_v31  ;;  %v1120_v46 = vmin.f32 %v992_v53, 255.0  ;;  %v2246_v35 = vcvt.s32.f32 %v2245_v24  ;;  %v740_v18 = vmul.f32 %v4059_v52, %v3964_v45  ;;  %v741_v8 = vmul.f32 %v4059_v52, %v3974_v33 }
 0x1c8   :  { %v1247_v14 = vsub.f32 %v1119_v50, %v4109_v47  ;;  %v2234_v28 = vsel %vm4193_vm3, %v2233_v22, %v737_v10  ;;  %v2241_v48 = vor.u32 %v2240_v59, %v2239_v23  ;;  %vm4218_vm5 = vcmp.lt.f32.partialorder %v2243_v5, 8388608.0 }
 0x1c9   :  { %v1248_v56 = vsub.f32 %v1120_v46, %v4109_v47  ;;  %v993_v6 = vadd.f32 %v2234_v28, %v4109_v47  ;;  %v2247_v44 = vand.u32 2147483647, %v2246_v35  ;;  %v2251_v19 = vand.u32 2147483647, %v740_v18 }
 0x1ca   :  { %v1375_v9 = vmul.f32 %v1247_v14, %v4046_v29  ;;  %v2242_v45 = vsel %vm4202_vm4, %v2241_v48, %v738_v57  ;;  %v2253_v10 = vcvt.f32.s32 %v740_v18  ;;  %v2256_v49 = vand.u32 2147483648, %v740_v18 }
 0x1cb   :  { %v1376_v4 = vmul.f32 %v1248_v56, %v4046_v29  ;;  %v1121_v13 = vmin.f32 %v993_v6, 255.0  ;;  %v994_v33 = vadd.f32 %v2242_v45, %v4109_v47  ;;  %v2249_v17 = vor.u32 %v2248_v51, %v2247_v44 }
 0x1cc   :  { %1503 = vst [vmem:[#allocation5 + $0x238] sm:$0xff] %v1375_v9  ;;  %v2254_v21 = vcvt.s32.f32 %v2253_v10  ;;  %v2259_v2 = vand.u32 2147483647, %v741_v8  ;;  %v2261_v20 = vcvt.f32.s32 %v741_v8  ;;  %vm4227_vm6 = vcmp.lt.f32.partialorder %v2251_v19, 8388608.0 }
 0x1cd   :  { %1504 = vst [vmem:[#allocation5 + $0x240] sm:$0xff] %v1376_v4  ;;  %v1249_v59 = vsub.f32 %v1121_v13, %v4109_v47  ;;  %v1122_v57 = vmin.f32 %v994_v33, 255.0  ;;  %v2250_v15 = vsel %vm4218_vm5, %v2249_v17, %v739_v7  ;;  %v2264_v53 = vand.u32 2147483648, %v741_v8 }
 0x1ce   :  { %v995_v40 = vadd.f32 %v2250_v15, %v4109_v47  ;;  %v2255_v62 = vand.u32 2147483647, %v2254_v21  ;;  %v2262_v31 = vcvt.s32.f32 %v2261_v20  ;;  %v742_v50 = vmul.f32 %v4059_v52, %v3982_v16 }
 0x1cf   :  { %v1377_v36 = vmul.f32 %v1249_v59, %v4046_v29  ;;  %v1250_v24 = vsub.f32 %v1122_v57, %v4109_v47  ;;  %v743_v22 = vmul.f32 %v4059_v52, %v3990_v43  ;;  %vm4238_vm7 = vcmp.lt.f32.partialorder %v2259_v2, 8388608.0 }
 0x1d0   :  { %v1123_v7 = vmin.f32 %v995_v40, 255.0  ;;  %v2257_v23 = vor.u32 %v2256_v49, %v2255_v62  ;;  %v2263_v46 = vand.u32 2147483647, %v2262_v31  ;;  %v2267_v51 = vand.u32 2147483647, %v742_v50 }
 0x1d1   :  { %1505 = vst [vmem:[#allocation5 + $0x248] sm:$0xff] %v1377_v36  ;;  %v1378_v35 = vmul.f32 %v1250_v24, %v4046_v29  ;;  %v2269_v14 = vcvt.f32.s32 %v742_v50  ;;  %v596_v28 = vmul.f32 %v4093_v38, %v4057_v63  ;;  %v2272_v48 = vand.u32 2147483648, %v742_v50 }
 0x1d2   :  { %v1251_v16 = vsub.f32 %v1123_v7, %v4109_v47  ;;  %v2258_v43 = vsel %vm4227_vm6, %v2257_v23, %v740_v18  ;;  %v2265_v52 = vor.u32 %v2264_v53, %v2263_v46  ;;  %v2275_v44 = vand.u32 2147483647, %v743_v22 }
 0x1d3   :  { %1506 = vst [vmem:[#allocation5 + $0x250] sm:$0xff] %v1378_v35  ;;  %v996_v56 = vadd.f32 %v2258_v43, %v4109_v47  ;;  %v2270_v6 = vcvt.s32.f32 %v2269_v14  ;;  %v2277_v19 = vcvt.f32.s32 %v743_v22  ;;  %vm4252_vm8 = vcmp.lt.f32.partialorder %v2267_v51, 8388608.0  ;;  %v4285_v14 = vld [vmem:[#allocation2 + $0x300] sm:$0xff] }
 0x1d4   :  { %v1379_v9 = vmul.f32 %v1251_v16, %v4046_v29  ;;  %v2266_v45 = vsel %vm4238_vm7, %v2265_v52, %v741_v8  ;;  %v2280_v10 = vand.u32 2147483648, %v743_v22  ;;  %v597_v17 = vsub.f32 1.0, %v596_v28  ;;  %v4287_v28 = vld [vmem:[#allocation2 + $0x308] sm:$0xff] }
 0x1d5   :  { %v1124_v4 = vmin.f32 %v996_v56, 255.0  ;;  %v997_v18 = vadd.f32 %v2266_v45, %v4109_v47  ;;  %v2271_v13 = vand.u32 2147483647, %v2270_v6  ;;  %v2278_v33 = vcvt.s32.f32 %v2277_v19 }
 0x1d6   :  { %1507 = vst [vmem:[#allocation5 + $0x258] sm:$0xff] %v1379_v9  ;;  %vm600_vm9 = vweird.f32 %v4057_v63  ;;  %vm601_vm10 = vweird.f32 %v4093_v38  ;;  %v604_v21 = vand.u32 2147483647, %v4057_v63  ;;  %vm4261_vm11 = vcmp.lt.f32.partialorder %v2275_v44, 8388608.0 }
 0x1d7   :  { %v1252_v8 = vsub.f32 %v1124_v4, %v4109_v47  ;;  %v1125_v49 = vmin.f32 %v997_v18, 255.0  ;;  %v2273_v2 = vor.u32 %v2272_v48, %v2271_v13  ;;  %v2279_v20 = vand.u32 2147483647, %v2278_v33  ;;  %vm602_vm13 = vmor %vm600_vm9, %vm601_vm10 }
 0x1d8   :  { %v598_v57 = vmul.f32 %v4093_v38, %v597_v17  ;;  %vm4266_vm12 = vcmp.eq.f32.partialorder %v604_v21, 8.507059e+37  ;;  %v606_v32 = vand.u32 2147483648, %v4057_v63  ;;  %v645_v23 = vsub.f32 0.0, %v4049_v27 }
 0x1d9   :  { %v1380_v40 = vmul.f32 %v1252_v8, %v4046_v29  ;;  %v1253_v62 = vsub.f32 %v1125_v49, %v4109_v47  ;;  %v2274_v31 = vsel %vm4252_vm8, %v2273_v2, %v742_v50  ;;  %v2281_v53 = vor.u32 %v2280_v10, %v2279_v20 }
 0x1da   :  { %v998_v36 = vadd.f32 %v2274_v31, %v4109_v47  ;;  %v599_v24 = vadd.f32 %v4093_v38, %v598_v57  ;;  %v607_v7 = vor.u32 1.1754944e-38, %v606_v32  ;;  %v279_v6 = vmax.f32 %v4285_v14, %v4287_v28 }
 0x1db   :  { %1508 = vst [vmem:[#allocation5 + $0x260] sm:$0xff] %v1380_v40  ;;  %v1381_v5 = vmul.f32 %v1253_v62, %v4046_v29  ;;  %v2282_v46 = vsel %vm4261_vm11, %v2281_v53, %v743_v22 }
 0x1dc   :  { %v1126_v35 = vmin.f32 %v998_v36, 255.0  ;;  %v999_v50 = vadd.f32 %v2282_v46, %v4109_v47  ;;  %v603_v51 = vsel %vm602_vm13, %v4093_v38, %v599_v24 }
 0x1dd   :  { %1509 = vst [vmem:[#allocation5 + $0x268] sm:$0xff] %v1381_v5  ;;  %v4291_v16 = vsel %vm4266_vm12, %v607_v7, %v603_v51 }
 0x1de   :  { %v1254_v27 = vsub.f32 %v1126_v35, %v4109_v47  ;;  %v1127_v43 = vmin.f32 %v999_v50, 255.0  ;;  %v653_v52 = vmul.f32 %v645_v23, %v4291_v16  ;;  %v744_v22 = vmul.f32 %v4291_v16, %v3960_v54 }
 0x1df   :  { %v745_v38 = vmul.f32 %v4291_v16, %v3962_v61  ;;  %v746_v48 = vmul.f32 %v4291_v16, %v3972_v1  ;;  %v4303_v56 = vmul.f32 %v4291_v16, %v3980_v58  ;;  %v4311_v61 = vmul.f32 %v4291_v16, %v3988_v34 }
 0x1e0   :  { %v1382_v44 = vmul.f32 %v1254_v27, %v4046_v29  ;;  %v1255_v19 = vsub.f32 %v1127_v43, %v4109_v47  ;;  %v1619_v9 = vand.u32 2147483647, %v653_v52  ;;  %v1621_v45 = vcvt.f32.s32 %v653_v52 }
 0x1e1   :  { %v1624_v54 = vand.u32 2147483648, %v653_v52  ;;  %v2283_v42 = vand.u32 2147483647, %v744_v22  ;;  %v2285_v10 = vcvt.f32.s32 %v744_v22  ;;  %v2288_v4 = vand.u32 2147483648, %v744_v22 }
 0x1e2   :  { %1510 = vst [vmem:[#allocation5 + $0x270] sm:$0xff] %v1382_v44  ;;  %v1383_v1 = vmul.f32 %v1255_v19, %v4046_v29  ;;  %v1622_v58 = vcvt.s32.f32 %v1621_v45  ;;  %v2291_v18 = vand.u32 2147483647, %v745_v38  ;;  %vm4314_vm14 = vcmp.lt.f32.partialorder %v1619_v9, 8388608.0 }
 0x1e3   :  { %vm4318_vm15 = vcmp.lt.f32.partialorder %v2283_v42, 8388608.0  ;;  %v2286_v33 = vcvt.s32.f32 %v2285_v10  ;;  %v2293_v17 = vcvt.f32.s32 %v745_v38  ;;  %v2296_v34 = vand.u32 2147483648, %v745_v38 }
 0x1e4   :  { %1511 = vst [vmem:[#allocation5 + $0x278] sm:$0xff] %v1383_v1  ;;  %v1623_v21 = vand.u32 2147483647, %v1622_v58  ;;  %v2299_v8 = vand.u32 2147483647, %v746_v48  ;;  %v2301_v49 = vcvt.f32.s32 %v746_v48  ;;  %vm4322_vm0 = vcmp.lt.f32.partialorder %v2291_v18, 8388608.0 }
 0x1e5   :  { %v2287_v2 = vand.u32 2147483647, %v2286_v33  ;;  %v2294_v20 = vcvt.s32.f32 %v2293_v17  ;;  %v2307_v59 = vand.u32 2147483647, %v4303_v56  ;;  %v2304_v32 = vand.u32 2147483648, %v746_v48 }
 0x1e6   :  { %v1625_v57 = vor.u32 %v1624_v54, %v1623_v21  ;;  %v2302_v15 = vcvt.s32.f32 %v2301_v49  ;;  %v2309_v40 = vcvt.f32.s32 %v4303_v56  ;;  %vm4328_vm1 = vcmp.lt.f32.partialorder %v2299_v8, 8388608.0 }
 0x1e7   :  { %v2289_v62 = vor.u32 %v2288_v4, %v2287_v2  ;;  %v2295_v31 = vand.u32 2147483647, %v2294_v20  ;;  %v2312_v36 = vand.u32 2147483648, %v4303_v56  ;;  %v2315_v5 = vand.u32 2147483647, %v4311_v61 }
 0x1e8   :  { %v4335_v24 = vsel %vm4314_vm14, %v1625_v57, %v653_v52  ;;  %v2303_v7 = vand.u32 2147483647, %v2302_v15  ;;  %v2310_v23 = vcvt.s32.f32 %v2309_v40  ;;  %vm4340_vm2 = vcmp.lt.f32.partialorder %v2307_v59, 8388608.0 }
 0x1e9   :  { %v2290_v46 = vsel %vm4318_vm15, %v2289_v62, %v744_v22  ;;  %v2297_v35 = vor.u32 %v2296_v34, %v2295_v31  ;;  %v2317_v51 = vcvt.f32.s32 %v4311_v61  ;;  %v2320_v52 = vand.u32 2147483648, %v4311_v61 }
 0x1ea   :  { %v1000_v27 = vadd.f32 %v2290_v46, %v4335_v24  ;;  %v2305_v43 = vor.u32 %v2304_v32, %v2303_v7  ;;  %v2311_v44 = vand.u32 2147483647, %v2310_v23  ;;  %vm4349_vm3 = vcmp.lt.f32.partialorder %v2315_v5, 8388608.0 }
 0x1eb   :  { %v2298_v19 = vsel %vm4322_vm0, %v2297_v35, %v745_v38  ;;  %v2318_v22 = vcvt.s32.f32 %v2317_v51  ;;  %v749_v45 = vmul.f32 %v4291_v16, %v3996_v0  ;;  %v750_v38 = vmul.f32 %v4291_v16, %v4002_v55 }
 0x1ec   :  { %v1128_v54 = vmin.f32 %v1000_v27, 255.0  ;;  %v1001_v42 = vadd.f32 %v2298_v19, %v4335_v24  ;;  %v2306_v10 = vsel %vm4328_vm1, %v2305_v43, %v746_v48  ;;  %v2313_v1 = vor.u32 %v2312_v36, %v2311_v44 }
 0x1ed   :  { %v1002_v58 = vadd.f32 %v2306_v10, %v4335_v24  ;;  %v2319_v4 = vand.u32 2147483647, %v2318_v22  ;;  %v2325_v18 = vcvt.f32.s32 %v749_v45  ;;  %v2323_v33 = vand.u32 2147483647, %v749_v45 }
 0x1ee   :  { %v1256_v13 = vsub.f32 %v1128_v54, %v4335_v24  ;;  %v1129_v47 = vmin.f32 %v1001_v42, 255.0  ;;  %v2314_v0 = vsel %vm4340_vm2, %v2313_v1, %v4303_v56  ;;  %v2328_v34 = vand.u32 2147483648, %v749_v45 }
 0x1ef   :  { %v1130_v17 = vmin.f32 %v1002_v58, 255.0  ;;  %v1003_v21 = vadd.f32 %v2314_v0, %v4335_v24  ;;  %v2321_v48 = vor.u32 %v2320_v52, %v2319_v4  ;;  %v2326_v2 = vcvt.s32.f32 %v2325_v18  ;;  %v4452_v0 = vld [vmem:[#allocation2 + $0x310] sm:$0xff] }
 0x1f0   :  { %v1384_v8 = vmul.f32 %v1256_v13, %v4057_v63  ;;  %v1257_v49 = vsub.f32 %v1129_v47, %v4335_v24  ;;  %v2331_v29 = vand.u32 2147483647, %v750_v38  ;;  %v2333_v56 = vcvt.f32.s32 %v750_v38 }
 0x1f1   :  { %v1258_v55 = vsub.f32 %v1130_v17, %v4335_v24  ;;  %v1131_v20 = vmin.f32 %v1003_v21, 255.0  ;;  %v2322_v59 = vsel %vm4349_vm3, %v2321_v48, %v4311_v61  ;;  %vm4374_vm4 = vcmp.lt.f32.partialorder %v2323_v33, 8388608.0 }
 0x1f2   :  { %1512 = vst [vmem:[#allocation5 + $0x280] sm:$0xff] %v1384_v8  ;;  %v1385_v57 = vmul.f32 %v1257_v49, %v4057_v63  ;;  %v1004_v15 = vadd.f32 %v2322_v59, %v4335_v24  ;;  %v2327_v40 = vand.u32 2147483647, %v2326_v2  ;;  %v2334_v53 = vcvt.s32.f32 %v2333_v56 }
 0x1f3   :  { %v1386_v62 = vmul.f32 %v1258_v55, %v4057_v63  ;;  %v1259_v31 = vsub.f32 %v1131_v20, %v4335_v24  ;;  %v2336_v36 = vand.u32 2147483648, %v750_v38  ;;  %v751_v23 = vmul.f32 %v4291_v16, %v4007_v25 }
 0x1f4   :  { %1513 = vst [vmem:[#allocation5 + $0x288] sm:$0xff] %v1385_v57  ;;  %v1132_v7 = vmin.f32 %v1004_v15, 255.0  ;;  %v2329_v61 = vor.u32 %v2328_v34, %v2327_v40  ;;  %v752_v5 = vmul.f32 %v4291_v16, %v4012_v41  ;;  %vm4385_vm5 = vcmp.lt.f32.partialorder %v2331_v29, 8388608.0 }
 0x1f5   :  { %1514 = vst [vmem:[#allocation5 + $0x290] sm:$0xff] %v1386_v62  ;;  %v1387_v46 = vmul.f32 %v1259_v31, %v4057_v63  ;;  %v2335_v50 = vand.u32 2147483647, %v2334_v53  ;;  %v753_v51 = vmul.f32 %v4291_v16, %v4017_v37  ;;  %v2339_v25 = vand.u32 2147483647, %v751_v23 }
 0x1f6   :  { %v1260_v27 = vsub.f32 %v1132_v7, %v4335_v24  ;;  %v2330_v43 = vsel %vm4374_vm4, %v2329_v61, %v749_v45  ;;  %v2341_v44 = vcvt.f32.s32 %v751_v23  ;;  %v2347_v19 = vand.u32 2147483647, %v752_v5 }
 0x1f7   :  { %1515 = vst [vmem:[#allocation5 + $0x298] sm:$0xff] %v1387_v46  ;;  %v1005_v41 = vadd.f32 %v2330_v43, %v4335_v24  ;;  %v2337_v52 = vor.u32 %v2336_v36, %v2335_v50  ;;  %v754_v9 = vmul.f32 %v4291_v16, %v4021_v39  ;;  %v2344_v42 = vand.u32 2147483648, %v751_v23 }
 0x1f8   :  { %v1388_v22 = vmul.f32 %v1260_v27, %v4057_v63  ;;  %v2342_v54 = vcvt.s32.f32 %v2341_v44  ;;  %v2349_v37 = vcvt.f32.s32 %v752_v5  ;;  %vm4400_vm6 = vcmp.lt.f32.partialorder %v2339_v25, 8388608.0 }
 0x1f9   :  { %v1133_v10 = vmin.f32 %v1005_v41, 255.0  ;;  %v2338_v1 = vsel %vm4385_vm5, %v2337_v52, %v750_v38  ;;  %v2352_v58 = vand.u32 2147483648, %v752_v5  ;;  %v2355_v39 = vand.u32 2147483647, %v753_v51 }
 0x1fa   :  { %1516 = vst [vmem:[#allocation5 + $0x2a0] sm:$0xff] %v1388_v22  ;;  %v1006_v4 = vadd.f32 %v2338_v1, %v4335_v24  ;;  %v2343_v18 = vand.u32 2147483647, %v2342_v54  ;;  %v2350_v13 = vcvt.s32.f32 %v2349_v37  ;;  %vm4406_vm7 = vcmp.lt.f32.partialorder %v2347_v19, 8388608.0 }
 0x1fb   :  { %v1261_v47 = vsub.f32 %v1133_v10, %v4335_v24  ;;  %v2357_v33 = vcvt.f32.s32 %v753_v51  ;;  %v2360_v17 = vand.u32 2147483648, %v753_v51  ;;  %v2363_v34 = vand.u32 2147483647, %v754_v9 }
 0x1fc   :  { %v1134_v38 = vmin.f32 %v1006_v4, 255.0  ;;  %v2345_v21 = vor.u32 %v2344_v42, %v2343_v18  ;;  %v2351_v48 = vand.u32 2147483647, %v2350_v13  ;;  %vm4411_vm8 = vcmp.lt.f32.partialorder %v2355_v39, 8388608.0 }
 0x1fd   :  { %v1389_v8 = vmul.f32 %v1261_v47, %v4057_v63  ;;  %v2358_v2 = vcvt.s32.f32 %v2357_v33  ;;  %v2365_v29 = vcvt.f32.s32 %v754_v9  ;;  %v2368_v56 = vand.u32 2147483648, %v754_v9 }
 0x1fe   :  { %v1262_v55 = vsub.f32 %v1134_v38, %v4335_v24  ;;  %v2346_v20 = vsel %vm4400_vm6, %v2345_v21, %v751_v23  ;;  %v2353_v59 = vor.u32 %v2352_v58, %v2351_v48  ;;  %v755_v40 = vmul.f32 %v4291_v16, %v4025_v11 }
 0x1ff   :  { %1517 = vst [vmem:[#allocation5 + $0x2a8] sm:$0xff] %v1389_v8  ;;  %v1007_v57 = vadd.f32 %v2346_v20, %v4335_v24  ;;  %v2359_v15 = vand.u32 2147483647, %v2358_v2  ;;  %v2366_v32 = vcvt.s32.f32 %v2365_v29  ;;  %vm4424_vm9 = vcmp.lt.f32.partialorder %v2363_v34, 8388608.0 }
 0x200   :  { %v1390_v62 = vmul.f32 %v1262_v55, %v4057_v63  ;;  %v2354_v31 = vsel %vm4406_vm7, %v2353_v59, %v752_v5  ;;  %v756_v36 = vmul.f32 %v4291_v16, %v4029_v30  ;;  %v2371_v35 = vand.u32 2147483647, %v755_v40 }
 0x201   :  { %v1135_v7 = vmin.f32 %v1007_v57, 255.0  ;;  %v1008_v61 = vadd.f32 %v2354_v31, %v4335_v24  ;;  %v2361_v23 = vor.u32 %v2360_v17, %v2359_v15  ;;  %v2367_v46 = vand.u32 2147483647, %v2366_v32  ;;  %v4472_v15 = vld [vmem:[#allocation2 + $0x318] sm:$0xff] }
 0x202   :  { %1518 = vst [vmem:[#allocation5 + $0x2b0] sm:$0xff] %v1390_v62  ;;  %v2373_v11 = vcvt.f32.s32 %v755_v40  ;;  %v2379_v50 = vand.u32 2147483647, %v756_v36  ;;  %v757_v27 = vmul.f32 %v4291_v16, %v4033_v60  ;;  %vm4437_vm10 = vcmp.lt.f32.partialorder %v2371_v35, 8388608.0 }
 0x203   :  { %v1263_v5 = vsub.f32 %v1135_v7, %v4335_v24  ;;  %v1136_v43 = vmin.f32 %v1008_v61, 255.0  ;;  %v2362_v25 = vsel %vm4411_vm8, %v2361_v23, %v753_v51  ;;  %v2369_v44 = vor.u32 %v2368_v56, %v2367_v46  ;;  %v4477_v7 = vld [vmem:[#allocation2 + $0x320] sm:$0xff] }
 0x204   :  { %v1009_v30 = vadd.f32 %v2362_v25, %v4335_v24  ;;  %v2374_v52 = vcvt.s32.f32 %v2373_v11  ;;  %v2376_v19 = vand.u32 2147483648, %v755_v40  ;;  %v2381_v42 = vcvt.f32.s32 %v756_v36 }
 0x205   :  { %v1391_v22 = vmul.f32 %v1263_v5, %v4057_v63  ;;  %v1264_v54 = vsub.f32 %v1136_v43, %v4335_v24  ;;  %v2370_v60 = vsel %vm4424_vm9, %v2369_v44, %v754_v9  ;;  %vm4446_vm11 = vcmp.lt.f32.partialorder %v2379_v50, 8388608.0  ;;  %v4484_v43 = vld [vmem:[#allocation2 + $0x328] sm:$0xff] }
 0x206   :  { %v1137_v37 = vmin.f32 %v1009_v30, 255.0  ;;  %v1010_v51 = vadd.f32 %v2370_v60, %v4335_v24  ;;  %v2375_v10 = vand.u32 2147483647, %v2374_v52  ;;  %v2382_v58 = vcvt.s32.f32 %v2381_v42 }
 0x207   :  { %1519 = vst [vmem:[#allocation5 + $0x2b8] sm:$0xff] %v1391_v22  ;;  %v1392_v45 = vmul.f32 %v1264_v54, %v4057_v63  ;;  %v2384_v4 = vand.u32 2147483648, %v756_v36  ;;  %v2389_v18 = vcvt.f32.s32 %v757_v27  ;;  %v2387_v9 = vand.u32 2147483647, %v757_v27  ;;  %v4495_v54 = vld [vmem:[#allocation2 + $0x330] sm:$0xff] }
 0x208   :  { %v1265_v13 = vsub.f32 %v1137_v37, %v4335_v24  ;;  %v1138_v39 = vmin.f32 %v1010_v51, 255.0  ;;  %v2377_v47 = vor.u32 %v2376_v19, %v2375_v10  ;;  %v2383_v33 = vand.u32 2147483647, %v2382_v58  ;;  %v4507_v58 = vld [vmem:[#allocation2 + $0x338] sm:$0xff] }
 0x209   :  { %1520 = vst [vmem:[#allocation5 + $0x2c0] sm:$0xff] %v1392_v45  ;;  %v2390_v17 = vcvt.s32.f32 %v2389_v18  ;;  %v2392_v38 = vand.u32 2147483648, %v757_v27  ;;  %v758_v21 = vmul.f32 %v4291_v16, %v4037_v26  ;;  %v759_v49 = vmul.f32 %v4291_v16, %v4041_v3 }
 0x20a   :  { %v1393_v48 = vmul.f32 %v1265_v13, %v4057_v63  ;;  %v1266_v34 = vsub.f32 %v1138_v39, %v4335_v24  ;;  %v2378_v8 = vsel %vm4437_vm10, %v2377_v47, %v755_v40  ;;  %v2385_v29 = vor.u32 %v2384_v4, %v2383_v33 }
 0x20b   :  { %v1011_v2 = vadd.f32 %v2378_v8, %v4335_v24  ;;  %v2391_v55 = vand.u32 2147483647, %v2390_v17  ;;  %v280_v20 = vmax.f32 %v279_v6, %v4452_v0  ;;  %vm4468_vm12 = vcmp.lt.f32.partialorder %v2387_v9, 8388608.0  ;;  %v4515_v9 = vld [vmem:[#allocation2 + $0x340] sm:$0xff] }
 0x20c   :  { %1521 = vst [vmem:[#allocation5 + $0x2c8] sm:$0xff] %v1393_v48  ;;  %v1394_v26 = vmul.f32 %v1266_v34, %v4057_v63  ;;  %v2395_v56 = vand.u32 2147483647, %v758_v21  ;;  %v2397_v57 = vcvt.f32.s32 %v758_v21  ;;  %v2386_v16 = vsel %vm4446_vm11, %v2385_v29, %v756_v36  ;;  %v4520_v48 = vld [vmem:[#allocation2 + $0x348] sm:$0xff] }
 0x20d   :  { %v1139_v3 = vmin.f32 %v1011_v2, 255.0  ;;  %v2393_v32 = vor.u32 %v2392_v38, %v2391_v55  ;;  %v2400_v40 = vand.u32 2147483648, %v758_v21  ;;  %v1012_v6 = vadd.f32 %v2386_v16, %v4335_v24 }
 0x20e   :  { %1522 = vst [vmem:[#allocation5 + $0x2d0] sm:$0xff] %v1394_v26  ;;  %v2398_v62 = vcvt.s32.f32 %v2397_v57  ;;  %v2403_v31 = vand.u32 2147483647, %v759_v49  ;;  %v2405_v53 = vcvt.f32.s32 %v759_v49  ;;  %v2408_v46 = vand.u32 2147483648, %v759_v49 }
 0x20f   :  { %v1267_v61 = vsub.f32 %v1139_v3, %v4335_v24  ;;  %v2394_v23 = vsel %vm4468_vm12, %v2393_v32, %v757_v27  ;;  %v281_v35 = vmax.f32 %v280_v20, %v4472_v15  ;;  %v1140_v11 = vmin.f32 %v1012_v6, 255.0  ;;  %v4536_v32 = vld [vmem:[#allocation2 + $0x380] sm:$0xff] }
 0x210   :  { %v1013_v36 = vadd.f32 %v2394_v23, %v4335_v24  ;;  %v2399_v50 = vand.u32 2147483647, %v2398_v62  ;;  %v2406_v5 = vcvt.s32.f32 %v2405_v53  ;;  %vm4487_vm13 = vcmp.lt.f32.partialorder %v2395_v56, 8388608.0  ;;  %v4531_v56 = vld [vmem:[#allocation2 + $0x358] sm:$0xff]  ;;  %v4540_v6 = vld [vmem:[#allocation2 + $0x360] sm:$0xff]  ;;  %v4548_v53 = vld [vmem:[#allocation2 + $0x390] sm:$0xff] }
 0x211   :  { %v1395_v25 = vmul.f32 %v1267_v61, %v4057_v63  ;;  %v282_v30 = vmax.f32 %v281_v35, %v4477_v7  ;;  %v447_v27 = vmin.f32 %v4285_v14, %v4287_v28  ;;  %v1268_v41 = vsub.f32 %v1140_v11, %v4335_v24  ;;  %v4550_v61 = vld [vmem:[#allocation2 + $0x368] sm:$0xff] }
 0x212   :  { %v1141_v52 = vmin.f32 %v1013_v36, 255.0  ;;  %v2401_v19 = vor.u32 %v2400_v40, %v2399_v50  ;;  %v2407_v22 = vand.u32 2147483647, %v2406_v5  ;;  %vm4497_vm14 = vcmp.lt.f32.partialorder %v2403_v31, 8388608.0  ;;  %v4538_v40 = vld [vmem:[#allocation2 + $0x388] sm:$0xff]  ;;  %v4556_v36 = vld [vmem:[#allocation2 + $0x398] sm:$0xff] }
 0x213   :  { %1523 = vst [vmem:[#allocation5 + $0x2d8] sm:$0xff] %v1395_v25  ;;  %v283_v42 = vmax.f32 %v282_v30, %v4484_v43  ;;  %v448_v37 = vmin.f32 %v447_v27, %v4452_v0  ;;  %v1396_v51 = vmul.f32 %v1268_v41, %v4057_v63  ;;  %v468_v62 = vmin.f32 %v4536_v32, %v4538_v40  ;;  %v4558_v50 = vld [vmem:[#allocation2 + $0x370] sm:$0xff]  ;;  %v4564_v27 = vld [vmem:[#allocation2 + $0x3a0] sm:$0xff]  ;;  %v4566_v41 = vld [vmem:[#allocation2 + $0x378] sm:$0xff] }
 0x214   :  { %v1269_v10 = vsub.f32 %v1141_v52, %v4335_v24  ;;  %v2402_v1 = vsel %vm4487_vm13, %v2401_v19, %v758_v21  ;;  %v2409_v45 = vor.u32 %v2408_v46, %v2407_v22 }
 0x215   :  { %v1014_v4 = vadd.f32 %v2402_v1, %v4335_v24  ;;  %v284_v18 = vmax.f32 %v283_v42, %v4495_v54  ;;  %v449_v13 = vmin.f32 %v448_v37, %v4472_v15  ;;  %1524 = vst [vmem:[#allocation5 + $0x2e0] sm:$0xff] %v1396_v51  ;;  %v469_v46 = vmin.f32 %v468_v62, %v4548_v53  ;;  %v4572_v42 = vld [vmem:[#allocation2 + $0x3a8] sm:$0xff] }
 0x216   :  { %v1397_v39 = vmul.f32 %v1269_v10, %v4057_v63  ;;  %v2410_v47 = vsel %vm4497_vm14, %v2409_v45, %v759_v49  ;;  %v4525_v49 = vld [vmem:[#allocation2 + $0x350] sm:$0xff] }
 0x217   :  { %v1142_v33 = vmin.f32 %v1014_v4, 255.0  ;;  %v1015_v17 = vadd.f32 %v2410_v47, %v4335_v24  ;;  %v285_v38 = vmax.f32 %v284_v18, %v4507_v58  ;;  %v450_v21 = vmin.f32 %v449_v13, %v4477_v7  ;;  %v4578_v45 = vld [vmem:[#allocation2 + $0x3b0] sm:$0xff]  ;;  %v4583_v47 = vld [vmem:[#allocation2 + $0x3b8] sm:$0xff] }
 0x218   :  { %1525 = vst [vmem:[#allocation5 + $0x2e8] sm:$0xff] %v1397_v39  ;;  %v470_v25 = vmin.f32 %v469_v46, %v4556_v36 }
 0x219   :  { %v1270_v34 = vsub.f32 %v1142_v33, %v4335_v24  ;;  %v1143_v8 = vmin.f32 %v1015_v17, 255.0  ;;  %v286_v2 = vmax.f32 %v285_v38, %v4515_v9  ;;  %v451_v29 = vmin.f32 %v450_v21, %v4484_v43 }
 0x21a   :  { %v471_v19 = vmin.f32 %v470_v25, %v4564_v27 }
 0x21b   :  { %v1398_v55 = vmul.f32 %v1270_v34, %v4057_v63  ;;  %v1271_v20 = vsub.f32 %v1143_v8, %v4335_v24  ;;  %v287_v26 = vmax.f32 %v286_v2, %v4520_v48  ;;  %v452_v59 = vmin.f32 %v451_v29, %v4495_v54  ;;  %v4588_v34 = vld [vmem:[#allocation2 + $0x3c0] sm:$0xff] }
 0x21c   :  { %v300_v24 = vmax.f32 %v4536_v32, %v4538_v40  ;;  %v472_v51 = vmin.f32 %v471_v19, %v4572_v42 }
 0x21d   :  { %1526 = vst [vmem:[#allocation5 + $0x2f0] sm:$0xff] %v1398_v55  ;;  %v1399_v57 = vmul.f32 %v1271_v20, %v4057_v63  ;;  %v288_v3 = vmax.f32 %v287_v26, %v4525_v49  ;;  %v453_v16 = vmin.f32 %v452_v59, %v4507_v58  ;;  %v4593_v20 = vld [vmem:[#allocation2 + $0x3c8] sm:$0xff] }
 0x21e   :  { %v301_v23 = vmax.f32 %v300_v24, %v4548_v53  ;;  %v473_v18 = vmin.f32 %v472_v51, %v4578_v45  ;;  %v4613_v51 = vld [vmem:[#allocation2 + $0x3f0] sm:$0xff] }
 0x21f   :  { %1527 = vst [vmem:[#allocation5 + $0x2f8] sm:$0xff] %v1399_v57  ;;  %v289_v31 = vmax.f32 %v288_v3, %v4531_v56  ;;  %v454_v63 = vmin.f32 %v453_v16, %v4515_v9  ;;  %v4597_v16 = vld [vmem:[#allocation2 + $0x3d0] sm:$0xff] }
 0x220   :  { %v302_v5 = vmax.f32 %v301_v23, %v4556_v36  ;;  %v474_v17 = vmin.f32 %v473_v18, %v4583_v47  ;;  %v4617_v18 = vld [vmem:[#allocation2 + $0x3f8] sm:$0xff] }
 0x221   :  { %v290_v35 = vmax.f32 %v289_v31, %v4540_v6  ;;  %v455_v11 = vmin.f32 %v454_v63, %v4520_v48  ;;  %v4601_v63 = vld [vmem:[#allocation2 + $0x3d8] sm:$0xff] }
 0x222   :  { %v303_v52 = vmax.f32 %v302_v5, %v4564_v27  ;;  %v475_v2 = vmin.f32 %v474_v17, %v4588_v34  ;;  %v4605_v5 = vld [vmem:[#allocation2 + $0x3e0] sm:$0xff] }
 0x223   :  { %v291_v44 = vmax.f32 %v290_v35, %v4550_v61  ;;  %v456_v30 = vmin.f32 %v455_v11, %v4525_v49 }
 0x224   :  { %v304_v37 = vmax.f32 %v303_v52, %v4572_v42  ;;  %v476_v59 = vmin.f32 %v475_v2, %v4593_v20  ;;  %v4609_v52 = vld [vmem:[#allocation2 + $0x3e8] sm:$0xff] }
 0x225   :  { %v292_v22 = vmax.f32 %v291_v44, %v4558_v50  ;;  %v457_v60 = vmin.f32 %v456_v30, %v4531_v56 }
 0x226   :  { %v305_v4 = vmax.f32 %v304_v37, %v4578_v45  ;;  %v477_v62 = vmin.f32 %v476_v59, %v4597_v16 }
 0x227   :  { %v293_v10 = vmax.f32 %v292_v22, %v4566_v41  ;;  %v458_v1 = vmin.f32 %v457_v60, %v4540_v6 }
 0x228   :  { %v306_v33 = vmax.f32 %v305_v4, %v4583_v47  ;;  %v478_v46 = vmin.f32 %v477_v62, %v4601_v63 }
 0x229   :  { %v294_v13 = vrot.slane %v293_v10, 4  ;;  %v459_v39 = vmin.f32 %v458_v1, %v4550_v61 }
 0x22a   :  { %v307_v8 = vmax.f32 %v306_v33, %v4588_v34  ;;  %v479_v44 = vmin.f32 %v478_v46, %v4605_v5 }
 0x22b   :  { %v295_v38 = vmax.f32 %v293_v10, %v294_v13  ;;  %v460_v21 = vmin.f32 %v459_v39, %v4558_v50 }
 0x22c   :  { %v308_v26 = vmax.f32 %v307_v8, %v4593_v20  ;;  %v480_v22 = vmin.f32 %v479_v44, %v4609_v52 }
 0x22d   :  { %v296_v29 = vrot.slane %v295_v38, 2  ;;  %v461_v55 = vmin.f32 %v460_v21, %v4566_v41 }
 0x22e   :  { %v309_v24 = vmax.f32 %v308_v26, %v4597_v16  ;;  %v481_v1 = vmin.f32 %v480_v22, %v4613_v51 }
 0x22f   :  { %v297_v57 = vmax.f32 %v295_v38, %v296_v29  ;;  %v462_v3 = vrot.slane %v461_v55, 4 }
 0x230   :  { %v310_v23 = vmax.f32 %v309_v24, %v4601_v63  ;;  %v482_v39 = vmin.f32 %v481_v1, %v4617_v18 }
 0x231   :  { %v463_v31 = vmin.f32 %v461_v55, %v462_v3  ;;  %v298_v35 = vrot.slane %v297_v57, 1 }
 0x232   :  { %v311_v25 = vmax.f32 %v310_v23, %v4605_v5  ;;  %v483_v38 = vrot.slane %v482_v39, 4 }
 0x233   :  { %v464_v11 = vrot.slane %v463_v31, 2  ;;  %v299_v60 = vmax.f32 %v297_v57, %v298_v35 }
 0x234   :  { %v312_v19 = vmax.f32 %v311_v25, %v4609_v52  ;;  %v484_v2 = vmin.f32 %v482_v39, %v483_v38 }
 0x235   :  { %v465_v30 = vmin.f32 %v463_v31, %v464_v11 }
 0x236   :  { %v313_v10 = vmax.f32 %v312_v19, %v4613_v51  ;;  %v485_v26 = vrot.slane %v484_v2, 2 }
 0x237   :  { %v466_v37 = vrot.slane %v465_v30, 1 }
 0x238   :  { %v314_v13 = vmax.f32 %v313_v10, %v4617_v18  ;;  %v486_v57 = vmin.f32 %v484_v2, %v485_v26 }
 0x239   :  { %v467_v4 = vmin.f32 %v465_v30, %v466_v37 }
 0x23a   :  { %v315_v17 = vrot.slane %v314_v13, 4  ;;  %v487_v24 = vrot.slane %v486_v57, 1 }
 0x23b   :  { %v495_v33 = vsub.f32 %v299_v60, %v467_v4  ;;  %v646_v37 = vsub.f32 0.0, %v467_v4 }
 0x23c   :  { %v316_v8 = vmax.f32 %v314_v13, %v315_v17  ;;  %v4625_v31 = vmin.f32 %v486_v57, %v487_v24 }
 0x23d   :  { %v510_v21 = vmul.f32 %v2889_v12, %v495_v33 }
 0x23e   :  { %v317_v55 = vrot.slane %v316_v8, 2 }
 0x23f   :  { %v4622_v29 = vmax.f32 %v510_v21, 1e-08 }
 0x240   :  { %v318_v59 = vmax.f32 %v316_v8, %v317_v55 }
 0x241   :  { %2686 = vrcp.f32 %v4622_v29  ;;  %vm615_vm15 = vweird.f32 %v4622_v29  ;;  %v621_v11 = vand.u32 2147483648, %v4622_v29  ;;  %v619_v44 = vand.u32 2147483647, %v4622_v29 }
 0x242   :  { %v319_v3 = vrot.slane %v318_v59, 1 }
 0x243   :  { %v622_v22 = vor.u32 1.1754944e-38, %v621_v11  ;;  %vm620_vm2 = vcmp.eq.f32.partialorder %v619_v44, 8.507059e+37 }
 0x244   :  { %v320_v62 = vmax.f32 %v318_v59, %v319_v3 }
 0x246   :  { %v496_v35 = vsub.f32 %v320_v62, %v4625_v31 }
 0x247   :  { %v2687_v23 = vpop.eup %2686 }
 0x248   :  { %v611_v46 = vmul.f32 %v2687_v23, %v4622_v29  ;;  %vm616_vm0 = vweird.f32 %v2687_v23  ;;  %v511_v30 = vmul.f32 %v2889_v12, %v496_v35 }
 0x249   :  { %vm617_vm1 = vmor %vm615_vm15, %vm616_vm0 }
 0x24a   :  { %v612_v25 = vsub.f32 1.0, %v611_v46  ;;  %v4633_v10 = vmax.f32 %v511_v30, 1e-08 }
 0x24c   :  { %v613_v19 = vmul.f32 %v2687_v23, %v612_v25  ;;  %2688 = vrcp.f32 %v4633_v10 }
 0x24e   :  { %v614_v60 = vadd.f32 %v2687_v23, %v613_v19 }
 0x250   :  { %v618_v1 = vsel %vm617_vm1, %v2687_v23, %v614_v60 }
 0x251   :  { %v4635_v13 = vsel %vm620_vm2, %v622_v22, %v618_v1 }
 0x252   :  { %v654_v39 = vmul.f32 %v646_v37, %v4635_v13  ;;  %v760_v33 = vmul.f32 %v4635_v13, %v4285_v14  ;;  %v761_v17 = vmul.f32 %v4635_v13, %v4287_v28  ;;  %v762_v12 = vmul.f32 %v4635_v13, %v4452_v0 }
 0x253   :  { %v4647_v4 = vmul.f32 %v4635_v13, %v4472_v15  ;;  %v4651_v38 = vmul.f32 %v4635_v13, %v4477_v7  ;;  %v4655_v21 = vmul.f32 %v4635_v13, %v4484_v43  ;;  %v4659_v2 = vmul.f32 %v4635_v13, %v4495_v54  ;;  %v4669_v54 = vpop.eup %2688 }
 0x254   :  { %v1627_v14 = vand.u32 2147483647, %v654_v39  ;;  %v1629_v8 = vcvt.f32.s32 %v654_v39  ;;  %v2411_v28 = vand.u32 2147483647, %v760_v33  ;;  %v1632_v0 = vand.u32 2147483648, %v654_v39 }
 0x255   :  { %v2413_v55 = vcvt.f32.s32 %v760_v33  ;;  %v2419_v26 = vand.u32 2147483647, %v761_v17  ;;  %v2421_v15 = vcvt.f32.s32 %v761_v17  ;;  %v2416_v43 = vand.u32 2147483648, %v760_v33 }
 0x256   :  { %vm4661_vm3 = vcmp.lt.f32.partialorder %v1627_v14, 8388608.0  ;;  %v1630_v7 = vcvt.s32.f32 %v1629_v8  ;;  %vm4665_vm4 = vcmp.lt.f32.partialorder %v2411_v28, 8388608.0  ;;  %v2424_v62 = vand.u32 2147483648, %v761_v17 }
 0x257   :  { %v2414_v3 = vcvt.s32.f32 %v2413_v55  ;;  %v2422_v24 = vcvt.s32.f32 %v2421_v15  ;;  %v2427_v23 = vand.u32 2147483647, %v762_v12  ;;  %vm4671_vm5 = vcmp.lt.f32.partialorder %v2419_v26, 8388608.0 }
 0x258   :  { %v1631_v46 = vand.u32 2147483647, %v1630_v7  ;;  %v2429_v11 = vcvt.f32.s32 %v762_v12  ;;  %v2435_v25 = vand.u32 2147483647, %v4647_v4  ;;  %v2432_v19 = vand.u32 2147483648, %v762_v12 }
 0x259   :  { %v2415_v44 = vand.u32 2147483647, %v2414_v3  ;;  %v2423_v30 = vand.u32 2147483647, %v2422_v24  ;;  %v2437_v22 = vcvt.f32.s32 %v4647_v4  ;;  %vm4677_vm6 = vcmp.lt.f32.partialorder %v2427_v23, 8388608.0 }
 0x25a   :  { %v1633_v60 = vor.u32 %v1632_v0, %v1631_v46  ;;  %v2430_v1 = vcvt.s32.f32 %v2429_v11  ;;  %v2440_v14 = vand.u32 2147483648, %v4647_v4  ;;  %v2443_v26 = vand.u32 2147483647, %v4651_v38 }
 0x25b   :  { %v2417_v8 = vor.u32 %v2416_v43, %v2415_v44  ;;  %v2425_v28 = vor.u32 %v2424_v62, %v2423_v30  ;;  %v2438_v55 = vcvt.s32.f32 %v2437_v22  ;;  %vm4687_vm7 = vcmp.lt.f32.partialorder %v2435_v25, 8388608.0 }
 0x25c   :  { %v4685_v15 = vsel %vm4661_vm3, %v1633_v60, %v654_v39  ;;  %v2431_v7 = vand.u32 2147483647, %v2430_v1  ;;  %v2445_v0 = vcvt.f32.s32 %v4651_v38  ;;  %v2448_v23 = vand.u32 2147483648, %v4651_v38 }
 0x25d   :  { %v2418_v24 = vsel %vm4665_vm4, %v2417_v8, %v760_v33  ;;  %v2426_v43 = vsel %vm4671_vm5, %v2425_v28, %v761_v17  ;;  %v2439_v62 = vand.u32 2147483647, %v2438_v55  ;;  %vm4699_vm8 = vcmp.lt.f32.partialorder %v2443_v26, 8388608.0 }
 0x25e   :  { %v1016_v59 = vadd.f32 %v2418_v24, %v4685_v15  ;;  %v1017_v39 = vadd.f32 %v2426_v43, %v4685_v15  ;;  %v2433_v46 = vor.u32 %v2432_v19, %v2431_v7  ;;  %v2446_v11 = vcvt.s32.f32 %v2445_v0 }
 0x25f   :  { %v2441_v25 = vor.u32 %v2440_v14, %v2439_v62  ;;  %v2451_v57 = vand.u32 2147483647, %v4655_v21  ;;  %v2453_v33 = vcvt.f32.s32 %v4655_v21  ;;  %v2456_v14 = vand.u32 2147483648, %v4655_v21 }
 0x260   :  { %v1144_v35 = vmin.f32 %v1016_v59, 255.0  ;;  %v1145_v17 = vmin.f32 %v1017_v39, 255.0  ;;  %v2434_v30 = vsel %vm4677_vm6, %v2433_v46, %v762_v12  ;;  %v2447_v22 = vand.u32 2147483647, %v2446_v11 }
 0x261   :  { %v1018_v60 = vadd.f32 %v2434_v30, %v4685_v15  ;;  %v2442_v19 = vsel %vm4687_vm7, %v2441_v25, %v4647_v4  ;;  %v2454_v1 = vcvt.s32.f32 %v2453_v33  ;;  %vm4715_vm9 = vcmp.lt.f32.partialorder %v2451_v57, 8388608.0 }
 0x262   :  { %v1272_v8 = vsub.f32 %v1144_v35, %v4685_v15  ;;  %v1273_v28 = vsub.f32 %v1145_v17, %v4685_v15  ;;  %v1019_v55 = vadd.f32 %v2442_v19, %v4685_v15  ;;  %v2449_v26 = vor.u32 %v2448_v23, %v2447_v22 }
 0x263   :  { %v1146_v7 = vmin.f32 %v1018_v60, 255.0  ;;  %v2455_v37 = vand.u32 2147483647, %v2454_v1  ;;  %v2461_v0 = vcvt.f32.s32 %v4659_v2  ;;  %v2459_v39 = vand.u32 2147483647, %v4659_v2 }
 0x264   :  { %v1400_v4 = vmul.f32 %v1272_v8, %v4622_v29  ;;  %v1401_v3 = vmul.f32 %v1273_v28, %v4622_v29  ;;  %v1147_v24 = vmin.f32 %v1019_v55, 255.0  ;;  %v2450_v43 = vsel %vm4699_vm8, %v2449_v26, %v4651_v38 }
 0x265   :  { %v1274_v62 = vsub.f32 %v1146_v7, %v4685_v15  ;;  %v1020_v23 = vadd.f32 %v2450_v43, %v4685_v15  ;;  %v2457_v59 = vor.u32 %v2456_v14, %v2455_v37  ;;  %v2462_v11 = vcvt.s32.f32 %v2461_v0 }
 0x266   :  { %1528 = vst [vmem:[#allocation5 + $0x300] sm:$0xff] %v1400_v4  ;;  %v1275_v46 = vsub.f32 %v1147_v24, %v4685_v15  ;;  %v2464_v25 = vand.u32 2147483648, %v4659_v2  ;;  %v767_v57 = vmul.f32 %v4635_v13, %v4507_v58  ;;  %v768_v35 = vmul.f32 %v4635_v13, %v4515_v9 }
 0x267   :  { %1529 = vst [vmem:[#allocation5 + $0x308] sm:$0xff] %v1401_v3  ;;  %v1402_v44 = vmul.f32 %v1274_v62, %v4622_v29  ;;  %v1148_v38 = vmin.f32 %v1020_v23, 255.0  ;;  %v2458_v33 = vsel %vm4715_vm9, %v2457_v59, %v4655_v21  ;;  %v2463_v22 = vand.u32 2147483647, %v2462_v11 }
 0x268   :  { %v1403_v17 = vmul.f32 %v1275_v46, %v4622_v29  ;;  %v1021_v30 = vadd.f32 %v2458_v33, %v4685_v15  ;;  %v2467_v60 = vand.u32 2147483647, %v767_v57  ;;  %vm4741_vm10 = vcmp.lt.f32.partialorder %v2459_v39, 8388608.0 }
 0x269   :  { %1530 = vst [vmem:[#allocation5 + $0x310] sm:$0xff] %v1402_v44  ;;  %v1276_v58 = vsub.f32 %v1148_v38, %v4685_v15  ;;  %v2469_v1 = vcvt.f32.s32 %v767_v57  ;;  %v2475_v14 = vand.u32 2147483647, %v768_v35  ;;  %v2465_v8 = vor.u32 %v2464_v25, %v2463_v22 }
 0x26a   :  { %1531 = vst [vmem:[#allocation5 + $0x318] sm:$0xff] %v1403_v17  ;;  %v1149_v21 = vmin.f32 %v1021_v30, 255.0  ;;  %v2472_v28 = vand.u32 2147483648, %v767_v57  ;;  %v2477_v9 = vcvt.f32.s32 %v768_v35  ;;  %vm4746_vm11 = vcmp.lt.f32.partialorder %v2467_v60, 8388608.0 }
 0x26b   :  { %v1404_v55 = vmul.f32 %v1276_v58, %v4622_v29  ;;  %v2470_v7 = vcvt.s32.f32 %v2469_v1  ;;  %v2480_v12 = vand.u32 2147483648, %v768_v35  ;;  %v2466_v0 = vsel %vm4741_vm10, %v2465_v8, %v4659_v2 }
 0x26c   :  { %v1277_v37 = vsub.f32 %v1149_v21, %v4685_v15  ;;  %v2478_v4 = vcvt.s32.f32 %v2477_v9  ;;  %v769_v3 = vmul.f32 %v4635_v13, %v4520_v48  ;;  %v1022_v24 = vadd.f32 %v2466_v0, %v4685_v15 }
 0x26d   :  { %1532 = vst [vmem:[#allocation5 + $0x320] sm:$0xff] %v1404_v55  ;;  %v2471_v43 = vand.u32 2147483647, %v2470_v7  ;;  %vm4757_vm12 = vcmp.lt.f32.partialorder %v2475_v14, 8388608.0  ;;  %v770_v23 = vmul.f32 %v4635_v13, %v4525_v49  ;;  %v771_v48 = vmul.f32 %v4635_v13, %v4531_v56 }
 0x26e   :  { %v1405_v59 = vmul.f32 %v1277_v37, %v4622_v29  ;;  %v2479_v39 = vand.u32 2147483647, %v2478_v4  ;;  %v2483_v46 = vand.u32 2147483647, %v769_v3  ;;  %v2485_v2 = vcvt.f32.s32 %v769_v3 }
 0x26f   :  { %v1150_v11 = vmin.f32 %v1022_v24, 255.0  ;;  %v2473_v25 = vor.u32 %v2472_v28, %v2471_v43  ;;  %v2491_v44 = vand.u32 2147483647, %v770_v23  ;;  %v2488_v17 = vand.u32 2147483648, %v769_v3 }
 0x270   :  { %1533 = vst [vmem:[#allocation5 + $0x328] sm:$0xff] %v1405_v59  ;;  %v2481_v38 = vor.u32 %v2480_v12, %v2479_v39  ;;  %v2486_v33 = vcvt.s32.f32 %v2485_v2  ;;  %v2493_v30 = vcvt.f32.s32 %v770_v23  ;;  %vm4769_vm13 = vcmp.lt.f32.partialorder %v2483_v46, 8388608.0 }
 0x271   :  { %v1278_v22 = vsub.f32 %v1150_v11, %v4685_v15  ;;  %v2474_v49 = vsel %vm4746_vm11, %v2473_v25, %v767_v57  ;;  %v2496_v58 = vand.u32 2147483648, %v770_v23  ;;  %vm4778_vm14 = vcmp.lt.f32.partialorder %v2491_v44, 8388608.0 }
 0x272   :  { %v1023_v19 = vadd.f32 %v2474_v49, %v4685_v15  ;;  %v2482_v56 = vsel %vm4757_vm12, %v2481_v38, %v768_v35  ;;  %v2487_v1 = vand.u32 2147483647, %v2486_v33  ;;  %v2494_v14 = vcvt.s32.f32 %v2493_v30 }
 0x273   :  { %v1406_v21 = vmul.f32 %v1278_v22, %v4622_v29  ;;  %v1024_v8 = vadd.f32 %v2482_v56, %v4685_v15  ;;  %v2501_v57 = vcvt.f32.s32 %v771_v48  ;;  %v2499_v7 = vand.u32 2147483647, %v771_v48 }
 0x274   :  { %v1151_v9 = vmin.f32 %v1023_v19, 255.0  ;;  %v2489_v55 = vor.u32 %v2488_v17, %v2487_v1  ;;  %v2495_v26 = vand.u32 2147483647, %v2494_v14  ;;  %v2504_v0 = vand.u32 2147483648, %v771_v48 }
 0x275   :  { %1534 = vst [vmem:[#allocation5 + $0x330] sm:$0xff] %v1406_v21  ;;  %v1152_v12 = vmin.f32 %v1024_v8, 255.0  ;;  %v2502_v37 = vcvt.s32.f32 %v2501_v57  ;;  %v772_v35 = vmul.f32 %v4635_v13, %v4540_v6  ;;  %v773_v62 = vmul.f32 %v4635_v13, %v4550_v61 }
 0x276   :  { %v1279_v4 = vsub.f32 %v1151_v9, %v4685_v15  ;;  %v2490_v24 = vsel %vm4769_vm13, %v2489_v55, %v769_v3  ;;  %v2497_v43 = vor.u32 %v2496_v58, %v2495_v26  ;;  %vm4794_vm15 = vcmp.lt.f32.partialorder %v2499_v7, 8388608.0 }
 0x277   :  { %v1280_v59 = vsub.f32 %v1152_v12, %v4685_v15  ;;  %v1025_v39 = vadd.f32 %v2490_v24, %v4685_v15  ;;  %v2503_v46 = vand.u32 2147483647, %v2502_v37  ;;  %v2507_v2 = vand.u32 2147483647, %v772_v35 }
 0x278   :  { %v1407_v11 = vmul.f32 %v1279_v4, %v4622_v29  ;;  %v2498_v6 = vsel %vm4778_vm14, %v2497_v43, %v770_v23  ;;  %v2509_v3 = vcvt.f32.s32 %v772_v35  ;;  %v2512_v30 = vand.u32 2147483648, %v772_v35 }
 0x279   :  { %v1408_v44 = vmul.f32 %v1280_v59, %v4622_v29  ;;  %v1153_v38 = vmin.f32 %v1025_v39, 255.0  ;;  %v1026_v61 = vadd.f32 %v2498_v6, %v4685_v15  ;;  %v2505_v33 = vor.u32 %v2504_v0, %v2503_v46 }
 0x27a   :  { %1535 = vst [vmem:[#allocation5 + $0x338] sm:$0xff] %v1407_v11  ;;  %v2510_v17 = vcvt.s32.f32 %v2509_v3  ;;  %v2515_v22 = vand.u32 2147483647, %v773_v62  ;;  %v2517_v49 = vcvt.f32.s32 %v773_v62  ;;  %vm4803_vm0 = vcmp.lt.f32.partialorder %v2507_v2, 8388608.0 }
 0x27b   :  { %1536 = vst [vmem:[#allocation5 + $0x340] sm:$0xff] %v1408_v44  ;;  %v1281_v60 = vsub.f32 %v1153_v38, %v4685_v15  ;;  %v1154_v23 = vmin.f32 %v1026_v61, 255.0  ;;  %v2506_v58 = vsel %vm4794_vm15, %v2505_v33, %v771_v48  ;;  %v2520_v21 = vand.u32 2147483648, %v773_v62 }
 0x27c   :  { %v1027_v56 = vadd.f32 %v2506_v58, %v4685_v15  ;;  %v2511_v1 = vand.u32 2147483647, %v2510_v17  ;;  %v2518_v14 = vcvt.s32.f32 %v2517_v49  ;;  %v774_v57 = vmul.f32 %v4635_v13, %v4558_v50 }
 0x27d   :  { %v1409_v8 = vmul.f32 %v1281_v60, %v4622_v29  ;;  %v1282_v28 = vsub.f32 %v1154_v23, %v4685_v15  ;;  %v775_v9 = vmul.f32 %v4635_v13, %v4566_v41  ;;  %vm4814_vm1 = vcmp.lt.f32.partialorder %v2515_v22, 8388608.0 }
 0x27e   :  { %v1155_v48 = vmin.f32 %v1027_v56, 255.0  ;;  %v2513_v55 = vor.u32 %v2512_v30, %v2511_v1  ;;  %v2519_v7 = vand.u32 2147483647, %v2518_v14  ;;  %v2523_v37 = vand.u32 2147483647, %v774_v57 }
 0x27f   :  { %1537 = vst [vmem:[#allocation5 + $0x348] sm:$0xff] %v1409_v8  ;;  %v1410_v12 = vmul.f32 %v1282_v28, %v4622_v29  ;;  %v2525_v0 = vcvt.f32.s32 %v774_v57  ;;  %v626_v4 = vmul.f32 %v4669_v54, %v4633_v10  ;;  %v2528_v24 = vand.u32 2147483648, %v774_v57 }
 0x280   :  { %v1283_v50 = vsub.f32 %v1155_v48, %v4685_v15  ;;  %v2514_v41 = vsel %vm4803_vm0, %v2513_v55, %v772_v35  ;;  %v2521_v13 = vor.u32 %v2520_v21, %v2519_v7  ;;  %v2531_v39 = vand.u32 2147483647, %v775_v9 }
 0x281   :  { %1538 = vst [vmem:[#allocation5 + $0x350] sm:$0xff] %v1410_v12  ;;  %v1028_v43 = vadd.f32 %v2514_v41, %v4685_v15  ;;  %v2526_v59 = vcvt.s32.f32 %v2525_v0  ;;  %v2533_v46 = vcvt.f32.s32 %v775_v9  ;;  %vm4828_vm2 = vcmp.lt.f32.partialorder %v2523_v37, 8388608.0 }
 0x282   :  { %v1411_v2 = vmul.f32 %v1283_v50, %v4622_v29  ;;  %v2522_v11 = vsel %vm4814_vm1, %v2521_v13, %v773_v62  ;;  %v2536_v25 = vand.u32 2147483648, %v775_v9  ;;  %v627_v61 = vsub.f32 1.0, %v626_v4 }
 0x283   :  { %v1156_v3 = vmin.f32 %v1028_v43, 255.0  ;;  %v1029_v35 = vadd.f32 %v2522_v11, %v4685_v15  ;;  %v2527_v44 = vand.u32 2147483647, %v2526_v59  ;;  %v2534_v38 = vcvt.s32.f32 %v2533_v46 }
 0x284   :  { %1539 = vst [vmem:[#allocation5 + $0x358] sm:$0xff] %v1411_v2  ;;  %vm630_vm3 = vweird.f32 %v4633_v10  ;;  %vm631_vm4 = vweird.f32 %v4669_v54  ;;  %v634_v33 = vand.u32 2147483647, %v4633_v10  ;;  %vm4837_vm5 = vcmp.lt.f32.partialorder %v2531_v39, 8388608.0 }
 0x285   :  { %v1284_v62 = vsub.f32 %v1156_v3, %v4685_v15  ;;  %v1157_v17 = vmin.f32 %v1029_v35, 255.0  ;;  %v2529_v30 = vor.u32 %v2528_v24, %v2527_v44  ;;  %v2535_v22 = vand.u32 2147483647, %v2534_v38  ;;  %vm632_vm7 = vmor %vm630_vm3, %vm631_vm4 }
 0x286   :  { %v628_v60 = vmul.f32 %v4669_v54, %v627_v61  ;;  %vm4842_vm6 = vcmp.eq.f32.partialorder %v634_v33, 8.507059e+37  ;;  %v636_v58 = vand.u32 2147483648, %v4633_v10  ;;  %v647_v48 = vsub.f32 0.0, %v4625_v31 }
 0x287   :  { %v1412_v19 = vmul.f32 %v1284_v62, %v4622_v29  ;;  %v1285_v56 = vsub.f32 %v1157_v17, %v4685_v15  ;;  %v2530_v1 = vsel %vm4828_vm2, %v2529_v30, %v774_v57  ;;  %v2537_v14 = vor.u32 %v2536_v25, %v2535_v22 }
 0x288   :  { %v1030_v21 = vadd.f32 %v2530_v1, %v4685_v15  ;;  %v629_v8 = vadd.f32 %v4669_v54, %v628_v60  ;;  %v637_v28 = vor.u32 1.1754944e-38, %v636_v58 }
 0x289   :  { %1540 = vst [vmem:[#allocation5 + $0x360] sm:$0xff] %v1412_v19  ;;  %v1413_v55 = vmul.f32 %v1285_v56, %v4622_v29  ;;  %v2538_v26 = vsel %vm4837_vm5, %v2537_v14, %v775_v9 }
 0x28a   :  { %v1158_v7 = vmin.f32 %v1030_v21, 255.0  ;;  %v1031_v57 = vadd.f32 %v2538_v26, %v4685_v15  ;;  %v633_v12 = vsel %vm632_vm7, %v4669_v54, %v629_v8 }
 0x28b   :  { %1541 = vst [vmem:[#allocation5 + $0x368] sm:$0xff] %v1413_v55  ;;  %v4863_v37 = vsel %vm4842_vm6, %v637_v28, %v633_v12 }
 0x28c   :  { %v1286_v0 = vsub.f32 %v1158_v7, %v4685_v15  ;;  %v1159_v4 = vmin.f32 %v1031_v57, 255.0  ;;  %v655_v31 = vmul.f32 %v647_v48, %v4863_v37  ;;  %v776_v50 = vmul.f32 %v4863_v37, %v4536_v32 }
 0x28d   :  { %v777_v9 = vmul.f32 %v4863_v37, %v4538_v40  ;;  %v778_v41 = vmul.f32 %v4863_v37, %v4548_v53  ;;  %v4875_v54 = vmul.f32 %v4863_v37, %v4556_v36  ;;  %v4881_v32 = vmul.f32 %v4863_v37, %v4564_v27 }
 0x28e   :  { %v1414_v13 = vmul.f32 %v1286_v0, %v4622_v29  ;;  %v1287_v24 = vsub.f32 %v1159_v4, %v4685_v15  ;;  %v1635_v43 = vand.u32 2147483647, %v655_v31  ;;  %v1637_v59 = vcvt.f32.s32 %v655_v31 }
 0x28f   :  { %v1640_v39 = vand.u32 2147483648, %v655_v31  ;;  %v2539_v46 = vand.u32 2147483647, %v776_v50  ;;  %v2541_v2 = vcvt.f32.s32 %v776_v50  ;;  %v2544_v11 = vand.u32 2147483648, %v776_v50 }
 0x290   :  { %1542 = vst [vmem:[#allocation5 + $0x370] sm:$0xff] %v1414_v13  ;;  %v1415_v40 = vmul.f32 %v1287_v24, %v4622_v29  ;;  %v1638_v53 = vcvt.s32.f32 %v1637_v59  ;;  %v2547_v36 = vand.u32 2147483647, %v777_v9  ;;  %vm4884_vm8 = vcmp.lt.f32.partialorder %v1635_v43, 8388608.0 }
 0x291   :  { %vm4888_vm9 = vcmp.lt.f32.partialorder %v2539_v46, 8388608.0  ;;  %v2542_v25 = vcvt.s32.f32 %v2541_v2  ;;  %v2549_v3 = vcvt.f32.s32 %v777_v9  ;;  %v2552_v27 = vand.u32 2147483648, %v777_v9 }
 0x292   :  { %1543 = vst [vmem:[#allocation5 + $0x378] sm:$0xff] %v1415_v40  ;;  %v1639_v35 = vand.u32 2147483647, %v1638_v53  ;;  %v2555_v44 = vand.u32 2147483647, %v778_v41  ;;  %v2557_v38 = vcvt.f32.s32 %v778_v41  ;;  %vm4892_vm10 = vcmp.lt.f32.partialorder %v2547_v36, 8388608.0 }
 0x293   :  { %v2543_v61 = vand.u32 2147483647, %v2542_v25  ;;  %v2550_v33 = vcvt.s32.f32 %v2549_v3  ;;  %v2563_v62 = vand.u32 2147483647, %v4875_v54  ;;  %v2560_v22 = vand.u32 2147483648, %v778_v41 }
 0x294   :  { %v1641_v17 = vor.u32 %v1640_v39, %v1639_v35  ;;  %v2558_v30 = vcvt.s32.f32 %v2557_v38  ;;  %v2565_v49 = vcvt.f32.s32 %v4875_v54  ;;  %vm4898_vm11 = vcmp.lt.f32.partialorder %v2555_v44, 8388608.0 }
 0x295   :  { %v2545_v60 = vor.u32 %v2544_v11, %v2543_v61  ;;  %v2551_v23 = vand.u32 2147483647, %v2550_v33  ;;  %v2568_v19 = vand.u32 2147483648, %v4875_v54  ;;  %v2571_v21 = vand.u32 2147483647, %v4881_v32 }
 0x296   :  { %v4905_v56 = vsel %vm4884_vm8, %v1641_v17, %v655_v31  ;;  %v2559_v1 = vand.u32 2147483647, %v2558_v30  ;;  %v2566_v14 = vcvt.s32.f32 %v2565_v49  ;;  %vm4910_vm12 = vcmp.lt.f32.partialorder %v2563_v62, 8388608.0 }
 0x297   :  { %v2546_v8 = vsel %vm4888_vm9, %v2545_v60, %v776_v50  ;;  %v2553_v28 = vor.u32 %v2552_v27, %v2551_v23  ;;  %v2573_v55 = vcvt.f32.s32 %v4881_v32  ;;  %v2576_v12 = vand.u32 2147483648, %v4881_v32 }
 0x298   :  { %v1032_v26 = vadd.f32 %v2546_v8, %v4905_v56  ;;  %v2561_v7 = vor.u32 %v2560_v22, %v2559_v1  ;;  %v2567_v57 = vand.u32 2147483647, %v2566_v14  ;;  %vm4919_vm13 = vcmp.lt.f32.partialorder %v2571_v21, 8388608.0 }
 0x299   :  { %v2554_v0 = vsel %vm4892_vm10, %v2553_v28, %v777_v9  ;;  %v2574_v31 = vcvt.s32.f32 %v2573_v55  ;;  %v781_v50 = vmul.f32 %v4863_v37, %v4572_v42  ;;  %v782_v9 = vmul.f32 %v4863_v37, %v4578_v45 }
 0x29a   :  { %v1160_v13 = vmin.f32 %v1032_v26, 255.0  ;;  %v1033_v24 = vadd.f32 %v2554_v0, %v4905_v56  ;;  %v2562_v43 = vsel %vm4898_vm11, %v2561_v7, %v778_v41  ;;  %v2569_v59 = vor.u32 %v2568_v19, %v2567_v57 }
 0x29b   :  { %v1034_v39 = vadd.f32 %v2562_v43, %v4905_v56  ;;  %v2575_v46 = vand.u32 2147483647, %v2574_v31  ;;  %v2581_v2 = vcvt.f32.s32 %v781_v50  ;;  %v2579_v11 = vand.u32 2147483647, %v781_v50 }
 0x29c   :  { %v1288_v40 = vsub.f32 %v1160_v13, %v4905_v56  ;;  %v1161_v53 = vmin.f32 %v1033_v24, 255.0  ;;  %v2570_v42 = vsel %vm4910_vm12, %v2569_v59, %v4875_v54  ;;  %v2584_v15 = vand.u32 2147483648, %v781_v50 }
 0x29d   :  { %v1162_v36 = vmin.f32 %v1034_v39, 255.0  ;;  %v1035_v6 = vadd.f32 %v2570_v42, %v4905_v56  ;;  %v2577_v41 = vor.u32 %v2576_v12, %v2575_v46  ;;  %v2582_v35 = vcvt.s32.f32 %v2581_v2 }
 0x29e   :  { %v1416_v25 = vmul.f32 %v1288_v40, %v4633_v10  ;;  %v1289_v3 = vsub.f32 %v1161_v53, %v4905_v56  ;;  %v2587_v27 = vand.u32 2147483647, %v782_v9  ;;  %v2589_v54 = vcvt.f32.s32 %v782_v9 }
 0x29f   :  { %v1290_v45 = vsub.f32 %v1162_v36, %v4905_v56  ;;  %v1163_v44 = vmin.f32 %v1035_v6, 255.0  ;;  %v2578_v38 = vsel %vm4919_vm13, %v2577_v41, %v4881_v32  ;;  %vm4944_vm14 = vcmp.lt.f32.partialorder %v2579_v11, 8388608.0 }
 0x2a0   :  { %1544 = vst [vmem:[#allocation5 + $0x380] sm:$0xff] %v1416_v25  ;;  %v1417_v61 = vmul.f32 %v1289_v3, %v4633_v10  ;;  %v1036_v29 = vadd.f32 %v2578_v38, %v4905_v56  ;;  %v2583_v62 = vand.u32 2147483647, %v2582_v35  ;;  %v2590_v22 = vcvt.s32.f32 %v2589_v54 }
 0x2a1   :  { %v1418_v17 = vmul.f32 %v1290_v45, %v4633_v10  ;;  %v1291_v30 = vsub.f32 %v1163_v44, %v4905_v56  ;;  %v2592_v49 = vand.u32 2147483648, %v782_v9  ;;  %v783_v23 = vmul.f32 %v4863_v37, %v4583_v47 }
 0x2a2   :  { %1545 = vst [vmem:[#allocation5 + $0x388] sm:$0xff] %v1417_v61  ;;  %v1164_v60 = vmin.f32 %v1036_v29, 255.0  ;;  %v2585_v32 = vor.u32 %v2584_v15, %v2583_v62  ;;  %v784_v58 = vmul.f32 %v4863_v37, %v4588_v34  ;;  %vm4955_vm15 = vcmp.lt.f32.partialorder %v2587_v27, 8388608.0 }
 0x2a3   :  { %1546 = vst [vmem:[#allocation5 + $0x390] sm:$0xff] %v1418_v17  ;;  %v1419_v19 = vmul.f32 %v1291_v30, %v4633_v10  ;;  %v2591_v14 = vand.u32 2147483647, %v2590_v22  ;;  %v785_v21 = vmul.f32 %v4863_v37, %v4593_v20  ;;  %v2595_v47 = vand.u32 2147483647, %v783_v23 }
 0x2a4   :  { %v1292_v8 = vsub.f32 %v1164_v60, %v4905_v56  ;;  %v2586_v28 = vsel %vm4944_vm14, %v2585_v32, %v781_v50  ;;  %v2597_v48 = vcvt.f32.s32 %v783_v23  ;;  %v2603_v26 = vand.u32 2147483647, %v784_v58 }
 0x2a5   :  { %1547 = vst [vmem:[#allocation5 + $0x398] sm:$0xff] %v1419_v19  ;;  %v1037_v34 = vadd.f32 %v2586_v28, %v4905_v56  ;;  %v2593_v55 = vor.u32 %v2592_v49, %v2591_v14  ;;  %v786_v7 = vmul.f32 %v4863_v37, %v4597_v16  ;;  %v2600_v0 = vand.u32 2147483648, %v783_v23 }
 0x2a6   :  { %v1420_v57 = vmul.f32 %v1292_v8, %v4633_v10  ;;  %v2598_v12 = vcvt.s32.f32 %v2597_v48  ;;  %v2605_v20 = vcvt.f32.s32 %v784_v58  ;;  %vm4970_vm0 = vcmp.lt.f32.partialorder %v2595_v47, 8388608.0 }
 0x2a7   :  { %v1165_v4 = vmin.f32 %v1037_v34, 255.0  ;;  %v2594_v31 = vsel %vm4955_vm15, %v2593_v55, %v782_v9  ;;  %v2608_v13 = vand.u32 2147483648, %v784_v58  ;;  %v2611_v16 = vand.u32 2147483647, %v785_v21 }
 0x2a8   :  { %1548 = vst [vmem:[#allocation5 + $0x3a0] sm:$0xff] %v1420_v57  ;;  %v1038_v24 = vadd.f32 %v2594_v31, %v4905_v56  ;;  %v2599_v43 = vand.u32 2147483647, %v2598_v12  ;;  %v2606_v59 = vcvt.s32.f32 %v2605_v20  ;;  %vm4976_vm1 = vcmp.lt.f32.partialorder %v2603_v26, 8388608.0 }
 0x2a9   :  { %v1293_v39 = vsub.f32 %v1165_v4, %v4905_v56  ;;  %v2613_v2 = vcvt.f32.s32 %v785_v21  ;;  %v2616_v40 = vand.u32 2147483648, %v785_v21  ;;  %v2619_v11 = vand.u32 2147483647, %v786_v7 }
 0x2aa   :  { %v1166_v9 = vmin.f32 %v1038_v24, 255.0  ;;  %v2601_v53 = vor.u32 %v2600_v0, %v2599_v43  ;;  %v2607_v42 = vand.u32 2147483647, %v2606_v59  ;;  %vm4981_vm2 = vcmp.lt.f32.partialorder %v2611_v16, 8388608.0 }
 0x2ab   :  { %v1421_v36 = vmul.f32 %v1293_v39, %v4633_v10  ;;  %v2614_v41 = vcvt.s32.f32 %v2613_v2  ;;  %v2621_v15 = vcvt.f32.s32 %v786_v7  ;;  %v2624_v27 = vand.u32 2147483648, %v786_v7 }
 0x2ac   :  { %v1294_v25 = vsub.f32 %v1166_v9, %v4905_v56  ;;  %v2602_v3 = vsel %vm4970_vm0, %v2601_v53, %v783_v23  ;;  %v2609_v35 = vor.u32 %v2608_v13, %v2607_v42  ;;  %v787_v54 = vmul.f32 %v4863_v37, %v4601_v63 }
 0x2ad   :  { %1549 = vst [vmem:[#allocation5 + $0x3a8] sm:$0xff] %v1421_v36  ;;  %v1039_v45 = vadd.f32 %v2602_v3, %v4905_v56  ;;  %v2615_v44 = vand.u32 2147483647, %v2614_v41  ;;  %v2622_v38 = vcvt.s32.f32 %v2621_v15  ;;  %vm4994_vm3 = vcmp.lt.f32.partialorder %v2619_v11, 8388608.0 }
 0x2ae   :  { %v1422_v61 = vmul.f32 %v1294_v25, %v4633_v10  ;;  %v2610_v29 = vsel %vm4976_vm1, %v2609_v35, %v784_v58  ;;  %v788_v62 = vmul.f32 %v4863_v37, %v4605_v5  ;;  %v2627_v60 = vand.u32 2147483647, %v787_v54 }
 0x2af   :  { %v1167_v17 = vmin.f32 %v1039_v45, 255.0  ;;  %v1040_v30 = vadd.f32 %v2610_v29, %v4905_v56  ;;  %v2617_v22 = vor.u32 %v2616_v40, %v2615_v44  ;;  %v2623_v49 = vand.u32 2147483647, %v2622_v38 }
 0x2b0   :  { %1550 = vst [vmem:[#allocation5 + $0x3b0] sm:$0xff] %v1422_v61  ;;  %v2629_v63 = vcvt.f32.s32 %v787_v54  ;;  %v2635_v32 = vand.u32 2147483647, %v788_v62  ;;  %v789_v23 = vmul.f32 %v4863_v37, %v4609_v52  ;;  %vm5007_vm4 = vcmp.lt.f32.partialorder %v2627_v60, 8388608.0 }
 0x2b1   :  { %v1295_v58 = vsub.f32 %v1167_v17, %v4905_v56  ;;  %v1168_v19 = vmin.f32 %v1040_v30, 255.0  ;;  %v2618_v1 = vsel %vm4981_vm2, %v2617_v22, %v785_v21  ;;  %v2625_v14 = vor.u32 %v2624_v27, %v2623_v49 }
 0x2b2   :  { %v1041_v5 = vadd.f32 %v2618_v1, %v4905_v56  ;;  %v2630_v28 = vcvt.s32.f32 %v2629_v63  ;;  %v2632_v47 = vand.u32 2147483648, %v787_v54  ;;  %v2637_v55 = vcvt.f32.s32 %v788_v62 }
 0x2b3   :  { %v1423_v48 = vmul.f32 %v1295_v58, %v4633_v10  ;;  %v1296_v34 = vsub.f32 %v1168_v19, %v4905_v56  ;;  %v2626_v52 = vsel %vm4994_vm3, %v2625_v14, %v786_v7  ;;  %vm5016_vm5 = vcmp.lt.f32.partialorder %v2635_v32, 8388608.0 }
 0x2b4   :  { %v1169_v26 = vmin.f32 %v1041_v5, 255.0  ;;  %v1042_v21 = vadd.f32 %v2626_v52, %v4905_v56  ;;  %v2631_v57 = vand.u32 2147483647, %v2630_v28  ;;  %v2638_v20 = vcvt.s32.f32 %v2637_v55 }
 0x2b5   :  { %1551 = vst [vmem:[#allocation5 + $0x3b8] sm:$0xff] %v1423_v48  ;;  %v1424_v0 = vmul.f32 %v1296_v34, %v4633_v10  ;;  %v2640_v4 = vand.u32 2147483648, %v788_v62  ;;  %v2645_v31 = vcvt.f32.s32 %v789_v23  ;;  %v2643_v7 = vand.u32 2147483647, %v789_v23 }
 0x2b6   :  { %v1297_v50 = vsub.f32 %v1169_v26, %v4905_v56  ;;  %v1170_v13 = vmin.f32 %v1042_v21, 255.0  ;;  %v2633_v24 = vor.u32 %v2632_v47, %v2631_v57  ;;  %v2639_v43 = vand.u32 2147483647, %v2638_v20 }
 0x2b7   :  { %1552 = vst [vmem:[#allocation5 + $0x3c0] sm:$0xff] %v1424_v0  ;;  %v2646_v59 = vcvt.s32.f32 %v2645_v31  ;;  %v2648_v16 = vand.u32 2147483648, %v789_v23  ;;  %v790_v39 = vmul.f32 %v4863_v37, %v4613_v51  ;;  %v791_v9 = vmul.f32 %v4863_v37, %v4617_v18 }
 0x2b8   :  { %v1425_v46 = vmul.f32 %v1297_v50, %v4633_v10  ;;  %v1298_v2 = vsub.f32 %v1170_v13, %v4905_v56  ;;  %v2634_v40 = vsel %vm5007_vm4, %v2633_v24, %v787_v54  ;;  %v2641_v42 = vor.u32 %v2640_v4, %v2639_v43 }
 0x2b9   :  { %v1043_v53 = vadd.f32 %v2634_v40, %v4905_v56  ;;  %v2647_v11 = vand.u32 2147483647, %v2646_v59  ;;  %vm5032_vm6 = vcmp.lt.f32.partialorder %v2643_v7, 8388608.0  ;;  %v2653_v51 = vcvt.f32.s32 %v790_v39 }
 0x2ba   :  { %1553 = vst [vmem:[#allocation5 + $0x3c8] sm:$0xff] %v1425_v46  ;;  %v1426_v36 = vmul.f32 %v1298_v2, %v4633_v10  ;;  %v2642_v15 = vsel %vm5016_vm5, %v2641_v42, %v788_v62  ;;  %v2651_v3 = vand.u32 2147483647, %v790_v39  ;;  %v2656_v35 = vand.u32 2147483648, %v790_v39 }
 0x2bb   :  { %v1171_v41 = vmin.f32 %v1043_v53, 255.0  ;;  %v2649_v25 = vor.u32 %v2648_v16, %v2647_v11  ;;  %v1044_v18 = vadd.f32 %v2642_v15, %v4905_v56  ;;  %v2654_v37 = vcvt.s32.f32 %v2653_v51 }
 0x2bc   :  { %1554 = vst [vmem:[#allocation5 + $0x3d0] sm:$0xff] %v1426_v36  ;;  %v2661_v27 = vcvt.f32.s32 %v791_v9  ;;  %v2659_v38 = vand.u32 2147483647, %v791_v9  ;;  %v2664_v54 = vand.u32 2147483648, %v791_v9  ;;  %vm2652_vm7 = vcmp.lt.f32.partialorder %v2651_v3, 8388608.0 }
 0x2bd   :  { %v1299_v45 = vsub.f32 %v1171_v41, %v4905_v56  ;;  %v2650_v44 = vsel %vm5032_vm6, %v2649_v25, %v789_v23  ;;  %v1172_v61 = vmin.f32 %v1044_v18, 255.0  ;;  %v2655_v33 = vand.u32 2147483647, %v2654_v37 }
 0x2be   :  { %v1045_v29 = vadd.f32 %v2650_v44, %v4905_v56  ;;  %v2662_v62 = vcvt.s32.f32 %v2661_v27  ;;  %vm2660_vm8 = vcmp.lt.f32.partialorder %v2659_v38, 8388608.0 }
 0x2bf   :  { %v1427_v17 = vmul.f32 %v1299_v45, %v4633_v10  ;;  %v1300_v30 = vsub.f32 %v1172_v61, %v4905_v56  ;;  %v2657_v49 = vor.u32 %v2656_v35, %v2655_v33 }
 0x2c0   :  { %v1173_v22 = vmin.f32 %v1045_v29, 255.0  ;;  %v2663_v60 = vand.u32 2147483647, %v2662_v62 }
 0x2c1   :  { %1555 = vst [vmem:[#allocation5 + $0x3d8] sm:$0xff] %v1427_v17  ;;  %v1428_v63 = vmul.f32 %v1300_v30, %v4633_v10  ;;  %v2658_v23 = vsel %vm2652_vm7, %v2657_v49, %v790_v39 }
 0x2c2   :  { %v1301_v32 = vsub.f32 %v1173_v22, %v4905_v56  ;;  %v2665_v58 = vor.u32 %v2664_v54, %v2663_v60  ;;  %v1046_v19 = vadd.f32 %v2658_v23, %v4905_v56 }
 0x2c3   :  { %1556 = vst [vmem:[#allocation5 + $0x3e0] sm:$0xff] %v1428_v63 }
 0x2c4   :  { %v1429_v1 = vmul.f32 %v1301_v32, %v4633_v10  ;;  %v2666_v14 = vsel %vm2660_vm8, %v2665_v58, %v791_v9  ;;  %v1174_v5 = vmin.f32 %v1046_v19, 255.0 }
 0x2c5   :  { %v1047_v8 = vadd.f32 %v2666_v14, %v4905_v56 }
 0x2c6   :  { %1557 = vst [vmem:[#allocation5 + $0x3e8] sm:$0xff] %v1429_v1  ;;  %v1302_v28 = vsub.f32 %v1174_v5, %v4905_v56 }
 0x2c7   :  { %v1175_v47 = vmin.f32 %v1047_v8, 255.0 }
 0x2c8   :  { %v1430_v48 = vmul.f32 %v1302_v28, %v4633_v10 }
 0x2c9   :  { %v1303_v34 = vsub.f32 %v1175_v47, %v4905_v56 }
 0x2ca   :  { %1558 = vst [vmem:[#allocation5 + $0x3f0] sm:$0xff] %v1430_v48 }
 0x2cb   :  { %v1431_v52 = vmul.f32 %v1303_v34, %v4633_v10 }
 0x2cd   :  { %1559 = vst [vmem:[#allocation5 + $0x3f8] sm:$0xff] %v1431_v52 }
 0x2ce   :  { %1572 = dma.vmem_to_hbm [thread:$0]  %s1565_s13, 16384, %s1567_s16, [#allocation4], %s2743_s11, %s2743_s11, %s2744_s12  }
 0x2cf   :  { %2740 = dma.done.wait [#allocation4], 16384  }
 0x2d0   :  { %2741 = vsyncadd [#allocation4], 4294950912 }
 0x2d1   :  { %1577 = vsyncpa [#allocation3], 1 }
 0x2d2   :  { %1578 = vsyncpa [#allocation4], 1 }

</bundles_post_ra>
